<compile_context>
chip_gen: v5e
topology: v5e:2x2
jax: 0.10.0
libtpu: 0.0.40
codegen_flags: <defaults>
</compile_context>

<pallas_src>
import functools

import jax
import jax.numpy as jnp
from jax.experimental import pallas as pl
from jax.experimental.pallas import tpu as pltpu


_VMEM_LIMIT = 32 * 1024 * 1024   # explicit scoped-VMEM budget; safe on v5e / v6e / v7x


# ----------------------------------------------------------------------------- kernels
def _conv_pool_kernel(p_ref, w_ref, b_ref, o_ref, *, apply_relu):
    """Fused conv-as-matmul + 2x2 maxpool + bias (+ optional ReLU).

    p_ref: (4, bm, K)  im2col patches, one plane per 2x2 pooling position.
    w_ref: (K, Cout)   conv weights.   b_ref: (1, Cout) bias.
    o_ref: (bm, Cout)  pooled output rows ordered (n, pooled_h, pooled_w).
    """
    w = w_ref[...]
    y = jnp.dot(p_ref[0], w, preferred_element_type=jnp.float32)
    y = jnp.maximum(y, jnp.dot(p_ref[1], w, preferred_element_type=jnp.float32))
    y = jnp.maximum(y, jnp.dot(p_ref[2], w, preferred_element_type=jnp.float32))
    y = jnp.maximum(y, jnp.dot(p_ref[3], w, preferred_element_type=jnp.float32))
    # bias is identical across the four pool positions, so add it after the max
    y = y + b_ref[...]
    if apply_relu:
        y = jnp.maximum(y, 0.0)
    o_ref[...] = y.astype(o_ref.dtype)


def _fc_tail_kernel(x_ref, w1_ref, b1_ref, w2_ref, b2_ref,
                    wm_ref, bmean_ref, wls_ref, bls_ref,
                    mean_ref, logstd_ref):
    """linear1+ReLU -> linear2+ReLU -> mean head & log_std head (clamped to [-20, 2])."""
    h = jnp.dot(x_ref[...], w1_ref[...], preferred_element_type=jnp.float32) + b1_ref[...]
    h = jnp.maximum(h, 0.0)
    h = jnp.dot(h, w2_ref[...], preferred_element_type=jnp.float32) + b2_ref[...]
    h = jnp.maximum(h, 0.0)
    mean = jnp.dot(h, wm_ref[...], preferred_element_type=jnp.float32) + bmean_ref[...]
    log_std = jnp.dot(h, wls_ref[...], preferred_element_type=jnp.float32) + bls_ref[...]
    mean_ref[...] = mean.astype(mean_ref.dtype)
    logstd_ref[...] = jnp.clip(log_std, -20.0, 2.0).astype(logstd_ref.dtype)


# ----------------------------------------------------------------------------- wrappers
def _pick_block_m(m, target=512):
    """Largest multiple-of-8 divisor of m that is <= target (byte-budgeted tile), else m."""
    best = None
    for d in range(8, min(m, target) + 1, 8):
        if m % d == 0:
            best = d
    return best if best is not None else m


def _conv_pool(planes, w, b, *, apply_relu):
    """Fused conv (matmul over the 4 stacked pool-position planes) + maxpool + bias (+ReLU)."""
    _, m, k = planes.shape
    cout = w.shape[1]
    bm = _pick_block_m(m)
    grid = (m // bm,)
    kernel = functools.partial(_conv_pool_kernel, apply_relu=apply_relu)
    return pl.pallas_call(
        kernel,
        out_shape=jax.ShapeDtypeStruct((m, cout), jnp.float32),
        grid=grid,
        in_specs=[pl.BlockSpec((4, bm, k), lambda i: (0, i, 0)),
                  pl.BlockSpec((k, cout), lambda i: (0, 0)),
                  pl.BlockSpec((1, cout), lambda i: (0, 0))],
        out_specs=pl.BlockSpec((bm, cout), lambda i: (i, 0)),
        compiler_params=pltpu.CompilerParams(
            dimension_semantics=("parallel",),
            vmem_limit_bytes=_VMEM_LIMIT),
    )(planes, w, b)


def _fc_tail(feat, w1, b1, w2, b2, wm, bmean, wls, bls):
    """Single pallas_call for the whole FC tail; returns (mean, log_std)."""
    n = feat.shape[0]
    acts_dim = bmean.shape[-1]

    def full(a):
        return pl.BlockSpec(a.shape, lambda i: (0, 0))

    mean, log_std = pl.pallas_call(
        _fc_tail_kernel,
        out_shape=(jax.ShapeDtypeStruct((n, acts_dim), jnp.float32),
                   jax.ShapeDtypeStruct((n, acts_dim), jnp.float32)),
        grid=(1,),
        in_specs=[full(feat), full(w1), full(b1), full(w2), full(b2),
                  full(wm), full(bmean), full(wls), full(bls)],
        out_specs=(pl.BlockSpec((n, acts_dim), lambda i: (0, 0)),
                   pl.BlockSpec((n, acts_dim), lambda i: (0, 0))),
        compiler_params=pltpu.CompilerParams(
            dimension_semantics=("arbitrary",),
            vmem_limit_bytes=_VMEM_LIMIT),
    )(feat, w1, b1, w2, b2, wm, bmean, wls, bls)
    return mean, log_std


# ----------------------------------------------------------------------------- XLA glue
def _im2col_pool_planes(x, ksize, stride, out_h, out_w):
    """x: (N, H, W, C), already padded.  Returns the im2col patch matrix split into the
    four 2x2-maxpool position planes stacked as (4, N*(out_h//2)*(out_w//2), K*K*C).
    Rows ordered (n, pooled_h, pooled_w); K ordered (kh, kw, cin).  Pure XLA slice glue.
    """
    n, _, _, c = x.shape
    ph, pw = out_h // 2, out_w // 2
    planes = []
    for a in range(2):
        for b in range(2):
            taps = []
            for i in range(ksize):
                for j in range(ksize):
                    h0 = a * stride + i
                    w0 = b * stride + j
                    taps.append(
                        x[:, h0:h0 + 2 * stride * (ph - 1) + 1:2 * stride,
                             w0:w0 + 2 * stride * (pw - 1) + 1:2 * stride, :])
            p = jnp.stack(taps, axis=3)                    # (N, ph, pw, K*K, C)
            planes.append(p.reshape(n * ph * pw, ksize * ksize * c))
    return jnp.stack(planes, axis=0)                       # (4, M_pooled, K)


# ----------------------------------------------------------------------------- params
def init_params(key, acts_dim=10, num_filters=8, lin_1_dim=128, lin_2_dim=64):
    """PyTorch-convention parameters (Conv2d: (Cout,Cin,KH,KW); Linear: (out,in))."""
    ks = jax.random.split(key, 12)

    def w(k, shape, scale=0.05):
        return scale * jax.random.normal(k, shape, dtype=jnp.float32)

    return {
        "conv1_w": w(ks[0], (num_filters, 3, 9, 9)),
        "conv1_b": w(ks[1], (num_filters,)),
        "conv2_w": w(ks[2], (num_filters, num_filters, 4, 4)),
        "conv2_b": w(ks[3], (num_filters,)),
        "lin1_w": w(ks[4], (lin_1_dim, num_filters * 7 * 7)),
        "lin1_b": w(ks[5], (lin_1_dim,)),
        "lin2_w": w(ks[6], (lin_2_dim, lin_1_dim)),
        "lin2_b": w(ks[7], (lin_2_dim,)),
        "mean_w": w(ks[8], (acts_dim, lin_2_dim)),
        "mean_b": w(ks[9], (acts_dim,)),
        "logstd_w": w(ks[10], (acts_dim, lin_2_dim)),
        "logstd_b": w(ks[11], (acts_dim,)),
    }


def prepare_params(params, *, pov_scaling=255.0):
    """One-time (outside jit) layout prep: conv weights -> (KH*KW*Cin, Cout) with
    1/pov_scaling folded into conv1 (bf16); linear weights -> (in, out) with the PyTorch
    NCHW-flatten permutation folded into linear1; per-head weights kept separate."""
    f = params["conv1_b"].shape[0]
    lin1_out = params["lin1_b"].shape[0]

    w1 = params["conv1_w"].transpose(2, 3, 1, 0).reshape(9 * 9 * 3, f)
    w1 = (w1 / pov_scaling).astype(jnp.bfloat16)               # fold obs/255 into weights
    w2 = params["conv2_w"].transpose(2, 3, 1, 0).reshape(4 * 4 * f, f)

    # linear1 rows reordered from NCHW-flatten (c, ph, pw) to our row order (ph, pw, c)
    lin1 = params["lin1_w"].reshape(lin1_out, f, 7, 7).transpose(2, 3, 1, 0)
    lin1 = lin1.reshape(7 * 7 * f, lin1_out)
    lin2 = params["lin2_w"].T

    return {
        "conv1_w": w1, "conv1_b": params["conv1_b"].reshape(1, f),
        "conv2_w": w2, "conv2_b": params["conv2_b"].reshape(1, f),
        "lin1_w": lin1, "lin1_b": params["lin1_b"].reshape(1, -1),
        "lin2_w": lin2, "lin2_b": params["lin2_b"].reshape(1, -1),
        "mean_w": params["mean_w"].T, "mean_b": params["mean_b"].reshape(1, -1),
        "logstd_w": params["logstd_w"].T, "logstd_b": params["logstd_b"].reshape(1, -1),
    }


# ----------------------------------------------------------------------------- model
def actor_forward(prepped, obs):
    """obs: (N, 64, 64, 3) float32 pixels in [0, 255].  Returns (mean, log_std)."""
    n, h, w, c = obs.shape
    assert (h, w, c) == (64, 64, 3), "ActorNetwork expects 64x64x3 NHWC observations"
    f = prepped["conv1_b"].shape[-1]

    # conv1 (9x9, stride 1, pad 0; /255 folded into bf16 weights) + maxpool 2x2 + ReLU,
    # all in one fused kernel: 64 -> 56 -> 28.
    planes1 = _im2col_pool_planes(obs.astype(jnp.bfloat16), 9, 1, 56, 56)
    a1 = _conv_pool(planes1, prepped["conv1_w"], prepped["conv1_b"], apply_relu=True)

    # conv2 (4x4, stride 2, pad 1) + maxpool 2x2, fused: 28 -> 14 -> 7.
    # NO ReLU here: the PyTorch code flattens the pre-ReLU max_pool2 output.
    x2 = jnp.pad(a1.reshape(n, 28, 28, f), ((0, 0), (1, 1), (1, 1), (0, 0)))
    planes2 = _im2col_pool_planes(x2, 4, 2, 14, 14)
    a2 = _conv_pool(planes2, prepped["conv2_w"], prepped["conv2_b"], apply_relu=False)

    # flatten: the NCHW-flatten permutation is folded into lin1_w, so a reshape suffices.
    feat = a2.reshape(n, 7 * 7 * f)

    mean, log_std = _fc_tail(feat, prepped["lin1_w"], prepped["lin1_b"],
                             prepped["lin2_w"], prepped["lin2_b"],
                             prepped["mean_w"], prepped["mean_b"],
                             prepped["logstd_w"], prepped["logstd_b"])
    # TODO(synk): get_log_probs / get_action Normal sampling + tanh squashing are
    # stochastic and outside the forward pass; not implemented here.
    return mean, log_std


if __name__ == "__main__":
    key = jax.random.PRNGKey(0)
    kp, kx = jax.random.split(key)
    num_filters = 8
    acts_dim = 10

    params = init_params(kp, acts_dim=acts_dim, num_filters=num_filters)
    prepped = prepare_params(params)     # weight layout prep happens once, outside jit
    # obs is NHWC pixels in [0, 255]; spatial must be 64x64 so the conv/pool stack
    # yields the 7x7 feature map linear1 expects.
    obs = jax.random.uniform(kx, (2, 64, 64, 3), dtype=jnp.float32,
                             minval=0.0, maxval=255.0)

    fwd = jax.jit(actor_forward)
    mean, log_std = fwd(prepped, obs)
    jax.block_until_ready((mean, log_std))

    assert mean.shape == (2, acts_dim) and log_std.shape == (2, acts_dim)
    assert bool(jnp.all(jnp.isfinite(mean))) and bool(jnp.all(jnp.isfinite(log_std)))
    assert bool(jnp.all(log_std >= -20.0)) and bool(jnp.all(log_std <= 2.0))
    print("KERNEL_OK")
</pallas_src>

<mosaic_0001>
module attributes {stable_mosaic.version = 11 : i64} {
  func.func @_conv_pool_kernel(%arg0: i32, %arg1: memref<4x392x243xbf16, #tpu.memory_space<vmem>>, %arg2: memref<243x8xbf16, #tpu.memory_space<vmem>>, %arg3: memref<1x8xf32, #tpu.memory_space<vmem>>, %arg4: memref<392x8xf32, #tpu.memory_space<vmem>>) attributes {dimension_semantics = [#tpu.dimension_semantics<parallel>], iteration_bounds = array<i64: 4>, scalar_prefetch = 0 : i64, scratch_operands = 0 : i64, tpu.core_type = #tpu.core_type<tc>, window_params = [{transform_indices = @transform_0, window_bounds = array<i64: 4, 392, 243>}, {pipeline_mode = #tpu.pipeline_mode<synchronous>, transform_indices = @transform_1, window_bounds = array<i64: 243, 8>}, {pipeline_mode = #tpu.pipeline_mode<synchronous>, transform_indices = @transform_2, window_bounds = array<i64: 1, 8>}, {transform_indices = @transform_3, window_bounds = array<i64: 392, 8>}]} {
    %c0 = arith.constant 0 : index
    %c0_0 = arith.constant 0 : index
    %0 = vector.load %arg2[%c0, %c0_0] : memref<243x8xbf16, #tpu.memory_space<vmem>>, vector<243x8xbf16>
    %c0_1 = arith.constant 0 : index
    %c0_2 = arith.constant 0 : index
    %c0_3 = arith.constant 0 : index
    %1 = vector.load %arg1[%c0_1, %c0_2, %c0_3] : memref<4x392x243xbf16, #tpu.memory_space<vmem>>, vector<1x392x243xbf16>
    %2 = vector.shape_cast %1 : vector<1x392x243xbf16> to vector<392x243xbf16>
    %cst = arith.constant dense<0.000000e+00> : vector<392x8xf32>
    %3 = tpu.matmul %2, %0, %cst {dimension_numbers = #tpu.dot_dimension_numbers<[1], [0], [0], [1], [0, 0, 1, 1], [], []>} : vector<392x243xbf16>, vector<243x8xbf16>, vector<392x8xf32> -> vector<392x8xf32>
    %c1 = arith.constant 1 : index
    %c0_4 = arith.constant 0 : index
    %c0_5 = arith.constant 0 : index
    %4 = vector.load %arg1[%c1, %c0_4, %c0_5] : memref<4x392x243xbf16, #tpu.memory_space<vmem>>, vector<1x392x243xbf16>
    %5 = vector.shape_cast %4 : vector<1x392x243xbf16> to vector<392x243xbf16>
    %cst_6 = arith.constant dense<0.000000e+00> : vector<392x8xf32>
    %6 = tpu.matmul %5, %0, %cst_6 {dimension_numbers = #tpu.dot_dimension_numbers<[1], [0], [0], [1], [0, 0, 1, 1], [], []>} : vector<392x243xbf16>, vector<243x8xbf16>, vector<392x8xf32> -> vector<392x8xf32>
    %7 = arith.maximumf %3, %6 : vector<392x8xf32>
    %c2 = arith.constant 2 : index
    %c0_7 = arith.constant 0 : index
    %c0_8 = arith.constant 0 : index
    %8 = vector.load %arg1[%c2, %c0_7, %c0_8] : memref<4x392x243xbf16, #tpu.memory_space<vmem>>, vector<1x392x243xbf16>
    %9 = vector.shape_cast %8 : vector<1x392x243xbf16> to vector<392x243xbf16>
    %cst_9 = arith.constant dense<0.000000e+00> : vector<392x8xf32>
    %10 = tpu.matmul %9, %0, %cst_9 {dimension_numbers = #tpu.dot_dimension_numbers<[1], [0], [0], [1], [0, 0, 1, 1], [], []>} : vector<392x243xbf16>, vector<243x8xbf16>, vector<392x8xf32> -> vector<392x8xf32>
    %11 = arith.maximumf %7, %10 : vector<392x8xf32>
    %c3 = arith.constant 3 : index
    %c0_10 = arith.constant 0 : index
    %c0_11 = arith.constant 0 : index
    %12 = vector.load %arg1[%c3, %c0_10, %c0_11] : memref<4x392x243xbf16, #tpu.memory_space<vmem>>, vector<1x392x243xbf16>
    %13 = vector.shape_cast %12 : vector<1x392x243xbf16> to vector<392x243xbf16>
    %cst_12 = arith.constant dense<0.000000e+00> : vector<392x8xf32>
    %14 = tpu.matmul %13, %0, %cst_12 {dimension_numbers = #tpu.dot_dimension_numbers<[1], [0], [0], [1], [0, 0, 1, 1], [], []>} : vector<392x243xbf16>, vector<243x8xbf16>, vector<392x8xf32> -> vector<392x8xf32>
    %15 = arith.maximumf %11, %14 : vector<392x8xf32>
    %c0_13 = arith.constant 0 : index
    %c0_14 = arith.constant 0 : index
    %16 = vector.load %arg3[%c0_13, %c0_14] : memref<1x8xf32, #tpu.memory_space<vmem>>, vector<1x8xf32>
    %17 = vector.broadcast %16 : vector<1x8xf32> to vector<392x8xf32>
    %18 = arith.addf %15, %17 : vector<392x8xf32>
    %cst_15 = arith.constant 0.000000e+00 : f32
    %19 = vector.broadcast %cst_15 : f32 to vector<392x8xf32>
    %20 = arith.maximumf %18, %19 : vector<392x8xf32>
    %c0_16 = arith.constant 0 : index
    %c0_17 = arith.constant 0 : index
    %21 = vector.load %arg4[%c0_16, %c0_17] : memref<392x8xf32, #tpu.memory_space<vmem>>, vector<392x8xf32>
    tpu.vector_store %arg4[%c0_16, %c0_17], %20 {strides = array<i32>} : memref<392x8xf32, #tpu.memory_space<vmem>>, vector<392x8xf32>,
    return
  }
  func.func @transform_0(%arg0: i32) -> (i32, i32, i32) {
    %c0_i32 = arith.constant 0 : i32
    %c0_i32_0 = arith.constant 0 : i32
    %c0_i32_1 = arith.constant 0 : i32
    return %c0_i32, %arg0, %c0_i32_0 : i32, i32, i32
  }
  func.func @transform_1(%arg0: i32) -> (i32, i32) {
    %c0_i32 = arith.constant 0 : i32
    %c0_i32_0 = arith.constant 0 : i32
    %c0_i32_1 = arith.constant 0 : i32
    return %c0_i32, %c0_i32_0 : i32, i32
  }
  func.func @transform_2(%arg0: i32) -> (i32, i32) {
    %c0_i32 = arith.constant 0 : i32
    %c0_i32_0 = arith.constant 0 : i32
    %c0_i32_1 = arith.constant 0 : i32
    return %c0_i32, %c0_i32_0 : i32, i32
  }
  func.func @transform_3(%arg0: i32) -> (i32, i32) {
    %c0_i32 = arith.constant 0 : i32
    %c0_i32_0 = arith.constant 0 : i32
    return %arg0, %c0_i32 : i32, i32
  }
}

module attributes {stable_mosaic.version = 11 : i64} {
  func.func @_conv_pool_kernel(%arg0: i32, %arg1: memref<4x98x128xf32, #tpu.memory_space<vmem>>, %arg2: memref<128x8xf32, #tpu.memory_space<vmem>>, %arg3: memref<1x8xf32, #tpu.memory_space<vmem>>, %arg4: memref<98x8xf32, #tpu.memory_space<vmem>>) attributes {dimension_semantics = [#tpu.dimension_semantics<parallel>], iteration_bounds = array<i64: 1>, scalar_prefetch = 0 : i64, scratch_operands = 0 : i64, tpu.core_type = #tpu.core_type<tc>, window_params = [{transform_indices = @transform_0, window_bounds = array<i64: 4, 98, 128>}, {pipeline_mode = #tpu.pipeline_mode<synchronous>, transform_indices = @transform_1, window_bounds = array<i64: 128, 8>}, {pipeline_mode = #tpu.pipeline_mode<synchronous>, transform_indices = @transform_2, window_bounds = array<i64: 1, 8>}, {transform_indices = @transform_3, window_bounds = array<i64: 98, 8>}]} {
    %c0 = arith.constant 0 : index
    %c0_0 = arith.constant 0 : index
    %0 = vector.load %arg2[%c0, %c0_0] : memref<128x8xf32, #tpu.memory_space<vmem>>, vector<128x8xf32>
    %c0_1 = arith.constant 0 : index
    %c0_2 = arith.constant 0 : index
    %c0_3 = arith.constant 0 : index
    %1 = vector.load %arg1[%c0_1, %c0_2, %c0_3] : memref<4x98x128xf32, #tpu.memory_space<vmem>>, vector<1x98x128xf32>
    %2 = vector.shape_cast %1 : vector<1x98x128xf32> to vector<98x128xf32>
    %cst = arith.constant dense<0.000000e+00> : vector<98x8xf32>
    %3 = tpu.matmul %2, %0, %cst {dimension_numbers = #tpu.dot_dimension_numbers<[1], [0], [0], [1], [0, 0, 1, 1], [], []>} : vector<98x128xf32>, vector<128x8xf32>, vector<98x8xf32> -> vector<98x8xf32>
    %c1 = arith.constant 1 : index
    %c0_4 = arith.constant 0 : index
    %c0_5 = arith.constant 0 : index
    %4 = vector.load %arg1[%c1, %c0_4, %c0_5] : memref<4x98x128xf32, #tpu.memory_space<vmem>>, vector<1x98x128xf32>
    %5 = vector.shape_cast %4 : vector<1x98x128xf32> to vector<98x128xf32>
    %cst_6 = arith.constant dense<0.000000e+00> : vector<98x8xf32>
    %6 = tpu.matmul %5, %0, %cst_6 {dimension_numbers = #tpu.dot_dimension_numbers<[1], [0], [0], [1], [0, 0, 1, 1], [], []>} : vector<98x128xf32>, vector<128x8xf32>, vector<98x8xf32> -> vector<98x8xf32>
    %7 = arith.maximumf %3, %6 : vector<98x8xf32>
    %c2 = arith.constant 2 : index
    %c0_7 = arith.constant 0 : index
    %c0_8 = arith.constant 0 : index
    %8 = vector.load %arg1[%c2, %c0_7, %c0_8] : memref<4x98x128xf32, #tpu.memory_space<vmem>>, vector<1x98x128xf32>
    %9 = vector.shape_cast %8 : vector<1x98x128xf32> to vector<98x128xf32>
    %cst_9 = arith.constant dense<0.000000e+00> : vector<98x8xf32>
    %10 = tpu.matmul %9, %0, %cst_9 {dimension_numbers = #tpu.dot_dimension_numbers<[1], [0], [0], [1], [0, 0, 1, 1], [], []>} : vector<98x128xf32>, vector<128x8xf32>, vector<98x8xf32> -> vector<98x8xf32>
    %11 = arith.maximumf %7, %10 : vector<98x8xf32>
    %c3 = arith.constant 3 : index
    %c0_10 = arith.constant 0 : index
    %c0_11 = arith.constant 0 : index
    %12 = vector.load %arg1[%c3, %c0_10, %c0_11] : memref<4x98x128xf32, #tpu.memory_space<vmem>>, vector<1x98x128xf32>
    %13 = vector.shape_cast %12 : vector<1x98x128xf32> to vector<98x128xf32>
    %cst_12 = arith.constant dense<0.000000e+00> : vector<98x8xf32>
    %14 = tpu.matmul %13, %0, %cst_12 {dimension_numbers = #tpu.dot_dimension_numbers<[1], [0], [0], [1], [0, 0, 1, 1], [], []>} : vector<98x128xf32>, vector<128x8xf32>, vector<98x8xf32> -> vector<98x8xf32>
    %15 = arith.maximumf %11, %14 : vector<98x8xf32>
    %c0_13 = arith.constant 0 : index
    %c0_14 = arith.constant 0 : index
    %16 = vector.load %arg3[%c0_13, %c0_14] : memref<1x8xf32, #tpu.memory_space<vmem>>, vector<1x8xf32>
    %17 = vector.broadcast %16 : vector<1x8xf32> to vector<98x8xf32>
    %18 = arith.addf %15, %17 : vector<98x8xf32>
    %c0_15 = arith.constant 0 : index
    %c0_16 = arith.constant 0 : index
    %19 = vector.load %arg4[%c0_15, %c0_16] : memref<98x8xf32, #tpu.memory_space<vmem>>, vector<98x8xf32>
    tpu.vector_store %arg4[%c0_15, %c0_16], %18 {strides = array<i32>} : memref<98x8xf32, #tpu.memory_space<vmem>>, vector<98x8xf32>,
    return
  }
  func.func @transform_0(%arg0: i32) -> (i32, i32, i32) {
    %c0_i32 = arith.constant 0 : i32
    %c0_i32_0 = arith.constant 0 : i32
    %c0_i32_1 = arith.constant 0 : i32
    return %c0_i32, %arg0, %c0_i32_0 : i32, i32, i32
  }
  func.func @transform_1(%arg0: i32) -> (i32, i32) {
    %c0_i32 = arith.constant 0 : i32
    %c0_i32_0 = arith.constant 0 : i32
    %c0_i32_1 = arith.constant 0 : i32
    return %c0_i32, %c0_i32_0 : i32, i32
  }
  func.func @transform_2(%arg0: i32) -> (i32, i32) {
    %c0_i32 = arith.constant 0 : i32
    %c0_i32_0 = arith.constant 0 : i32
    %c0_i32_1 = arith.constant 0 : i32
    return %c0_i32, %c0_i32_0 : i32, i32
  }
  func.func @transform_3(%arg0: i32) -> (i32, i32) {
    %c0_i32 = arith.constant 0 : i32
    %c0_i32_0 = arith.constant 0 : i32
    return %arg0, %c0_i32 : i32, i32
  }
}

module attributes {stable_mosaic.version = 11 : i64} {
  func.func @_fc_tail_kernel(%arg0: i32, %arg1: memref<2x392xf32, #tpu.memory_space<vmem>>, %arg2: memref<392x128xf32, #tpu.memory_space<vmem>>, %arg3: memref<1x128xf32, #tpu.memory_space<vmem>>, %arg4: memref<128x64xf32, #tpu.memory_space<vmem>>, %arg5: memref<1x64xf32, #tpu.memory_space<vmem>>, %arg6: memref<64x10xf32, #tpu.memory_space<vmem>>, %arg7: memref<1x10xf32, #tpu.memory_space<vmem>>, %arg8: memref<64x10xf32, #tpu.memory_space<vmem>>, %arg9: memref<1x10xf32, #tpu.memory_space<vmem>>, %arg10: memref<2x10xf32, #tpu.memory_space<vmem>>, %arg11: memref<2x10xf32, #tpu.memory_space<vmem>>) attributes {dimension_semantics = [#tpu.dimension_semantics<arbitrary>], iteration_bounds = array<i64: 1>, scalar_prefetch = 0 : i64, scratch_operands = 0 : i64, tpu.core_type = #tpu.core_type<tc>, window_params = [{pipeline_mode = #tpu.pipeline_mode<synchronous>, transform_indices = @transform_0, window_bounds = array<i64: 2, 392>}, {pipeline_mode = #tpu.pipeline_mode<synchronous>, transform_indices = @transform_1, window_bounds = array<i64: 392, 128>}, {pipeline_mode = #tpu.pipeline_mode<synchronous>, transform_indices = @transform_2, window_bounds = array<i64: 1, 128>}, {pipeline_mode = #tpu.pipeline_mode<synchronous>, transform_indices = @transform_3, window_bounds = array<i64: 128, 64>}, {pipeline_mode = #tpu.pipeline_mode<synchronous>, transform_indices = @transform_4, window_bounds = array<i64: 1, 64>}, {pipeline_mode = #tpu.pipeline_mode<synchronous>, transform_indices = @transform_5, window_bounds = array<i64: 64, 10>}, {pipeline_mode = #tpu.pipeline_mode<synchronous>, transform_indices = @transform_6, window_bounds = array<i64: 1, 10>}, {pipeline_mode = #tpu.pipeline_mode<synchronous>, transform_indices = @transform_7, window_bounds = array<i64: 64, 10>}, {pipeline_mode = #tpu.pipeline_mode<synchronous>, transform_indices = @transform_8, window_bounds = array<i64: 1, 10>}, {pipeline_mode = #tpu.pipeline_mode<synchronous>, transform_indices = @transform_9, window_bounds = array<i64: 2, 10>}, {pipeline_mode = #tpu.pipeline_mode<synchronous>, transform_indices = @transform_10, window_bounds = array<i64: 2, 10>}]} {
    %c0 = arith.constant 0 : index
    %c0_0 = arith.constant 0 : index
    %0 = vector.load %arg1[%c0, %c0_0] : memref<2x392xf32, #tpu.memory_space<vmem>>, vector<2x392xf32>
    %c0_1 = arith.constant 0 : index
    %c0_2 = arith.constant 0 : index
    %1 = vector.load %arg2[%c0_1, %c0_2] : memref<392x128xf32, #tpu.memory_space<vmem>>, vector<392x128xf32>
    %cst = arith.constant dense<0.000000e+00> : vector<2x128xf32>
    %2 = tpu.matmul %0, %1, %cst {dimension_numbers = #tpu.dot_dimension_numbers<[1], [0], [0], [1], [0, 0, 1, 1], [], []>} : vector<2x392xf32>, vector<392x128xf32>, vector<2x128xf32> -> vector<2x128xf32>
    %c0_3 = arith.constant 0 : index
    %c0_4 = arith.constant 0 : index
    %3 = vector.load %arg3[%c0_3, %c0_4] : memref<1x128xf32, #tpu.memory_space<vmem>>, vector<1x128xf32>
    %4 = vector.broadcast %3 : vector<1x128xf32> to vector<2x128xf32>
    %5 = arith.addf %2, %4 : vector<2x128xf32>
    %cst_5 = arith.constant 0.000000e+00 : f32
    %6 = vector.broadcast %cst_5 : f32 to vector<2x128xf32>
    %7 = arith.maximumf %5, %6 : vector<2x128xf32>
    %c0_6 = arith.constant 0 : index
    %c0_7 = arith.constant 0 : index
    %8 = vector.load %arg4[%c0_6, %c0_7] : memref<128x64xf32, #tpu.memory_space<vmem>>, vector<128x64xf32>
    %cst_8 = arith.constant dense<0.000000e+00> : vector<2x64xf32>
    %9 = tpu.matmul %7, %8, %cst_8 {dimension_numbers = #tpu.dot_dimension_numbers<[1], [0], [0], [1], [0, 0, 1, 1], [], []>} : vector<2x128xf32>, vector<128x64xf32>, vector<2x64xf32> -> vector<2x64xf32>
    %c0_9 = arith.constant 0 : index
    %c0_10 = arith.constant 0 : index
    %10 = vector.load %arg5[%c0_9, %c0_10] : memref<1x64xf32, #tpu.memory_space<vmem>>, vector<1x64xf32>
    %11 = vector.broadcast %10 : vector<1x64xf32> to vector<2x64xf32>
    %12 = arith.addf %9, %11 : vector<2x64xf32>
    %cst_11 = arith.constant 0.000000e+00 : f32
    %13 = vector.broadcast %cst_11 : f32 to vector<2x64xf32>
    %14 = arith.maximumf %12, %13 : vector<2x64xf32>
    %c0_12 = arith.constant 0 : index
    %c0_13 = arith.constant 0 : index
    %15 = vector.load %arg6[%c0_12, %c0_13] : memref<64x10xf32, #tpu.memory_space<vmem>>, vector<64x10xf32>
    %cst_14 = arith.constant dense<0.000000e+00> : vector<2x10xf32>
    %16 = tpu.matmul %14, %15, %cst_14 {dimension_numbers = #tpu.dot_dimension_numbers<[1], [0], [0], [1], [0, 0, 1, 1], [], []>} : vector<2x64xf32>, vector<64x10xf32>, vector<2x10xf32> -> vector<2x10xf32>
    %c0_15 = arith.constant 0 : index
    %c0_16 = arith.constant 0 : index
    %17 = vector.load %arg7[%c0_15, %c0_16] : memref<1x10xf32, #tpu.memory_space<vmem>>, vector<1x10xf32>
    %18 = vector.broadcast %17 : vector<1x10xf32> to vector<2x10xf32>
    %19 = arith.addf %16, %18 : vector<2x10xf32>
    %c0_17 = arith.constant 0 : index
    %c0_18 = arith.constant 0 : index
    %20 = vector.load %arg8[%c0_17, %c0_18] : memref<64x10xf32, #tpu.memory_space<vmem>>, vector<64x10xf32>
    %cst_19 = arith.constant dense<0.000000e+00> : vector<2x10xf32>
    %21 = tpu.matmul %14, %20, %cst_19 {dimension_numbers = #tpu.dot_dimension_numbers<[1], [0], [0], [1], [0, 0, 1, 1], [], []>} : vector<2x64xf32>, vector<64x10xf32>, vector<2x10xf32> -> vector<2x10xf32>
    %c0_20 = arith.constant 0 : index
    %c0_21 = arith.constant 0 : index
    %22 = vector.load %arg9[%c0_20, %c0_21] : memref<1x10xf32, #tpu.memory_space<vmem>>, vector<1x10xf32>
    %23 = vector.broadcast %22 : vector<1x10xf32> to vector<2x10xf32>
    %24 = arith.addf %21, %23 : vector<2x10xf32>
    %c0_22 = arith.constant 0 : index
    %c0_23 = arith.constant 0 : index
    %25 = vector.load %arg10[%c0_22, %c0_23] : memref<2x10xf32, #tpu.memory_space<vmem>>, vector<2x10xf32>
    tpu.vector_store %arg10[%c0_22, %c0_23], %19 {strides = array<i32>} : memref<2x10xf32, #tpu.memory_space<vmem>>, vector<2x10xf32>,
    %cst_24 = arith.constant -2.000000e+01 : f32
    %cst_25 = arith.constant 2.000000e+00 : f32
    %26 = vector.broadcast %cst_24 : f32 to vector<2x10xf32>
    %27 = arith.maximumf %26, %24 : vector<2x10xf32>
    %28 = vector.broadcast %cst_25 : f32 to vector<2x10xf32>
    %29 = arith.minimumf %28, %27 : vector<2x10xf32>
    %c0_26 = arith.constant 0 : index
    %c0_27 = arith.constant 0 : index
    %30 = vector.load %arg11[%c0_26, %c0_27] : memref<2x10xf32, #tpu.memory_space<vmem>>, vector<2x10xf32>
    tpu.vector_store %arg11[%c0_26, %c0_27], %29 {strides = array<i32>} : memref<2x10xf32, #tpu.memory_space<vmem>>, vector<2x10xf32>,
    return
  }
  func.func @transform_0(%arg0: i32) -> (i32, i32) {
    %c0_i32 = arith.constant 0 : i32
    %c0_i32_0 = arith.constant 0 : i32
    %c0_i32_1 = arith.constant 0 : i32
    return %c0_i32, %c0_i32_0 : i32, i32
  }
  func.func @transform_1(%arg0: i32) -> (i32, i32) {
    %c0_i32 = arith.constant 0 : i32
    %c0_i32_0 = arith.constant 0 : i32
    %c0_i32_1 = arith.constant 0 : i32
    return %c0_i32, %c0_i32_0 : i32, i32
  }
  func.func @transform_2(%arg0: i32) -> (i32, i32) {
    %c0_i32 = arith.constant 0 : i32
    %c0_i32_0 = arith.constant 0 : i32
    %c0_i32_1 = arith.constant 0 : i32
    return %c0_i32, %c0_i32_0 : i32, i32
  }
  func.func @transform_3(%arg0: i32) -> (i32, i32) {
    %c0_i32 = arith.constant 0 : i32
    %c0_i32_0 = arith.constant 0 : i32
    %c0_i32_1 = arith.constant 0 : i32
    return %c0_i32, %c0_i32_0 : i32, i32
  }
  func.func @transform_4(%arg0: i32) -> (i32, i32) {
    %c0_i32 = arith.constant 0 : i32
    %c0_i32_0 = arith.constant 0 : i32
    %c0_i32_1 = arith.constant 0 : i32
    return %c0_i32, %c0_i32_0 : i32, i32
  }
  func.func @transform_5(%arg0: i32) -> (i32, i32) {
    %c0_i32 = arith.constant 0 : i32
    %c0_i32_0 = arith.constant 0 : i32
    %c0_i32_1 = arith.constant 0 : i32
    return %c0_i32, %c0_i32_0 : i32, i32
  }
  func.func @transform_6(%arg0: i32) -> (i32, i32) {
    %c0_i32 = arith.constant 0 : i32
    %c0_i32_0 = arith.constant 0 : i32
    %c0_i32_1 = arith.constant 0 : i32
    return %c0_i32, %c0_i32_0 : i32, i32
  }
  func.func @transform_7(%arg0: i32) -> (i32, i32) {
    %c0_i32 = arith.constant 0 : i32
    %c0_i32_0 = arith.constant 0 : i32
    %c0_i32_1 = arith.constant 0 : i32
    return %c0_i32, %c0_i32_0 : i32, i32
  }
  func.func @transform_8(%arg0: i32) -> (i32, i32) {
    %c0_i32 = arith.constant 0 : i32
    %c0_i32_0 = arith.constant 0 : i32
    %c0_i32_1 = arith.constant 0 : i32
    return %c0_i32, %c0_i32_0 : i32, i32
  }
  func.func @transform_9(%arg0: i32) -> (i32, i32) {
    %c0_i32 = arith.constant 0 : i32
    %c0_i32_0 = arith.constant 0 : i32
    %c0_i32_1 = arith.constant 0 : i32
    return %c0_i32, %c0_i32_0 : i32, i32
  }
  func.func @transform_10(%arg0: i32) -> (i32, i32) {
    %c0_i32 = arith.constant 0 : i32
    %c0_i32_0 = arith.constant 0 : i32
    %c0_i32_1 = arith.constant 0 : i32
    return %c0_i32, %c0_i32_0 : i32, i32
  }
}

</mosaic_0001>

<bundles_post_ra>
// kernel: actor_forward.3
= control target key start
LH: loop header
LB: loop body
LE: loop exit
PB: predicated region body
PF: predicated region fallthrough
CT: control target
= control target key end

     0   :  { %s5303_s12 = smov 0   ;;  %s5305_s13 = smov 0   ;;  %s6985_s0 = inlined_call_operand.vmem [shape: bf16[4,1568,243], index: 0, kind: input, shape index: {}]   ;;  %s6986_s1 = inlined_call_operand.vmem [shape: bf16[243,8], index: 1, kind: input, shape index: {}]   ;;  %s6987_s2 = inlined_call_operand.vmem [shape: f32[1,8], index: 2, kind: input, shape index: {}]   ;;  %s6988_s3 = inlined_call_operand.vmem [shape: f32[1568,8], index: 3, kind: output, shape index: {}]  }
   0x1   :  { %s5307_s14 = smov 0  }
   0x2 LB: > { %s3934_s15 = sadd.s32 4294967295, %s5280_s14   ;;  %s5320_s16 = sadd.s32 1, %s5280_s14   ;;  %s5280_s14 = sphi %s5307_s14, %s7202_s14   ;;  %s5276_s13 = sphi %s5305_s13, %s7201_s13   ;;  %s5272_s12 = sphi %s5303_s12, %s7200_s12  }
   0x3   : > { %s17_s17 = ssub.s32 %s5280_s14, %s5320_s16  ;;  %s20_s18 = sadd.s32 1, %s5276_s13 }
   0x4   : > { %p18_p0 = scmp.eq.s32.totalorder %s17_s17, 0  ;;  %p27_p1 = scmp.ne.s32.totalorder %s5276_s13, %s5272_s12 }
   0x5   : > { %p28_p2 = scmp.eq.s32.totalorder %s5280_s14, 0  ;;  %p3937_p4 = scmp.ge.s32.totalorder %s5280_s14, 4 }
   0x6   : > { %s5329_s19 = scalar_select %p18_p0, %s5276_s13, %s20_s18  }
   0x7   : > { %p29_p3 = por %p28_p2, %p27_p1  ;;  %127 = sbr.rel (%p3937_p4) target bundleno = 213 (0xd5), region = 24 }
   0xc   : > { %130 = sbr.rel (!%p29_p3) target bundleno = 213 (0xd5), region = 28  ;;  %s132_s20 = sand.u32 (%p29_p3), 1, %s5276_s13  }
   0xd   : > { %s5228_s21 = smul.u32 (%p29_p3), 392, %s5280_s14 }
   0xe   : > { %s5229_s22 = smul.u32 (%p29_p3), 1568, %s132_s20 }
   0xf   : > { %s5337_s25 = scalar_lea.vmem (%p29_p3), %s6985_s0, %s5228_s21 }
  0x10   : > { %v557_v0 = vld [vmem:[%s5337_s25] sm:$0xff] (%p29_p3)  ;;  %v559_v1 = vld [vmem:[%s5337_s25 + $0x8] sm:$0xff] (%p29_p3)  ;;  %v561_v2 = vld [vmem:[%s5337_s25 + $0x10] sm:$0xff] (%p29_p3)  ;;  %s5342_s26 = scalar_lea.vmem (%p29_p3), [#allocation2], %s5229_s22 }
  0x11   : > { %558 = vst [vmem:[%s5342_s26] sm:$0xff] %v557_v0  ;;  %v563_v3 = vld [vmem:[%s5337_s25 + $0x18] sm:$0xff]  ;;  %v565_v4 = vld [vmem:[%s5337_s25 + $0x20] sm:$0xff]  ;;  %v567_v5 = vld [vmem:[%s5337_s25 + $0x28] sm:$0xff] }
  0x12   : > { %560 = vst [vmem:[%s5342_s26 + $0x8] sm:$0xff] %v559_v1  ;;  %v569_v6 = vld [vmem:[%s5337_s25 + $0x30] sm:$0xff]  ;;  %v571_v7 = vld [vmem:[%s5337_s25 + $0x38] sm:$0xff]  ;;  %v573_v8 = vld [vmem:[%s5337_s25 + $0x40] sm:$0xff] }
  0x13   : > { %562 = vst [vmem:[%s5342_s26 + $0x10] sm:$0xff] %v561_v2  ;;  %v575_v9 = vld [vmem:[%s5337_s25 + $0x48] sm:$0xff]  ;;  %v577_v10 = vld [vmem:[%s5337_s25 + $0x50] sm:$0xff]  ;;  %v579_v11 = vld [vmem:[%s5337_s25 + $0x58] sm:$0xff] }
  0x14   : > { %564 = vst [vmem:[%s5342_s26 + $0x18] sm:$0xff] %v563_v3  ;;  %v581_v12 = vld [vmem:[%s5337_s25 + $0x60] sm:$0xff]  ;;  %v583_v13 = vld [vmem:[%s5337_s25 + $0x68] sm:$0xff]  ;;  %v585_v14 = vld [vmem:[%s5337_s25 + $0x70] sm:$0xff] }
  0x15   : > { %566 = vst [vmem:[%s5342_s26 + $0x20] sm:$0xff] %v565_v4  ;;  %v587_v15 = vld [vmem:[%s5337_s25 + $0x78] sm:$0xff]  ;;  %v589_v16 = vld [vmem:[%s5337_s25 + $0x80] sm:$0xff]  ;;  %v591_v17 = vld [vmem:[%s5337_s25 + $0x88] sm:$0xff] }
  0x16   : > { %568 = vst [vmem:[%s5342_s26 + $0x28] sm:$0xff] %v567_v5  ;;  %v593_v18 = vld [vmem:[%s5337_s25 + $0x90] sm:$0xff]  ;;  %v595_v19 = vld [vmem:[%s5337_s25 + $0x98] sm:$0xff]  ;;  %v597_v20 = vld [vmem:[%s5337_s25 + $0xa0] sm:$0xff] }
  0x17   : > { %570 = vst [vmem:[%s5342_s26 + $0x30] sm:$0xff] %v569_v6  ;;  %v599_v21 = vld [vmem:[%s5337_s25 + $0xa8] sm:$0xff]  ;;  %v601_v22 = vld [vmem:[%s5337_s25 + $0xb0] sm:$0xff]  ;;  %v603_v23 = vld [vmem:[%s5337_s25 + $0xb8] sm:$0xff] }
  0x18   : > { %572 = vst [vmem:[%s5342_s26 + $0x38] sm:$0xff] %v571_v7  ;;  %v605_v24 = vld [vmem:[%s5337_s25 + $0xc0] sm:$0xff]  ;;  %v607_v25 = vld [vmem:[%s5337_s25 + $0xc8] sm:$0xff]  ;;  %v609_v26 = vld [vmem:[%s5337_s25 + $0xd0] sm:$0xff] }
  0x19   : > { %574 = vst [vmem:[%s5342_s26 + $0x40] sm:$0xff] %v573_v8  ;;  %v611_v27 = vld [vmem:[%s5337_s25 + $0xd8] sm:$0xff]  ;;  %v613_v28 = vld [vmem:[%s5337_s25 + $0xe0] sm:$0xff]  ;;  %v615_v29 = vld [vmem:[%s5337_s25 + $0xe8] sm:$0xff] }
  0x1a   : > { %576 = vst [vmem:[%s5342_s26 + $0x48] sm:$0xff] %v575_v9  ;;  %v617_v30 = vld [vmem:[%s5337_s25 + $0xf0] sm:$0xff]  ;;  %v619_v31 = vld [vmem:[%s5337_s25 + $0xf8] sm:$0xff]  ;;  %v621_v32 = vld [vmem:[%s5337_s25 + $0x100] sm:$0xff] }
  0x1b   : > { %578 = vst [vmem:[%s5342_s26 + $0x50] sm:$0xff] %v577_v10  ;;  %v623_v33 = vld [vmem:[%s5337_s25 + $0x108] sm:$0xff]  ;;  %v625_v34 = vld [vmem:[%s5337_s25 + $0x110] sm:$0xff]  ;;  %v627_v35 = vld [vmem:[%s5337_s25 + $0x118] sm:$0xff] }
  0x1c   : > { %580 = vst [vmem:[%s5342_s26 + $0x58] sm:$0xff] %v579_v11  ;;  %v629_v36 = vld [vmem:[%s5337_s25 + $0x120] sm:$0xff]  ;;  %v631_v37 = vld [vmem:[%s5337_s25 + $0x128] sm:$0xff]  ;;  %v633_v38 = vld [vmem:[%s5337_s25 + $0x130] sm:$0xff] }
  0x1d   : > { %582 = vst [vmem:[%s5342_s26 + $0x60] sm:$0xff] %v581_v12  ;;  %v635_v39 = vld [vmem:[%s5337_s25 + $0x138] sm:$0xff]  ;;  %v637_v40 = vld [vmem:[%s5337_s25 + $0x140] sm:$0xff]  ;;  %v639_v41 = vld [vmem:[%s5337_s25 + $0x148] sm:$0xff] }
  0x1e   : > { %584 = vst [vmem:[%s5342_s26 + $0x68] sm:$0xff] %v583_v13  ;;  %v641_v42 = vld [vmem:[%s5337_s25 + $0x150] sm:$0xff]  ;;  %v643_v43 = vld [vmem:[%s5337_s25 + $0x158] sm:$0xff]  ;;  %v645_v44 = vld [vmem:[%s5337_s25 + $0x160] sm:$0xff] }
  0x1f   : > { %586 = vst [vmem:[%s5342_s26 + $0x70] sm:$0xff] %v585_v14  ;;  %v647_v45 = vld [vmem:[%s5337_s25 + $0x168] sm:$0xff]  ;;  %v649_v46 = vld [vmem:[%s5337_s25 + $0x170] sm:$0xff]  ;;  %v651_v47 = vld [vmem:[%s5337_s25 + $0x178] sm:$0xff] }
  0x20   : > { %588 = vst [vmem:[%s5342_s26 + $0x78] sm:$0xff] %v587_v15  ;;  %v653_v48 = vld [vmem:[%s5337_s25 + $0x180] sm:$0xff]  ;;  %v657_v50 = vld [vmem:[%s5337_s25 + $0x628] sm:$0xff]  ;;  %v659_v51 = vld [vmem:[%s5337_s25 + $0x630] sm:$0xff] }
  0x21   : > { %590 = vst [vmem:[%s5342_s26 + $0x80] sm:$0xff] %v589_v16  ;;  %v655_v49 = vld [vmem:[%s5337_s25 + $0x620] sm:$0xff]  ;;  %v661_v52 = vld [vmem:[%s5337_s25 + $0x638] sm:$0xff]  ;;  %v665_v54 = vld [vmem:[%s5337_s25 + $0x648] sm:$0xff] }
  0x22   : > { %592 = vst [vmem:[%s5342_s26 + $0x88] sm:$0xff] %v591_v17  ;;  %v663_v53 = vld [vmem:[%s5337_s25 + $0x640] sm:$0xff]  ;;  %v667_v55 = vld [vmem:[%s5337_s25 + $0x650] sm:$0xff]  ;;  %v669_v56 = vld [vmem:[%s5337_s25 + $0x658] sm:$0xff] }
  0x23   : > { %594 = vst [vmem:[%s5342_s26 + $0x90] sm:$0xff] %v593_v18  ;;  %v671_v57 = vld [vmem:[%s5337_s25 + $0x660] sm:$0xff]  ;;  %v673_v58 = vld [vmem:[%s5337_s25 + $0x668] sm:$0xff]  ;;  %v675_v59 = vld [vmem:[%s5337_s25 + $0x670] sm:$0xff] }
  0x24   : > { %596 = vst [vmem:[%s5342_s26 + $0x98] sm:$0xff] %v595_v19  ;;  %v677_v60 = vld [vmem:[%s5337_s25 + $0x678] sm:$0xff]  ;;  %v679_v61 = vld [vmem:[%s5337_s25 + $0x680] sm:$0xff]  ;;  %v681_v62 = vld [vmem:[%s5337_s25 + $0x688] sm:$0xff] }
  0x25   : > { %598 = vst [vmem:[%s5342_s26 + $0xa0] sm:$0xff] %v597_v20  ;;  %v683_v63 = vld [vmem:[%s5337_s25 + $0x690] sm:$0xff]  ;;  %v685_v0 = vld [vmem:[%s5337_s25 + $0x698] sm:$0xff]  ;;  %v687_v1 = vld [vmem:[%s5337_s25 + $0x6a0] sm:$0xff] }
  0x26   : > { %600 = vst [vmem:[%s5342_s26 + $0xa8] sm:$0xff] %v599_v21  ;;  %v689_v2 = vld [vmem:[%s5337_s25 + $0x6a8] sm:$0xff]  ;;  %v691_v3 = vld [vmem:[%s5337_s25 + $0x6b0] sm:$0xff]  ;;  %v693_v4 = vld [vmem:[%s5337_s25 + $0x6b8] sm:$0xff] }
  0x27   : > { %602 = vst [vmem:[%s5342_s26 + $0xb0] sm:$0xff] %v601_v22  ;;  %v695_v5 = vld [vmem:[%s5337_s25 + $0x6c0] sm:$0xff]  ;;  %v697_v6 = vld [vmem:[%s5337_s25 + $0x6c8] sm:$0xff]  ;;  %v699_v7 = vld [vmem:[%s5337_s25 + $0x6d0] sm:$0xff] }
  0x28   : > { %604 = vst [vmem:[%s5342_s26 + $0xb8] sm:$0xff] %v603_v23  ;;  %v701_v8 = vld [vmem:[%s5337_s25 + $0x6d8] sm:$0xff]  ;;  %v703_v9 = vld [vmem:[%s5337_s25 + $0x6e0] sm:$0xff]  ;;  %v705_v10 = vld [vmem:[%s5337_s25 + $0x6e8] sm:$0xff] }
  0x29   : > { %606 = vst [vmem:[%s5342_s26 + $0xc0] sm:$0xff] %v605_v24  ;;  %v707_v11 = vld [vmem:[%s5337_s25 + $0x6f0] sm:$0xff]  ;;  %v709_v12 = vld [vmem:[%s5337_s25 + $0x6f8] sm:$0xff]  ;;  %v711_v13 = vld [vmem:[%s5337_s25 + $0x700] sm:$0xff] }
  0x2a   : > { %608 = vst [vmem:[%s5342_s26 + $0xc8] sm:$0xff] %v607_v25  ;;  %v713_v14 = vld [vmem:[%s5337_s25 + $0x708] sm:$0xff]  ;;  %v715_v15 = vld [vmem:[%s5337_s25 + $0x710] sm:$0xff]  ;;  %v717_v16 = vld [vmem:[%s5337_s25 + $0x718] sm:$0xff] }
  0x2b   : > { %610 = vst [vmem:[%s5342_s26 + $0xd0] sm:$0xff] %v609_v26  ;;  %v719_v17 = vld [vmem:[%s5337_s25 + $0x720] sm:$0xff]  ;;  %v721_v18 = vld [vmem:[%s5337_s25 + $0x728] sm:$0xff]  ;;  %v723_v19 = vld [vmem:[%s5337_s25 + $0x730] sm:$0xff] }
  0x2c   : > { %612 = vst [vmem:[%s5342_s26 + $0xd8] sm:$0xff] %v611_v27  ;;  %v725_v20 = vld [vmem:[%s5337_s25 + $0x738] sm:$0xff]  ;;  %v727_v21 = vld [vmem:[%s5337_s25 + $0x740] sm:$0xff]  ;;  %v729_v22 = vld [vmem:[%s5337_s25 + $0x748] sm:$0xff] }
  0x2d   : > { %614 = vst [vmem:[%s5342_s26 + $0xe0] sm:$0xff] %v613_v28  ;;  %v731_v23 = vld [vmem:[%s5337_s25 + $0x750] sm:$0xff]  ;;  %v733_v24 = vld [vmem:[%s5337_s25 + $0x758] sm:$0xff]  ;;  %v735_v25 = vld [vmem:[%s5337_s25 + $0x760] sm:$0xff] }
  0x2e   : > { %616 = vst [vmem:[%s5342_s26 + $0xe8] sm:$0xff] %v615_v29  ;;  %v737_v26 = vld [vmem:[%s5337_s25 + $0x768] sm:$0xff]  ;;  %v739_v27 = vld [vmem:[%s5337_s25 + $0x770] sm:$0xff]  ;;  %v741_v28 = vld [vmem:[%s5337_s25 + $0x778] sm:$0xff] }
  0x2f   : > { %618 = vst [vmem:[%s5342_s26 + $0xf0] sm:$0xff] %v617_v30  ;;  %v743_v29 = vld [vmem:[%s5337_s25 + $0x780] sm:$0xff]  ;;  %v745_v30 = vld [vmem:[%s5337_s25 + $0x788] sm:$0xff] }
  0x30   : > { %620 = vst [vmem:[%s5342_s26 + $0xf8] sm:$0xff] %v619_v31  ;;  %v747_v31 = vld [vmem:[%s5337_s25 + $0x790] sm:$0xff] }
  0x31   : > { %622 = vst [vmem:[%s5342_s26 + $0x100] sm:$0xff] %v621_v32  ;;  %v749_v32 = vld [vmem:[%s5337_s25 + $0x798] sm:$0xff] }
  0x32   : > { %624 = vst [vmem:[%s5342_s26 + $0x108] sm:$0xff] %v623_v33  ;;  %v751_v33 = vld [vmem:[%s5337_s25 + $0x7a0] sm:$0xff] }
  0x33   : > { %626 = vst [vmem:[%s5342_s26 + $0x110] sm:$0xff] %v625_v34  ;;  %v753_v34 = vld [vmem:[%s5337_s25 + $0xc40] sm:$0xff] }
  0x34   : > { %628 = vst [vmem:[%s5342_s26 + $0x118] sm:$0xff] %v627_v35  ;;  %v755_v35 = vld [vmem:[%s5337_s25 + $0xc48] sm:$0xff] }
  0x35   : > { %630 = vst [vmem:[%s5342_s26 + $0x120] sm:$0xff] %v629_v36  ;;  %v757_v36 = vld [vmem:[%s5337_s25 + $0xc50] sm:$0xff] }
  0x36   : > { %632 = vst [vmem:[%s5342_s26 + $0x128] sm:$0xff] %v631_v37  ;;  %v759_v37 = vld [vmem:[%s5337_s25 + $0xc58] sm:$0xff] }
  0x37   : > { %634 = vst [vmem:[%s5342_s26 + $0x130] sm:$0xff] %v633_v38  ;;  %v761_v38 = vld [vmem:[%s5337_s25 + $0xc60] sm:$0xff] }
  0x38   : > { %636 = vst [vmem:[%s5342_s26 + $0x138] sm:$0xff] %v635_v39  ;;  %v763_v39 = vld [vmem:[%s5337_s25 + $0xc68] sm:$0xff] }
  0x39   : > { %638 = vst [vmem:[%s5342_s26 + $0x140] sm:$0xff] %v637_v40  ;;  %v765_v40 = vld [vmem:[%s5337_s25 + $0xc70] sm:$0xff] }
  0x3a   : > { %640 = vst [vmem:[%s5342_s26 + $0x148] sm:$0xff] %v639_v41  ;;  %v767_v41 = vld [vmem:[%s5337_s25 + $0xc78] sm:$0xff] }
  0x3b   : > { %642 = vst [vmem:[%s5342_s26 + $0x150] sm:$0xff] %v641_v42  ;;  %v769_v42 = vld [vmem:[%s5337_s25 + $0xc80] sm:$0xff] }
  0x3c   : > { %644 = vst [vmem:[%s5342_s26 + $0x158] sm:$0xff] %v643_v43  ;;  %v771_v43 = vld [vmem:[%s5337_s25 + $0xc88] sm:$0xff] }
  0x3d   : > { %646 = vst [vmem:[%s5342_s26 + $0x160] sm:$0xff] %v645_v44  ;;  %v773_v44 = vld [vmem:[%s5337_s25 + $0xc90] sm:$0xff] }
  0x3e   : > { %648 = vst [vmem:[%s5342_s26 + $0x168] sm:$0xff] %v647_v45  ;;  %v775_v45 = vld [vmem:[%s5337_s25 + $0xc98] sm:$0xff] }
  0x3f   : > { %650 = vst [vmem:[%s5342_s26 + $0x170] sm:$0xff] %v649_v46  ;;  %v777_v46 = vld [vmem:[%s5337_s25 + $0xca0] sm:$0xff] }
  0x40   : > { %652 = vst [vmem:[%s5342_s26 + $0x178] sm:$0xff] %v651_v47  ;;  %v779_v47 = vld [vmem:[%s5337_s25 + $0xca8] sm:$0xff] }
  0x41   : > { %654 = vst [vmem:[%s5342_s26 + $0x180] sm:$0xff] %v653_v48  ;;  %v781_v48 = vld [vmem:[%s5337_s25 + $0xcb0] sm:$0xff] }
  0x42   : > { %656 = vst [vmem:[%s5342_s26 + $0x188] sm:$0xff] %v655_v49  ;;  %v783_v49 = vld [vmem:[%s5337_s25 + $0xcb8] sm:$0xff] }
  0x43   : > { %658 = vst [vmem:[%s5342_s26 + $0x190] sm:$0xff] %v657_v50  ;;  %v785_v50 = vld [vmem:[%s5337_s25 + $0xcc0] sm:$0xff] }
  0x44   : > { %660 = vst [vmem:[%s5342_s26 + $0x198] sm:$0xff] %v659_v51  ;;  %v787_v51 = vld [vmem:[%s5337_s25 + $0xcc8] sm:$0xff] }
  0x45   : > { %662 = vst [vmem:[%s5342_s26 + $0x1a0] sm:$0xff] %v661_v52  ;;  %v789_v52 = vld [vmem:[%s5337_s25 + $0xcd0] sm:$0xff] }
  0x46   : > { %664 = vst [vmem:[%s5342_s26 + $0x1a8] sm:$0xff] %v663_v53  ;;  %v791_v53 = vld [vmem:[%s5337_s25 + $0xcd8] sm:$0xff] }
  0x47   : > { %666 = vst [vmem:[%s5342_s26 + $0x1b0] sm:$0xff] %v665_v54  ;;  %v793_v54 = vld [vmem:[%s5337_s25 + $0xce0] sm:$0xff] }
  0x48   : > { %668 = vst [vmem:[%s5342_s26 + $0x1b8] sm:$0xff] %v667_v55  ;;  %v795_v55 = vld [vmem:[%s5337_s25 + $0xce8] sm:$0xff] }
  0x49   : > { %670 = vst [vmem:[%s5342_s26 + $0x1c0] sm:$0xff] %v669_v56  ;;  %v797_v56 = vld [vmem:[%s5337_s25 + $0xcf0] sm:$0xff] }
  0x4a   : > { %672 = vst [vmem:[%s5342_s26 + $0x1c8] sm:$0xff] %v671_v57  ;;  %v799_v57 = vld [vmem:[%s5337_s25 + $0xcf8] sm:$0xff] }
  0x4b   : > { %674 = vst [vmem:[%s5342_s26 + $0x1d0] sm:$0xff] %v673_v58  ;;  %v801_v58 = vld [vmem:[%s5337_s25 + $0xd00] sm:$0xff] }
  0x4c   : > { %676 = vst [vmem:[%s5342_s26 + $0x1d8] sm:$0xff] %v675_v59  ;;  %v803_v59 = vld [vmem:[%s5337_s25 + $0xd08] sm:$0xff] }
  0x4d   : > { %678 = vst [vmem:[%s5342_s26 + $0x1e0] sm:$0xff] %v677_v60  ;;  %v805_v60 = vld [vmem:[%s5337_s25 + $0xd10] sm:$0xff] }
  0x4e   : > { %680 = vst [vmem:[%s5342_s26 + $0x1e8] sm:$0xff] %v679_v61  ;;  %v807_v61 = vld [vmem:[%s5337_s25 + $0xd18] sm:$0xff] }
  0x4f   : > { %682 = vst [vmem:[%s5342_s26 + $0x1f0] sm:$0xff] %v681_v62  ;;  %v809_v62 = vld [vmem:[%s5337_s25 + $0xd20] sm:$0xff] }
  0x50   : > { %684 = vst [vmem:[%s5342_s26 + $0x1f8] sm:$0xff] %v683_v63  ;;  %v811_v63 = vld [vmem:[%s5337_s25 + $0xd28] sm:$0xff] }
  0x51   : > { %686 = vst [vmem:[%s5342_s26 + $0x200] sm:$0xff] %v685_v0  ;;  %v813_v0 = vld [vmem:[%s5337_s25 + $0xd30] sm:$0xff] }
  0x52   : > { %688 = vst [vmem:[%s5342_s26 + $0x208] sm:$0xff] %v687_v1  ;;  %v815_v1 = vld [vmem:[%s5337_s25 + $0xd38] sm:$0xff] }
  0x53   : > { %690 = vst [vmem:[%s5342_s26 + $0x210] sm:$0xff] %v689_v2  ;;  %v817_v2 = vld [vmem:[%s5337_s25 + $0xd40] sm:$0xff] }
  0x54   : > { %692 = vst [vmem:[%s5342_s26 + $0x218] sm:$0xff] %v691_v3  ;;  %v819_v3 = vld [vmem:[%s5337_s25 + $0xd48] sm:$0xff] }
  0x55   : > { %694 = vst [vmem:[%s5342_s26 + $0x220] sm:$0xff] %v693_v4  ;;  %v821_v4 = vld [vmem:[%s5337_s25 + $0xd50] sm:$0xff] }
  0x56   : > { %696 = vst [vmem:[%s5342_s26 + $0x228] sm:$0xff] %v695_v5  ;;  %v823_v5 = vld [vmem:[%s5337_s25 + $0xd58] sm:$0xff] }
  0x57   : > { %698 = vst [vmem:[%s5342_s26 + $0x230] sm:$0xff] %v697_v6  ;;  %v825_v6 = vld [vmem:[%s5337_s25 + $0xd60] sm:$0xff] }
  0x58   : > { %700 = vst [vmem:[%s5342_s26 + $0x238] sm:$0xff] %v699_v7  ;;  %v827_v7 = vld [vmem:[%s5337_s25 + $0xd68] sm:$0xff] }
  0x59   : > { %702 = vst [vmem:[%s5342_s26 + $0x240] sm:$0xff] %v701_v8  ;;  %v829_v8 = vld [vmem:[%s5337_s25 + $0xd70] sm:$0xff] }
  0x5a   : > { %704 = vst [vmem:[%s5342_s26 + $0x248] sm:$0xff] %v703_v9  ;;  %v831_v9 = vld [vmem:[%s5337_s25 + $0xd78] sm:$0xff] }
  0x5b   : > { %706 = vst [vmem:[%s5342_s26 + $0x250] sm:$0xff] %v705_v10  ;;  %v833_v10 = vld [vmem:[%s5337_s25 + $0xd80] sm:$0xff] }
  0x5c   : > { %708 = vst [vmem:[%s5342_s26 + $0x258] sm:$0xff] %v707_v11  ;;  %v835_v11 = vld [vmem:[%s5337_s25 + $0xd88] sm:$0xff] }
  0x5d   : > { %710 = vst [vmem:[%s5342_s26 + $0x260] sm:$0xff] %v709_v12  ;;  %v837_v12 = vld [vmem:[%s5337_s25 + $0xd90] sm:$0xff] }
  0x5e   : > { %712 = vst [vmem:[%s5342_s26 + $0x268] sm:$0xff] %v711_v13  ;;  %v839_v13 = vld [vmem:[%s5337_s25 + $0xd98] sm:$0xff] }
  0x5f   : > { %714 = vst [vmem:[%s5342_s26 + $0x270] sm:$0xff] %v713_v14  ;;  %v841_v14 = vld [vmem:[%s5337_s25 + $0xda0] sm:$0xff] }
  0x60   : > { %716 = vst [vmem:[%s5342_s26 + $0x278] sm:$0xff] %v715_v15  ;;  %v843_v15 = vld [vmem:[%s5337_s25 + $0xda8] sm:$0xff] }
  0x61   : > { %718 = vst [vmem:[%s5342_s26 + $0x280] sm:$0xff] %v717_v16  ;;  %v845_v16 = vld [vmem:[%s5337_s25 + $0xdb0] sm:$0xff] }
  0x62   : > { %720 = vst [vmem:[%s5342_s26 + $0x288] sm:$0xff] %v719_v17  ;;  %v847_v17 = vld [vmem:[%s5337_s25 + $0xdb8] sm:$0xff] }
  0x63   : > { %722 = vst [vmem:[%s5342_s26 + $0x290] sm:$0xff] %v721_v18  ;;  %v849_v18 = vld [vmem:[%s5337_s25 + $0xdc0] sm:$0xff] }
  0x64   : > { %724 = vst [vmem:[%s5342_s26 + $0x298] sm:$0xff] %v723_v19  ;;  %v851_v19 = vld [vmem:[%s5337_s25 + $0x1260] sm:$0xff] }
  0x65   : > { %726 = vst [vmem:[%s5342_s26 + $0x2a0] sm:$0xff] %v725_v20  ;;  %v853_v20 = vld [vmem:[%s5337_s25 + $0x1268] sm:$0xff] }
  0x66   : > { %728 = vst [vmem:[%s5342_s26 + $0x2a8] sm:$0xff] %v727_v21  ;;  %v855_v21 = vld [vmem:[%s5337_s25 + $0x1270] sm:$0xff] }
  0x67   : > { %730 = vst [vmem:[%s5342_s26 + $0x2b0] sm:$0xff] %v729_v22  ;;  %v857_v22 = vld [vmem:[%s5337_s25 + $0x1278] sm:$0xff] }
  0x68   : > { %732 = vst [vmem:[%s5342_s26 + $0x2b8] sm:$0xff] %v731_v23  ;;  %v859_v23 = vld [vmem:[%s5337_s25 + $0x1280] sm:$0xff] }
  0x69   : > { %734 = vst [vmem:[%s5342_s26 + $0x2c0] sm:$0xff] %v733_v24  ;;  %v861_v24 = vld [vmem:[%s5337_s25 + $0x1288] sm:$0xff] }
  0x6a   : > { %736 = vst [vmem:[%s5342_s26 + $0x2c8] sm:$0xff] %v735_v25  ;;  %v863_v25 = vld [vmem:[%s5337_s25 + $0x1290] sm:$0xff] }
  0x6b   : > { %738 = vst [vmem:[%s5342_s26 + $0x2d0] sm:$0xff] %v737_v26  ;;  %v865_v26 = vld [vmem:[%s5337_s25 + $0x1298] sm:$0xff] }
  0x6c   : > { %740 = vst [vmem:[%s5342_s26 + $0x2d8] sm:$0xff] %v739_v27  ;;  %v867_v27 = vld [vmem:[%s5337_s25 + $0x12a0] sm:$0xff] }
  0x6d   : > { %742 = vst [vmem:[%s5342_s26 + $0x2e0] sm:$0xff] %v741_v28  ;;  %v869_v28 = vld [vmem:[%s5337_s25 + $0x12a8] sm:$0xff] }
  0x6e   : > { %744 = vst [vmem:[%s5342_s26 + $0x2e8] sm:$0xff] %v743_v29  ;;  %v871_v29 = vld [vmem:[%s5337_s25 + $0x12b0] sm:$0xff] }
  0x6f   : > { %746 = vst [vmem:[%s5342_s26 + $0x2f0] sm:$0xff] %v745_v30  ;;  %v873_v30 = vld [vmem:[%s5337_s25 + $0x12b8] sm:$0xff] }
  0x70   : > { %748 = vst [vmem:[%s5342_s26 + $0x2f8] sm:$0xff] %v747_v31  ;;  %v875_v31 = vld [vmem:[%s5337_s25 + $0x12c0] sm:$0xff] }
  0x71   : > { %750 = vst [vmem:[%s5342_s26 + $0x300] sm:$0xff] %v749_v32  ;;  %v877_v32 = vld [vmem:[%s5337_s25 + $0x12c8] sm:$0xff] }
  0x72   : > { %752 = vst [vmem:[%s5342_s26 + $0x308] sm:$0xff] %v751_v33  ;;  %v879_v33 = vld [vmem:[%s5337_s25 + $0x12d0] sm:$0xff] }
  0x73   : > { %754 = vst [vmem:[%s5342_s26 + $0x310] sm:$0xff] %v753_v34  ;;  %v881_v34 = vld [vmem:[%s5337_s25 + $0x12d8] sm:$0xff] }
  0x74   : > { %756 = vst [vmem:[%s5342_s26 + $0x318] sm:$0xff] %v755_v35  ;;  %v883_v35 = vld [vmem:[%s5337_s25 + $0x12e0] sm:$0xff] }
  0x75   : > { %758 = vst [vmem:[%s5342_s26 + $0x320] sm:$0xff] %v757_v36  ;;  %v885_v36 = vld [vmem:[%s5337_s25 + $0x12e8] sm:$0xff] }
  0x76   : > { %760 = vst [vmem:[%s5342_s26 + $0x328] sm:$0xff] %v759_v37  ;;  %v887_v37 = vld [vmem:[%s5337_s25 + $0x12f0] sm:$0xff] }
  0x77   : > { %762 = vst [vmem:[%s5342_s26 + $0x330] sm:$0xff] %v761_v38  ;;  %v889_v38 = vld [vmem:[%s5337_s25 + $0x12f8] sm:$0xff] }
  0x78   : > { %764 = vst [vmem:[%s5342_s26 + $0x338] sm:$0xff] %v763_v39  ;;  %v891_v39 = vld [vmem:[%s5337_s25 + $0x1300] sm:$0xff] }
  0x79   : > { %766 = vst [vmem:[%s5342_s26 + $0x340] sm:$0xff] %v765_v40  ;;  %v893_v40 = vld [vmem:[%s5337_s25 + $0x1308] sm:$0xff] }
  0x7a   : > { %768 = vst [vmem:[%s5342_s26 + $0x348] sm:$0xff] %v767_v41  ;;  %v895_v41 = vld [vmem:[%s5337_s25 + $0x1310] sm:$0xff] }
  0x7b   : > { %770 = vst [vmem:[%s5342_s26 + $0x350] sm:$0xff] %v769_v42  ;;  %v897_v42 = vld [vmem:[%s5337_s25 + $0x1318] sm:$0xff] }
  0x7c   : > { %772 = vst [vmem:[%s5342_s26 + $0x358] sm:$0xff] %v771_v43  ;;  %v899_v43 = vld [vmem:[%s5337_s25 + $0x1320] sm:$0xff] }
  0x7d   : > { %774 = vst [vmem:[%s5342_s26 + $0x360] sm:$0xff] %v773_v44  ;;  %v901_v44 = vld [vmem:[%s5337_s25 + $0x1328] sm:$0xff] }
  0x7e   : > { %776 = vst [vmem:[%s5342_s26 + $0x368] sm:$0xff] %v775_v45  ;;  %v903_v45 = vld [vmem:[%s5337_s25 + $0x1330] sm:$0xff] }
  0x7f   : > { %778 = vst [vmem:[%s5342_s26 + $0x370] sm:$0xff] %v777_v46  ;;  %v905_v46 = vld [vmem:[%s5337_s25 + $0x1338] sm:$0xff] }
  0x80   : > { %780 = vst [vmem:[%s5342_s26 + $0x378] sm:$0xff] %v779_v47  ;;  %v907_v47 = vld [vmem:[%s5337_s25 + $0x1340] sm:$0xff] }
  0x81   : > { %782 = vst [vmem:[%s5342_s26 + $0x380] sm:$0xff] %v781_v48  ;;  %v909_v48 = vld [vmem:[%s5337_s25 + $0x1348] sm:$0xff] }
  0x82   : > { %784 = vst [vmem:[%s5342_s26 + $0x388] sm:$0xff] %v783_v49  ;;  %v911_v49 = vld [vmem:[%s5337_s25 + $0x1350] sm:$0xff] }
  0x83   : > { %786 = vst [vmem:[%s5342_s26 + $0x390] sm:$0xff] %v785_v50  ;;  %v913_v50 = vld [vmem:[%s5337_s25 + $0x1358] sm:$0xff] }
  0x84   : > { %788 = vst [vmem:[%s5342_s26 + $0x398] sm:$0xff] %v787_v51  ;;  %v915_v51 = vld [vmem:[%s5337_s25 + $0x1360] sm:$0xff] }
  0x85   : > { %790 = vst [vmem:[%s5342_s26 + $0x3a0] sm:$0xff] %v789_v52  ;;  %v917_v52 = vld [vmem:[%s5337_s25 + $0x1368] sm:$0xff] }
  0x86   : > { %792 = vst [vmem:[%s5342_s26 + $0x3a8] sm:$0xff] %v791_v53  ;;  %v919_v53 = vld [vmem:[%s5337_s25 + $0x1370] sm:$0xff] }
  0x87   : > { %794 = vst [vmem:[%s5342_s26 + $0x3b0] sm:$0xff] %v793_v54  ;;  %v921_v54 = vld [vmem:[%s5337_s25 + $0x1378] sm:$0xff] }
  0x88   : > { %796 = vst [vmem:[%s5342_s26 + $0x3b8] sm:$0xff] %v795_v55  ;;  %v923_v55 = vld [vmem:[%s5337_s25 + $0x1380] sm:$0xff] }
  0x89   : > { %798 = vst [vmem:[%s5342_s26 + $0x3c0] sm:$0xff] %v797_v56  ;;  %v925_v56 = vld [vmem:[%s5337_s25 + $0x1388] sm:$0xff] }
  0x8a   : > { %800 = vst [vmem:[%s5342_s26 + $0x3c8] sm:$0xff] %v799_v57  ;;  %v927_v57 = vld [vmem:[%s5337_s25 + $0x1390] sm:$0xff] }
  0x8b   : > { %802 = vst [vmem:[%s5342_s26 + $0x3d0] sm:$0xff] %v801_v58  ;;  %v929_v58 = vld [vmem:[%s5337_s25 + $0x1398] sm:$0xff] }
  0x8c   : > { %804 = vst [vmem:[%s5342_s26 + $0x3d8] sm:$0xff] %v803_v59  ;;  %v931_v59 = vld [vmem:[%s5337_s25 + $0x13a0] sm:$0xff] }
  0x8d   : > { %806 = vst [vmem:[%s5342_s26 + $0x3e0] sm:$0xff] %v805_v60  ;;  %v933_v60 = vld [vmem:[%s5337_s25 + $0x13a8] sm:$0xff] }
  0x8e   : > { %808 = vst [vmem:[%s5342_s26 + $0x3e8] sm:$0xff] %v807_v61  ;;  %v935_v61 = vld [vmem:[%s5337_s25 + $0x13b0] sm:$0xff] }
  0x8f   : > { %810 = vst [vmem:[%s5342_s26 + $0x3f0] sm:$0xff] %v809_v62  ;;  %v937_v62 = vld [vmem:[%s5337_s25 + $0x13b8] sm:$0xff] }
  0x90   : > { %812 = vst [vmem:[%s5342_s26 + $0x3f8] sm:$0xff] %v811_v63  ;;  %v939_v63 = vld [vmem:[%s5337_s25 + $0x13c0] sm:$0xff] }
  0x91   : > { %814 = vst [vmem:[%s5342_s26 + $0x400] sm:$0xff] %v813_v0  ;;  %v941_v0 = vld [vmem:[%s5337_s25 + $0x13c8] sm:$0xff] }
  0x92   : > { %816 = vst [vmem:[%s5342_s26 + $0x408] sm:$0xff] %v815_v1  ;;  %v943_v1 = vld [vmem:[%s5337_s25 + $0x13d0] sm:$0xff] }
  0x93   : > { %818 = vst [vmem:[%s5342_s26 + $0x410] sm:$0xff] %v817_v2  ;;  %v945_v2 = vld [vmem:[%s5337_s25 + $0x13d8] sm:$0xff] }
  0x94   : > { %820 = vst [vmem:[%s5342_s26 + $0x418] sm:$0xff] %v819_v3  ;;  %v947_v3 = vld [vmem:[%s5337_s25 + $0x13e0] sm:$0xff] }
  0x95   : > { %822 = vst [vmem:[%s5342_s26 + $0x420] sm:$0xff] %v821_v4 }
  0x96   : > { %824 = vst [vmem:[%s5342_s26 + $0x428] sm:$0xff] %v823_v5 }
  0x97   : > { %826 = vst [vmem:[%s5342_s26 + $0x430] sm:$0xff] %v825_v6 }
  0x98   : > { %828 = vst [vmem:[%s5342_s26 + $0x438] sm:$0xff] %v827_v7 }
  0x99   : > { %830 = vst [vmem:[%s5342_s26 + $0x440] sm:$0xff] %v829_v8 }
  0x9a   : > { %832 = vst [vmem:[%s5342_s26 + $0x448] sm:$0xff] %v831_v9 }
  0x9b   : > { %834 = vst [vmem:[%s5342_s26 + $0x450] sm:$0xff] %v833_v10 }
  0x9c   : > { %836 = vst [vmem:[%s5342_s26 + $0x458] sm:$0xff] %v835_v11 }
  0x9d   : > { %838 = vst [vmem:[%s5342_s26 + $0x460] sm:$0xff] %v837_v12 }
  0x9e   : > { %840 = vst [vmem:[%s5342_s26 + $0x468] sm:$0xff] %v839_v13 }
  0x9f   : > { %842 = vst [vmem:[%s5342_s26 + $0x470] sm:$0xff] %v841_v14 }
  0xa0   : > { %844 = vst [vmem:[%s5342_s26 + $0x478] sm:$0xff] %v843_v15 }
  0xa1   : > { %846 = vst [vmem:[%s5342_s26 + $0x480] sm:$0xff] %v845_v16 }
  0xa2   : > { %848 = vst [vmem:[%s5342_s26 + $0x488] sm:$0xff] %v847_v17 }
  0xa3   : > { %850 = vst [vmem:[%s5342_s26 + $0x490] sm:$0xff] %v849_v18 }
  0xa4   : > { %852 = vst [vmem:[%s5342_s26 + $0x498] sm:$0xff] %v851_v19 }
  0xa5   : > { %854 = vst [vmem:[%s5342_s26 + $0x4a0] sm:$0xff] %v853_v20 }
  0xa6   : > { %856 = vst [vmem:[%s5342_s26 + $0x4a8] sm:$0xff] %v855_v21 }
  0xa7   : > { %858 = vst [vmem:[%s5342_s26 + $0x4b0] sm:$0xff] %v857_v22 }
  0xa8   : > { %860 = vst [vmem:[%s5342_s26 + $0x4b8] sm:$0xff] %v859_v23 }
  0xa9   : > { %862 = vst [vmem:[%s5342_s26 + $0x4c0] sm:$0xff] %v861_v24 }
  0xaa   : > { %864 = vst [vmem:[%s5342_s26 + $0x4c8] sm:$0xff] %v863_v25 }
  0xab   : > { %866 = vst [vmem:[%s5342_s26 + $0x4d0] sm:$0xff] %v865_v26 }
  0xac   : > { %868 = vst [vmem:[%s5342_s26 + $0x4d8] sm:$0xff] %v867_v27 }
  0xad   : > { %870 = vst [vmem:[%s5342_s26 + $0x4e0] sm:$0xff] %v869_v28 }
  0xae   : > { %872 = vst [vmem:[%s5342_s26 + $0x4e8] sm:$0xff] %v871_v29 }
  0xaf   : > { %874 = vst [vmem:[%s5342_s26 + $0x4f0] sm:$0xff] %v873_v30 }
  0xb0   : > { %876 = vst [vmem:[%s5342_s26 + $0x4f8] sm:$0xff] %v875_v31 }
  0xb1   : > { %878 = vst [vmem:[%s5342_s26 + $0x500] sm:$0xff] %v877_v32 }
  0xb2   : > { %880 = vst [vmem:[%s5342_s26 + $0x508] sm:$0xff] %v879_v33 }
  0xb3   : > { %882 = vst [vmem:[%s5342_s26 + $0x510] sm:$0xff] %v881_v34 }
  0xb4   : > { %884 = vst [vmem:[%s5342_s26 + $0x518] sm:$0xff] %v883_v35 }
  0xb5   : > { %886 = vst [vmem:[%s5342_s26 + $0x520] sm:$0xff] %v885_v36 }
  0xb6   : > { %888 = vst [vmem:[%s5342_s26 + $0x528] sm:$0xff] %v887_v37 }
  0xb7   : > { %890 = vst [vmem:[%s5342_s26 + $0x530] sm:$0xff] %v889_v38 }
  0xb8   : > { %892 = vst [vmem:[%s5342_s26 + $0x538] sm:$0xff] %v891_v39 }
  0xb9   : > { %894 = vst [vmem:[%s5342_s26 + $0x540] sm:$0xff] %v893_v40 }
  0xba   : > { %896 = vst [vmem:[%s5342_s26 + $0x548] sm:$0xff] %v895_v41 }
  0xbb   : > { %898 = vst [vmem:[%s5342_s26 + $0x550] sm:$0xff] %v897_v42 }
  0xbc   : > { %900 = vst [vmem:[%s5342_s26 + $0x558] sm:$0xff] %v899_v43 }
  0xbd   : > { %902 = vst [vmem:[%s5342_s26 + $0x560] sm:$0xff] %v901_v44 }
  0xbe   : > { %904 = vst [vmem:[%s5342_s26 + $0x568] sm:$0xff] %v903_v45 }
  0xbf   : > { %906 = vst [vmem:[%s5342_s26 + $0x570] sm:$0xff] %v905_v46 }
  0xc0   : > { %908 = vst [vmem:[%s5342_s26 + $0x578] sm:$0xff] %v907_v47 }
  0xc1   : > { %910 = vst [vmem:[%s5342_s26 + $0x580] sm:$0xff] %v909_v48 }
  0xc2   : > { %912 = vst [vmem:[%s5342_s26 + $0x588] sm:$0xff] %v911_v49 }
  0xc3   : > { %914 = vst [vmem:[%s5342_s26 + $0x590] sm:$0xff] %v913_v50 }
  0xc4   : > { %916 = vst [vmem:[%s5342_s26 + $0x598] sm:$0xff] %v915_v51 }
  0xc5   : > { %918 = vst [vmem:[%s5342_s26 + $0x5a0] sm:$0xff] %v917_v52 }
  0xc6   : > { %920 = vst [vmem:[%s5342_s26 + $0x5a8] sm:$0xff] %v919_v53 }
  0xc7   : > { %922 = vst [vmem:[%s5342_s26 + $0x5b0] sm:$0xff] %v921_v54 }
  0xc8   : > { %924 = vst [vmem:[%s5342_s26 + $0x5b8] sm:$0xff] %v923_v55 }
  0xc9   : > { %926 = vst [vmem:[%s5342_s26 + $0x5c0] sm:$0xff] %v925_v56 }
  0xca   : > { %928 = vst [vmem:[%s5342_s26 + $0x5c8] sm:$0xff] %v927_v57 }
  0xcb   : > { %930 = vst [vmem:[%s5342_s26 + $0x5d0] sm:$0xff] %v929_v58 }
  0xcc   : > { %932 = vst [vmem:[%s5342_s26 + $0x5d8] sm:$0xff] %v931_v59 }
  0xcd   : > { %934 = vst [vmem:[%s5342_s26 + $0x5e0] sm:$0xff] %v933_v60 }
  0xce   : > { %936 = vst [vmem:[%s5342_s26 + $0x5e8] sm:$0xff] %v935_v61 }
  0xcf   : > { %938 = vst [vmem:[%s5342_s26 + $0x5f0] sm:$0xff] %v937_v62 }
  0xd0   : > { %940 = vst [vmem:[%s5342_s26 + $0x5f8] sm:$0xff] %v939_v63 }
  0xd1   : > { %942 = vst [vmem:[%s5342_s26 + $0x600] sm:$0xff] %v941_v0 }
  0xd2   : > { %944 = vst [vmem:[%s5342_s26 + $0x608] sm:$0xff] %v943_v1 }
  0xd3   : > { %946 = vst [vmem:[%s5342_s26 + $0x610] sm:$0xff] %v945_v2 }
  0xd4   : > { %948 = vst [vmem:[%s5342_s26 + $0x618] sm:$0xff] %v947_v3 }
  0xd5 PF: > { %p3940_p5 = scmp.ge.s32.totalorder %s5280_s14, 1  ;;  %p953_p6 = scmp.lt.s32.totalorder %s5280_s14, 5 }
  0xd7   : > { %p954_p7 = pnand %p3940_p5, %p953_p6 }
  0xd9   : > { %957 = sbr.rel (%p954_p7) target bundleno = 1186 (0x4a2), region = 66 }
  0xde   : > { %v5738_v4 = vld [vmem:[%s6986_s1 + $0x38] sm:$0xff]  ;;  %vm1461_vm0 = vcmask 1040384   ;;  %vm1462_vm1 = vcmask 1041408   ;;  %v5748_v7 = vld [vmem:[%s6986_s1 + $0x30] sm:$0xff]  ;;  %v5282_v8 = vmov 65535   ;;  %v5757_v13 = vld [vmem:[%s6986_s1 + $0x28] sm:$0xff] }
  0xdf   : > { %v1020_v5 = vld [vmem:[%s6986_s1 + $0x78] sm:$0x3]  ;;  %1468 = vmatpush.bf16.msra.mxu0 %v5738_v4  ;;  %2081 = vmatpush.bf16.msra.mxu2 %v5738_v4  ;;  %v1463_v9 = vsel %vm1461_vm0, 4294967295, %v5282_v8  ;;  %v5764_v14 = vld [vmem:[%s6986_s1 + $0x70] sm:$0xff]  ;;  %v5771_v15 = vld [vmem:[%s6986_s1 + $0x20] sm:$0xff]  ;;  %s960_s24 = sand.u32 1, %s5272_s12  }
  0xe0   : > { %v1353_v6 = vunpack.c.l.b16 %v1020_v5  ;;  %v1464_v11 = vsel %vm1462_vm1, %v1463_v9, 0  ;;  %v5778_v16 = vld [vmem:[%s6986_s1 + $0x68] sm:$0xff]  ;;  %v5785_v17 = vld [vmem:[%s6986_s1 + $0x18] sm:$0xff]  ;;  %v5792_v18 = vld [vmem:[%s6986_s1 + $0x60] sm:$0xff]  ;;  %s5230_s27 = smul.u32 1568, %s960_s24  ;;  %vm1385_vm2 = vcmask 941056  }
  0xe1   : > { %v5800_v19 = vld [vmem:[%s6986_s1 + $0x10] sm:$0xff]  ;;  %v5807_v20 = vld [vmem:[%s6986_s1 + $0x58] sm:$0xff]  ;;  %v5814_v21 = vld [vmem:[%s6986_s1 + $0x8] sm:$0xff]  ;;  %s984_s18 = smul.u32 49, %s3934_s15  ;;  %vm3822_vm3 = vcmask 64512  }
  0xe2   : > { %v1369_v10 = vpack.c.b16 %v1353_v6, %v1353_v6  ;;  %v5821_v22 = vld [vmem:[%s6986_s1 + $0x50] sm:$0xff]  ;;  %v5826_v23 = vld [vmem:[%s6986_s1] sm:$0xff]  ;;  %s5828_s8 = scalar_lea.vmem [#allocation2], %s5230_s27  ;;  %v5841_v28 = vld [vmem:[%s6986_s1 + $0x48] sm:$0xff] }
  0xe3   : > { %1469 = vmatpush.bf16.msra.mxu0 %v5748_v7  ;;  %2082 = vmatpush.bf16.msra.mxu2 %v5748_v7  ;;  %v3944_v24 = vld [vmem:[%s5828_s8] sm:$0xf]  ;;  %v5037_v25 = vld [vmem:[%s5828_s8 + $0x4] sm:$0xf0]  ;;  %v5085_v27 = vld [vmem:[%s5828_s8 + $0x18c] sm:$0xf0] }
  0xe4   : > { %v5750_v12 = vand.u32 %v1464_v11, %v1369_v10  ;;  %v4270_v26 = vld [vmem:[%s5828_s8 + $0x188] sm:$0xf]  ;;  %v3945_v29 = vor.u32 %v5037_v25, %v3944_v24  ;;  %v5848_v31 = vld [vmem:[%s6986_s1 + $0x40] sm:$0xff]  ;;  %v3946_v33 = vld [vmem:[%s5828_s8 + $0x8] sm:$0xf0]  ;;  %p985_p8 = scmp.lt.s32.totalorder %s984_s18, 195 }
  0xe5   : > { %v4271_v30 = vor.u32 %v5085_v27, %v4270_v26  ;;  %v5036_v32 = vld [vmem:[%s5828_s8 + $0x4] sm:$0xf]  ;;  %v5084_v34 = vld [vmem:[%s5828_s8 + $0x18c] sm:$0xf]  ;;  %v4272_v35 = vld [vmem:[%s5828_s8 + $0x190] sm:$0xf0] }
  0xe6   : > { %1601 = vmatpush.bf16.msra.mxu1 %v5750_v12  ;;  %2214 = vmatpush.bf16.msra.mxu3 %v5750_v12  ;;  %v3949_v36 = vor.u32 %v5036_v32, %v3946_v33  ;;  %v4275_v37 = vor.u32 %v5084_v34, %v4272_v35  ;;  %v3952_v38 = vld [vmem:[%s5828_s8 + $0x10] sm:$0xf]  ;;  %v5039_v39 = vld [vmem:[%s5828_s8 + $0x14] sm:$0xf0]  ;;  %v5087_v41 = vld [vmem:[%s5828_s8 + $0x19c] sm:$0xf0] }
  0xe7   : > { %1470 = vmatpush.bf16.msra.mxu0 %v5757_v13  ;;  %2083 = vmatpush.bf16.msra.mxu2 %v5757_v13  ;;  %v4278_v40 = vld [vmem:[%s5828_s8 + $0x198] sm:$0xf]  ;;  %v3953_v42 = vor.u32 %v5039_v39, %v3952_v38  ;;  %v5038_v44 = vld [vmem:[%s5828_s8 + $0x14] sm:$0xf]  ;;  %v3954_v45 = vld [vmem:[%s5828_s8 + $0x18] sm:$0xf0] }
  0xe8   : > { %v4279_v43 = vor.u32 %v5087_v41, %v4278_v40  ;;  %v5086_v46 = vld [vmem:[%s5828_s8 + $0x19c] sm:$0xf]  ;;  %v4280_v47 = vld [vmem:[%s5828_s8 + $0x1a0] sm:$0xf0]  ;;  %v3957_v48 = vor.u32 %v5038_v44, %v3954_v45  ;;  %v3960_v50 = vld [vmem:[%s5828_s8 + $0x20] sm:$0xf] }
  0xe9   : > { %v4283_v49 = vor.u32 %v5086_v46, %v4280_v47  ;;  %v5041_v51 = vld [vmem:[%s5828_s8 + $0x24] sm:$0xf0]  ;;  %v5089_v53 = vld [vmem:[%s5828_s8 + $0x1ac] sm:$0xf0]  ;;  %v5040_v56 = vld [vmem:[%s5828_s8 + $0x24] sm:$0xf] }
  0xea   : > { %1602 = vmatpush.bf16.msra.mxu1 %v5764_v14  ;;  %2215 = vmatpush.bf16.msra.mxu3 %v5764_v14  ;;  %v4286_v52 = vld [vmem:[%s5828_s8 + $0x1a8] sm:$0xf]  ;;  %v3961_v54 = vor.u32 %v5041_v51, %v3960_v50  ;;  %v3962_v57 = vld [vmem:[%s5828_s8 + $0x28] sm:$0xf0]  ;;  %v4288_v59 = vld [vmem:[%s5828_s8 + $0x1b0] sm:$0xf0] }
  0xeb   : > { %1471 = vmatpush.bf16.msra.mxu0 %v5771_v15  ;;  %2084 = vmatpush.bf16.msra.mxu2 %v5771_v15  ;;  %v4287_v55 = vor.u32 %v5089_v53, %v4286_v52  ;;  %v5088_v58 = vld [vmem:[%s5828_s8 + $0x1ac] sm:$0xf]  ;;  %v3965_v60 = vor.u32 %v5040_v56, %v3962_v57  ;;  %v3968_v62 = vld [vmem:[%s5828_s8 + $0x30] sm:$0xf]  ;;  %v5043_v63 = vld [vmem:[%s5828_s8 + $0x34] sm:$0xf0] }
  0xec   : > { %v4291_v61 = vor.u32 %v5088_v58, %v4288_v59  ;;  %v4294_v0 = vld [vmem:[%s5828_s8 + $0x1b8] sm:$0xf]  ;;  %v5091_v1 = vld [vmem:[%s5828_s8 + $0x1bc] sm:$0xf0]  ;;  %v3969_v2 = vor.u32 %v5043_v63, %v3968_v62  ;;  %v3970_v5 = vld [vmem:[%s5828_s8 + $0x38] sm:$0xf0] }
  0xed   : > { %v4295_v3 = vor.u32 %v5091_v1, %v4294_v0  ;;  %v5090_v6 = vld [vmem:[%s5828_s8 + $0x1bc] sm:$0xf]  ;;  %v3976_v10 = vld [vmem:[%s5828_s8 + $0x40] sm:$0xf]  ;;  %v5045_v11 = vld [vmem:[%s5828_s8 + $0x44] sm:$0xf0] }
  0xee   : > { %1603 = vmatpush.bf16.msra.mxu1 %v5778_v16  ;;  %2216 = vmatpush.bf16.msra.mxu3 %v5778_v16  ;;  %v4310_v24 = vld [vmem:[%s5828_s8 + $0x1d8] sm:$0xf]  ;;  %v5095_v25 = vld [vmem:[%s5828_s8 + $0x1dc] sm:$0xf0]  ;;  %v5049_v35 = vld [vmem:[%s5828_s8 + $0x64] sm:$0xf0] }
  0xef   : > { %1472 = vmatpush.bf16.msra.mxu0 %v5785_v17  ;;  %2085 = vmatpush.bf16.msra.mxu2 %v5785_v17  ;;  %v4311_v27 = vor.u32 %v5095_v25, %v4310_v24  ;;  %v3992_v34 = vld [vmem:[%s5828_s8 + $0x60] sm:$0xf]  ;;  %v5048_v40 = vld [vmem:[%s5828_s8 + $0x64] sm:$0xf]  ;;  %v3994_v41 = vld [vmem:[%s5828_s8 + $0x68] sm:$0xf0] }
  0xf0   : > { %v3993_v38 = vor.u32 %v5049_v35, %v3992_v34  ;;  %v3997_v44 = vor.u32 %v5048_v40, %v3994_v41  ;;  %v4000_v46 = vld [vmem:[%s5828_s8 + $0x70] sm:$0xf]  ;;  %v5051_v47 = vld [vmem:[%s5828_s8 + $0x74] sm:$0xf0]  ;;  %v5050_v52 = vld [vmem:[%s5828_s8 + $0x74] sm:$0xf] }
  0xf1   : > { %v4001_v50 = vor.u32 %v5051_v47, %v4000_v46  ;;  %v4002_v53 = vld [vmem:[%s5828_s8 + $0x78] sm:$0xf0]  ;;  %v4008_v58 = vld [vmem:[%s5828_s8 + $0x80] sm:$0xf]  ;;  %v5053_v59 = vld [vmem:[%s5828_s8 + $0x84] sm:$0xf0] }
  0xf2   : > { %1604 = vmatpush.bf16.msra.mxu1 %v5792_v18  ;;  %2217 = vmatpush.bf16.msra.mxu3 %v5792_v18  ;;  %v4005_v56 = vor.u32 %v5050_v52, %v4002_v53  ;;  %v4009_v62 = vor.u32 %v5053_v59, %v4008_v58  ;;  %v5052_v1 = vld [vmem:[%s5828_s8 + $0x84] sm:$0xf]  ;;  %v5054_v24 = vld [vmem:[%s5828_s8 + $0x94] sm:$0xf]  ;;  %v4018_v25 = vld [vmem:[%s5828_s8 + $0x98] sm:$0xf0] }
  0xf3   : > { %1473 = vmatpush.bf16.msra.mxu0 %v5800_v19  ;;  %2086 = vmatpush.bf16.msra.mxu2 %v5800_v19  ;;  %v4024_v40 = vld [vmem:[%s5828_s8 + $0xa0] sm:$0xf]  ;;  %v5057_v41 = vld [vmem:[%s5828_s8 + $0xa4] sm:$0xf0]  ;;  %v5104_v52 = vld [vmem:[%s5828_s8 + $0x22c] sm:$0xf] }
  0xf4   : > { %v4025_v47 = vor.u32 %v5057_v41, %v4024_v40  ;;  %v4352_v53 = vld [vmem:[%s5828_s8 + $0x230] sm:$0xf0]  ;;  %v4098_v40 = vld [vmem:[%s5828_s8 + $0x138] sm:$0xf0]  ;;  %v5076_v59 = vld [vmem:[%s5828_s8 + $0x144] sm:$0xf] }
  0xf5   : > { %s7204_s18 = smov (!%p985_p8, %s984_s18), 195 }
  0xf6   : > { %1605 = vmatpush.bf16.msra.mxu1 %v5807_v20  ;;  %2218 = vmatpush.bf16.msra.mxu3 %v5807_v20  ;;  %s3941_s20 = sshll.u32 %s7204_s18, 3 }
  0xf7   : > { %1474 = vmatpush.bf16.msra.mxu0 %v5814_v21  ;;  %2087 = vmatpush.bf16.msra.mxu2 %v5814_v21  ;;  %s6529_s23 = scalar_lea.vmem %s6988_s3, %s3941_s20 }
  0xfa   : > { %1606 = vmatpush.bf16.msra.mxu1 %v5821_v22  ;;  %2219 = vmatpush.bf16.msra.mxu3 %v5821_v22 }
  0xfb   : > { %1475 = vmatpush.bf16.msra.mxu0 %v5826_v23  ;;  %2088 = vmatpush.bf16.msra.mxu2 %v5826_v23 }
  0xfe   : > { %1607 = vmatpush.bf16.msra.mxu1 %v5841_v28  ;;  %2220 = vmatpush.bf16.msra.mxu3 %v5841_v28 }
  0xff   : > { %3405 = vmatpush.bf16.msrb.mxu2 %v5738_v4  ;;  %2743 = vmatpush.bf16.msrb.mxu0 %v5738_v4  ;;  %v5042_v4 = vld [vmem:[%s5828_s8 + $0x34] sm:$0xf] }
 0x100   : > { %1476 = vmatmul.bf16.vlgmr.msra.gmra.mxu0 %v3945_v29  ;;  %2089 = vmatmul.bf16.vlgmr.msra.gmra.mxu2 %v4271_v30  ;;  %v3973_v8 = vor.u32 %v5042_v4, %v3970_v5  ;;  %v3986_v29 = vld [vmem:[%s5828_s8 + $0x58] sm:$0xf0]  ;;  %v4336_v4 = vld [vmem:[%s5828_s8 + $0x210] sm:$0xf0] }
 0x101   : > { %v5094_v30 = vld [vmem:[%s5828_s8 + $0x1dc] sm:$0xf] }
 0x102   : > { %1608 = vmatpush.bf16.msra.mxu1 %v5848_v31  ;;  %2221 = vmatpush.bf16.msra.mxu3 %v5848_v31 }
 0x103   : > { %3406 = vmatpush.bf16.msrb.mxu2 %v5748_v7  ;;  %2744 = vmatpush.bf16.msrb.mxu0 %v5748_v7  ;;  %v4296_v7 = vld [vmem:[%s5828_s8 + $0x1c0] sm:$0xf0] }
 0x104   : > { %v4299_v9 = vor.u32 %v5090_v6, %v4296_v7 }
 0x105   : > { %4194 = vmatmul.msk.bf16.vlgmr.msra.gmra.mxu1 %vm1385_vm2, %v3949_v36  ;;  %4460 = vmatmul.msk.bf16.vlgmr.msra.gmra.mxu3 %vm1385_vm2, %v4275_v37  ;;  %v4318_v36 = vld [vmem:[%s5828_s8 + $0x1e8] sm:$0xf]  ;;  %v5097_v37 = vld [vmem:[%s5828_s8 + $0x1ec] sm:$0xf0] }
 0x106   : > { %3538 = vmatpush.bf16.msrb.mxu3 %v5750_v12  ;;  %2876 = vmatpush.bf16.msrb.mxu1 %v5750_v12  ;;  %v4302_v12 = vld [vmem:[%s5828_s8 + $0x1c8] sm:$0xf]  ;;  %v4319_v39 = vor.u32 %v5097_v37, %v4318_v36 }
 0x107   : > { %3407 = vmatpush.bf16.msrb.mxu2 %v5757_v13  ;;  %2745 = vmatpush.bf16.msrb.mxu0 %v5757_v13  ;;  %v5093_v13 = vld [vmem:[%s5828_s8 + $0x1cc] sm:$0xf0] }
 0x10a   : > { %3539 = vmatpush.bf16.msrb.mxu3 %v5764_v14  ;;  %2877 = vmatpush.bf16.msrb.mxu1 %v5764_v14  ;;  %v3977_v14 = vor.u32 %v5045_v11, %v3976_v10 }
 0x10b   : > { %3408 = vmatpush.bf16.msrb.mxu2 %v5771_v15  ;;  %2746 = vmatpush.bf16.msrb.mxu0 %v5771_v15  ;;  %v4303_v15 = vor.u32 %v5093_v13, %v4302_v12  ;;  %v4342_v12 = vld [vmem:[%s5828_s8 + $0x218] sm:$0xf] }
 0x10e   : > { %3540 = vmatpush.bf16.msrb.mxu3 %v5778_v16  ;;  %2878 = vmatpush.bf16.msrb.mxu1 %v5778_v16  ;;  %v5044_v16 = vld [vmem:[%s5828_s8 + $0x44] sm:$0xf] }
 0x10f   : > { %3409 = vmatpush.bf16.msrb.mxu2 %v5785_v17  ;;  %2747 = vmatpush.bf16.msrb.mxu0 %v5785_v17  ;;  %v3978_v17 = vld [vmem:[%s5828_s8 + $0x48] sm:$0xf0] }
 0x110   : > { %1481 = vmatmul.bf16.gmra.mxu0 %v3953_v42  ;;  %2094 = vmatmul.bf16.gmra.mxu2 %v4279_v43  ;;  %v5096_v42 = vld [vmem:[%s5828_s8 + $0x1ec] sm:$0xf]  ;;  %v4320_v43 = vld [vmem:[%s5828_s8 + $0x1f0] sm:$0xf0] }
 0x111   : > { %v4323_v45 = vor.u32 %v5096_v42, %v4320_v43  ;;  %v5105_v42 = vld [vmem:[%s5828_s8 + $0x22c] sm:$0xf0] }
 0x112   : > { %3541 = vmatpush.bf16.msrb.mxu3 %v5792_v18  ;;  %2879 = vmatpush.bf16.msrb.mxu1 %v5792_v18  ;;  %v5092_v18 = vld [vmem:[%s5828_s8 + $0x1cc] sm:$0xf] }
 0x113   : > { %3410 = vmatpush.bf16.msrb.mxu2 %v5800_v19  ;;  %2748 = vmatpush.bf16.msrb.mxu0 %v5800_v19  ;;  %v4304_v19 = vld [vmem:[%s5828_s8 + $0x1d0] sm:$0xf0] }
 0x115   : > { %4195 = vmatmul.msk.bf16.gmra.mxu1 %vm1385_vm2, %v3957_v48  ;;  %4461 = vmatmul.msk.bf16.gmra.mxu3 %vm1385_vm2, %v4283_v49  ;;  %v4326_v48 = vld [vmem:[%s5828_s8 + $0x1f8] sm:$0xf]  ;;  %v5099_v49 = vld [vmem:[%s5828_s8 + $0x1fc] sm:$0xf0] }
 0x116   : > { %3542 = vmatpush.bf16.msrb.mxu3 %v5807_v20  ;;  %2880 = vmatpush.bf16.msrb.mxu1 %v5807_v20  ;;  %v3981_v20 = vor.u32 %v5044_v16, %v3978_v17  ;;  %v4327_v51 = vor.u32 %v5099_v49, %v4326_v48  ;;  %v5103_v16 = vld [vmem:[%s5828_s8 + $0x21c] sm:$0xf0] }
 0x117   : > { %3411 = vmatpush.bf16.msrb.mxu2 %v5814_v21  ;;  %2749 = vmatpush.bf16.msrb.mxu0 %v5814_v21  ;;  %v4307_v21 = vor.u32 %v5092_v18, %v4304_v19  ;;  %v4432_v18 = vld [vmem:[%s5828_s8 + $0x2d0] sm:$0xf0] }
 0x11a   : > { %3543 = vmatpush.bf16.msrb.mxu3 %v5821_v22  ;;  %2881 = vmatpush.bf16.msrb.mxu1 %v5821_v22  ;;  %v3984_v22 = vld [vmem:[%s5828_s8 + $0x50] sm:$0xf] }
 0x11b   : > { %3412 = vmatpush.bf16.msrb.mxu2 %v5826_v23  ;;  %2750 = vmatpush.bf16.msrb.mxu0 %v5826_v23  ;;  %v5047_v23 = vld [vmem:[%s5828_s8 + $0x54] sm:$0xf0] }
 0x11c   : > { %v3985_v26 = vor.u32 %v5047_v23, %v3984_v22  ;;  %v4343_v22 = vor.u32 %v5103_v16, %v4342_v12  ;;  %v5106_v16 = vld [vmem:[%s5828_s8 + $0x23c] sm:$0xf] }
 0x11e   : > { %3544 = vmatpush.bf16.msrb.mxu3 %v5841_v28  ;;  %2882 = vmatpush.bf16.msrb.mxu1 %v5841_v28  ;;  %v5046_v28 = vld [vmem:[%s5828_s8 + $0x54] sm:$0xf] }
 0x11f   : > { %v3989_v32 = vor.u32 %v5046_v28, %v3986_v29 }
 0x120   : > { %1486 = vmatmul.bf16.gmra.mxu0 %v3961_v54  ;;  %2099 = vmatmul.bf16.gmra.mxu2 %v4287_v55  ;;  %v5098_v54 = vld [vmem:[%s5828_s8 + $0x1fc] sm:$0xf]  ;;  %v4328_v55 = vld [vmem:[%s5828_s8 + $0x200] sm:$0xf0] }
 0x121   : > { %v4331_v57 = vor.u32 %v5098_v54, %v4328_v55 }
 0x122   : > { %3545 = vmatpush.bf16.msrb.mxu3 %v5848_v31  ;;  %2883 = vmatpush.bf16.msrb.mxu1 %v5848_v31  ;;  %v4312_v31 = vld [vmem:[%s5828_s8 + $0x1e0] sm:$0xf0] }
 0x123   : > { %v4315_v33 = vor.u32 %v5094_v30, %v4312_v31  ;;  %v4021_v30 = vor.u32 %v5054_v24, %v4018_v25  ;;  %v5122_v25 = vld [vmem:[%s5828_s8 + $0x2bc] sm:$0xf] }
 0x125   : > { %4196 = vmatmul.msk.bf16.gmra.mxu1 %vm1385_vm2, %v3965_v60  ;;  %4462 = vmatmul.msk.bf16.gmra.mxu3 %vm1385_vm2, %v4291_v61  ;;  %v4334_v60 = vld [vmem:[%s5828_s8 + $0x208] sm:$0xf]  ;;  %v5101_v61 = vld [vmem:[%s5828_s8 + $0x20c] sm:$0xf0] }
 0x126   : > { %v4335_v63 = vor.u32 %v5101_v61, %v4334_v60 }
 0x130   : > { %1491 = vmatmul.bf16.gmra.mxu0 %v3969_v2  ;;  %2104 = vmatmul.bf16.gmra.mxu2 %v4295_v3  ;;  %v4010_v2 = vld [vmem:[%s5828_s8 + $0x88] sm:$0xf0] }
 0x131   : > { %v5100_v3 = vld [vmem:[%s5828_s8 + $0x20c] sm:$0xf]  ;;  %v4013_v5 = vor.u32 %v5052_v1, %v4010_v2  ;;  %v4032_v2 = vld [vmem:[%s5828_s8 + $0xb0] sm:$0xf] }
 0x132   : > { %v4339_v6 = vor.u32 %v5100_v3, %v4336_v4  ;;  %v5059_v3 = vld [vmem:[%s5828_s8 + $0xb4] sm:$0xf0]  ;;  %v5107_v4 = vld [vmem:[%s5828_s8 + $0x23c] sm:$0xf0] }
 0x135   : > { %4197 = vmatmul.msk.bf16.gmra.mxu1 %vm1385_vm2, %v3973_v8  ;;  %4463 = vmatmul.msk.bf16.gmra.mxu3 %vm1385_vm2, %v4299_v9 }
 0x140   : > { %1496 = vmatmul.bf16.gmra.mxu0 %v3977_v14  ;;  %2109 = vmatmul.bf16.gmra.mxu2 %v4303_v15  ;;  %v4016_v14 = vld [vmem:[%s5828_s8 + $0x90] sm:$0xf]  ;;  %v5055_v15 = vld [vmem:[%s5828_s8 + $0x94] sm:$0xf0] }
 0x145   : > { %4198 = vmatmul.msk.bf16.gmra.mxu1 %vm1385_vm2, %v3981_v20  ;;  %4464 = vmatmul.msk.bf16.gmra.mxu3 %vm1385_vm2, %v4307_v21  ;;  %v4017_v21 = vor.u32 %v5055_v15, %v4016_v14  ;;  %v5058_v14 = vld [vmem:[%s5828_s8 + $0xb4] sm:$0xf]  ;;  %v4034_v15 = vld [vmem:[%s5828_s8 + $0xb8] sm:$0xf0] }
 0x150   : > { %1501 = vmatmul.bf16.gmra.mxu0 %v3985_v26  ;;  %2114 = vmatmul.bf16.gmra.mxu2 %v4311_v27  ;;  %v5102_v26 = vld [vmem:[%s5828_s8 + $0x21c] sm:$0xf]  ;;  %v4344_v27 = vld [vmem:[%s5828_s8 + $0x220] sm:$0xf0] }
 0x151   : > { %v4347_v31 = vor.u32 %v5102_v26, %v4344_v27 }
 0x155   : > { %4199 = vmatmul.msk.bf16.gmra.mxu1 %vm1385_vm2, %v3989_v32  ;;  %4465 = vmatmul.msk.bf16.gmra.mxu3 %vm1385_vm2, %v4315_v33  ;;  %v5124_v33 = vld [vmem:[%s5828_s8 + $0x2cc] sm:$0xf] }
 0x160   : > { %1506 = vmatmul.bf16.gmra.mxu0 %v3993_v38  ;;  %2119 = vmatmul.bf16.gmra.mxu2 %v4319_v39  ;;  %v4350_v38 = vld [vmem:[%s5828_s8 + $0x228] sm:$0xf] }
 0x161   : > { %v4351_v48 = vor.u32 %v5105_v42, %v4350_v38 }
 0x165   : > { %4200 = vmatmul.msk.bf16.gmra.mxu1 %vm1385_vm2, %v3997_v44  ;;  %4466 = vmatmul.msk.bf16.gmra.mxu3 %vm1385_vm2, %v4323_v45  ;;  %v4106_v44 = vld [vmem:[%s5828_s8 + $0x148] sm:$0xf0] }
 0x170   : > { %1511 = vmatmul.bf16.gmra.mxu0 %v4001_v50  ;;  %2124 = vmatmul.bf16.gmra.mxu2 %v4327_v51  ;;  %v5056_v50 = vld [vmem:[%s5828_s8 + $0xa4] sm:$0xf]  ;;  %v4026_v51 = vld [vmem:[%s5828_s8 + $0xa8] sm:$0xf0] }
 0x175   : > { %4201 = vmatmul.msk.bf16.gmra.mxu1 %vm1385_vm2, %v4005_v56  ;;  %4467 = vmatmul.msk.bf16.gmra.mxu3 %vm1385_vm2, %v4331_v57  ;;  %v4029_v56 = vor.u32 %v5056_v50, %v4026_v51  ;;  %v4355_v57 = vor.u32 %v5104_v52, %v4352_v53  ;;  %v5108_v50 = vld [vmem:[%s5828_s8 + $0x24c] sm:$0xf]  ;;  %v4368_v51 = vld [vmem:[%s5828_s8 + $0x250] sm:$0xf0] }
 0x17d   : > { %v1477_v0 = vpop.f32.mrf.mxu0 }
 0x180   : > { %1516 = vmatmul.bf16.gmra.mxu0 %v4009_v62  ;;  %2129 = vmatmul.bf16.gmra.mxu2 %v4335_v63 }
 0x182   : > { %v1610_v7 = vpop.f32.mrf.mxu1 }
 0x183   : > { %v5970_v8 = vadd.f32 %v1610_v7, %v1477_v0  ;;  %v2090_v9 = vpop.f32.mrf.mxu2  ;;  %v4358_v0 = vld [vmem:[%s5828_s8 + $0x238] sm:$0xf] }
 0x185   : > { %4202 = vmatmul.msk.bf16.gmra.mxu1 %vm1385_vm2, %v4013_v5  ;;  %4468 = vmatmul.msk.bf16.gmra.mxu3 %vm1385_vm2, %v4339_v6  ;;  %v1479_v10 = vpop.f32.mrf.mxu0  ;;  %v4424_v6 = vld [vmem:[%s5828_s8 + $0x2c0] sm:$0xf0] }
 0x188   : > { %v2223_v11 = vpop.f32.mrf.mxu3 }
 0x189   : > { %v5975_v13 = vadd.f32 %v2223_v11, %v2090_v9  ;;  %v4359_v11 = vor.u32 %v5107_v4, %v4358_v0  ;;  %v4048_v4 = vld [vmem:[%s5828_s8 + $0xd0] sm:$0xf] }
 0x18a   : > { %v1612_v17 = vpop.f32.mrf.mxu1 }
 0x18b   : > { %v5982_v19 = vadd.f32 %v1612_v17, %v1479_v10  ;;  %v2092_v20 = vpop.f32.mrf.mxu2  ;;  %v4033_v10 = vor.u32 %v5059_v3, %v4032_v2  ;;  %v4360_v17 = vld [vmem:[%s5828_s8 + $0x240] sm:$0xf0]  ;;  %v4374_v2 = vld [vmem:[%s5828_s8 + $0x258] sm:$0xf] }
 0x18d   : > { %v1482_v23 = vpop.f32.mrf.mxu0 }
 0x190   : > { %v2225_v28 = vpop.f32.mrf.mxu3  ;;  %1521 = vmatmul.bf16.gmra.mxu0 %v4017_v21  ;;  %2134 = vmatmul.bf16.gmra.mxu2 %v4343_v22  ;;  %v4037_v22 = vor.u32 %v5058_v14, %v4034_v15 }
 0x191   : > { %v5988_v29 = vadd.f32 %v2225_v28, %v2092_v20 }
 0x192   : > { %v1615_v32 = vpop.f32.mrf.mxu1 }
 0x193   : > { %v5992_v34 = vadd.f32 %v1615_v32, %v1482_v23  ;;  %v2095_v35 = vpop.f32.mrf.mxu2  ;;  %v4363_v23 = vor.u32 %v5106_v16, %v4360_v17 }
 0x195   : > { %4203 = vmatmul.msk.bf16.gmra.mxu1 %vm1385_vm2, %v4021_v30  ;;  %4469 = vmatmul.msk.bf16.gmra.mxu3 %vm1385_vm2, %v4347_v31  ;;  %v1484_v36 = vpop.f32.mrf.mxu0  ;;  %v4366_v31 = vld [vmem:[%s5828_s8 + $0x248] sm:$0xf] }
 0x198   : > { %v2228_v37 = vpop.f32.mrf.mxu3 }
 0x199   : > { %v5997_v39 = vadd.f32 %v2228_v37, %v2095_v35  ;;  %v4040_v35 = vld [vmem:[%s5828_s8 + $0xc0] sm:$0xf]  ;;  %v5109_v37 = vld [vmem:[%s5828_s8 + $0x24c] sm:$0xf0] }
 0x19a   : > { %v1617_v43 = vpop.f32.mrf.mxu1 }
 0x19b   : > { %v6004_v45 = vadd.f32 %v1617_v43, %v1484_v36  ;;  %v2097_v46 = vpop.f32.mrf.mxu2  ;;  %v5061_v36 = vld [vmem:[%s5828_s8 + $0xc4] sm:$0xf0] }
 0x19c   : > { %v4041_v43 = vor.u32 %v5061_v36, %v4040_v35  ;;  %v5120_v36 = vld [vmem:[%s5828_s8 + $0x2ac] sm:$0xf] }
 0x19d   : > { %v1487_v49 = vpop.f32.mrf.mxu0 }
 0x1a0   : > { %v2230_v54 = vpop.f32.mrf.mxu3  ;;  %1526 = vmatmul.bf16.gmra.mxu0 %v4025_v47  ;;  %2139 = vmatmul.bf16.gmra.mxu2 %v4351_v48  ;;  %v5060_v48 = vld [vmem:[%s5828_s8 + $0xc4] sm:$0xf] }
 0x1a1   : > { %v6010_v55 = vadd.f32 %v2230_v54, %v2097_v46  ;;  %v4367_v46 = vor.u32 %v5109_v37, %v4366_v31 }
 0x1a2   : > { %v1620_v58 = vpop.f32.mrf.mxu1 }
 0x1a3   : > { %v6014_v60 = vadd.f32 %v1620_v58, %v1487_v49  ;;  %v2100_v61 = vpop.f32.mrf.mxu2  ;;  %v4042_v49 = vld [vmem:[%s5828_s8 + $0xc8] sm:$0xf0]  ;;  %v5074_v58 = vld [vmem:[%s5828_s8 + $0x134] sm:$0xf] }
 0x1a4   : > { %v4045_v54 = vor.u32 %v5060_v48, %v4042_v49  ;;  %v4056_v48 = vld [vmem:[%s5828_s8 + $0xe0] sm:$0xf]  ;;  %v5065_v49 = vld [vmem:[%s5828_s8 + $0xe4] sm:$0xf0] }
 0x1a5   : > { %4204 = vmatmul.msk.bf16.gmra.mxu1 %vm1385_vm2, %v4029_v56  ;;  %4470 = vmatmul.msk.bf16.gmra.mxu3 %vm1385_vm2, %v4355_v57  ;;  %v1489_v62 = vpop.f32.mrf.mxu0  ;;  %v4371_v56 = vor.u32 %v5108_v50, %v4368_v51  ;;  %v5113_v50 = vld [vmem:[%s5828_s8 + $0x26c] sm:$0xf0] }
 0x1a8   : > { %v2233_v63 = vpop.f32.mrf.mxu3 }
 0x1a9   : > { %v6019_v1 = vadd.f32 %v2233_v63, %v2100_v61 }
 0x1aa   : > { %v1622_v5 = vpop.f32.mrf.mxu1 }
 0x1ab   : > { %v6026_v7 = vadd.f32 %v1622_v5, %v1489_v62  ;;  %v2102_v9 = vpop.f32.mrf.mxu2  ;;  %v5063_v5 = vld [vmem:[%s5828_s8 + $0xd4] sm:$0xf0] }
 0x1ac   : > { %v4049_v15 = vor.u32 %v5063_v5, %v4048_v4  ;;  %v5112_v4 = vld [vmem:[%s5828_s8 + $0x26c] sm:$0xf]  ;;  %v4384_v5 = vld [vmem:[%s5828_s8 + $0x270] sm:$0xf0] }
 0x1ad   : > { %v1492_v12 = vpop.f32.mrf.mxu0 }
 0x1b0   : > { %v2235_v20 = vpop.f32.mrf.mxu3  ;;  %1531 = vmatmul.bf16.gmra.mxu0 %v4033_v10  ;;  %2144 = vmatmul.bf16.gmra.mxu2 %v4359_v11  ;;  %v4416_v11 = vld [vmem:[%s5828_s8 + $0x2b0] sm:$0xf0] }
 0x1b1   : > { %v6032_v21 = vadd.f32 %v2235_v20, %v2102_v9  ;;  %v5111_v9 = vld [vmem:[%s5828_s8 + $0x25c] sm:$0xf0]  ;;  %v5062_v20 = vld [vmem:[%s5828_s8 + $0xd4] sm:$0xf] }
 0x1b2   : > { %v1625_v24 = vpop.f32.mrf.mxu1  ;;  %v4375_v16 = vor.u32 %v5111_v9, %v4374_v2  ;;  %v4058_v2 = vld [vmem:[%s5828_s8 + $0xe8] sm:$0xf0] }
 0x1b3   : > { %v6036_v26 = vadd.f32 %v1625_v24, %v1492_v12  ;;  %v2105_v27 = vpop.f32.mrf.mxu2  ;;  %v4376_v24 = vld [vmem:[%s5828_s8 + $0x260] sm:$0xf0] }
 0x1b5   : > { %4205 = vmatmul.msk.bf16.gmra.mxu1 %vm1385_vm2, %v4037_v22  ;;  %4471 = vmatmul.msk.bf16.gmra.mxu3 %vm1385_vm2, %v4363_v23  ;;  %v1494_v28 = vpop.f32.mrf.mxu0  ;;  %v4050_v22 = vld [vmem:[%s5828_s8 + $0xd8] sm:$0xf0] }
 0x1b6   : > { %v5110_v23 = vld [vmem:[%s5828_s8 + $0x25c] sm:$0xf] }
 0x1b7   : > { %v4379_v31 = vor.u32 %v5110_v23, %v4376_v24 }
 0x1b8   : > { %v2238_v30 = vpop.f32.mrf.mxu3 }
 0x1b9   : > { %v6041_v32 = vadd.f32 %v2238_v30, %v2105_v27  ;;  %v4053_v30 = vor.u32 %v5062_v20, %v4050_v22 }
 0x1ba   : > { %v1627_v38 = vpop.f32.mrf.mxu1 }
 0x1bb   : > { %v6048_v41 = vadd.f32 %v1627_v38, %v1494_v28  ;;  %v2107_v42 = vpop.f32.mrf.mxu2 }
 0x1bd   : > { %v1497_v47 = vpop.f32.mrf.mxu0 }
 0x1c0   : > { %v2240_v52 = vpop.f32.mrf.mxu3  ;;  %1536 = vmatmul.bf16.gmra.mxu0 %v4041_v43  ;;  %2149 = vmatmul.bf16.gmra.mxu2 %v4367_v46  ;;  %v4382_v46 = vld [vmem:[%s5828_s8 + $0x268] sm:$0xf] }
 0x1c1   : > { %v6054_v53 = vadd.f32 %v2240_v52, %v2107_v42  ;;  %v4090_v52 = vld [vmem:[%s5828_s8 + $0x128] sm:$0xf0] }
 0x1c2   : > { %v1630_v57 = vpop.f32.mrf.mxu1 }
 0x1c3   : > { %v6058_v61 = vadd.f32 %v1630_v57, %v1497_v47  ;;  %v2110_v62 = vpop.f32.mrf.mxu2  ;;  %v4057_v57 = vor.u32 %v5065_v49, %v4056_v48 }
 0x1c5   : > { %4206 = vmatmul.msk.bf16.gmra.mxu1 %vm1385_vm2, %v4045_v54  ;;  %4472 = vmatmul.msk.bf16.gmra.mxu3 %vm1385_vm2, %v4371_v56  ;;  %v1499_v63 = vpop.f32.mrf.mxu0 }
 0x1c8   : > { %v2243_v0 = vpop.f32.mrf.mxu3 }
 0x1c9   : > { %v6063_v3 = vadd.f32 %v2243_v0, %v2110_v62  ;;  %v4383_v62 = vor.u32 %v5113_v50, %v4382_v46  ;;  %v5064_v0 = vld [vmem:[%s5828_s8 + $0xe4] sm:$0xf] }
 0x1ca   : > { %v1632_v10 = vpop.f32.mrf.mxu1 }
 0x1cb   : > { %v6070_v12 = vadd.f32 %v1632_v10, %v1499_v63  ;;  %v2112_v14 = vpop.f32.mrf.mxu2 }
 0x1cd   : > { %v1502_v17 = vpop.f32.mrf.mxu0 }
 0x1d0   : > { %v2245_v27 = vpop.f32.mrf.mxu3  ;;  %1541 = vmatmul.bf16.gmra.mxu0 %v4049_v15  ;;  %2154 = vmatmul.bf16.gmra.mxu2 %v4375_v16  ;;  %v4387_v15 = vor.u32 %v5112_v4, %v4384_v5 }
 0x1d1   : > { %v6076_v28 = vadd.f32 %v2245_v27, %v2112_v14  ;;  %v4061_v14 = vor.u32 %v5064_v0, %v4058_v2  ;;  %v4390_v27 = vld [vmem:[%s5828_s8 + $0x278] sm:$0xf] }
 0x1d2   : > { %v1635_v35 = vpop.f32.mrf.mxu1 }
 0x1d3   : > { %v6080_v37 = vadd.f32 %v1635_v35, %v1502_v17  ;;  %v2115_v38 = vpop.f32.mrf.mxu2  ;;  %v5067_v35 = vld [vmem:[%s5828_s8 + $0xf4] sm:$0xf0]  ;;  %v5072_v17 = vld [vmem:[%s5828_s8 + $0x124] sm:$0xf] }
 0x1d5   : > { %4207 = vmatmul.msk.bf16.gmra.mxu1 %vm1385_vm2, %v4053_v30  ;;  %4473 = vmatmul.msk.bf16.gmra.mxu3 %vm1385_vm2, %v4379_v31  ;;  %v1504_v42 = vpop.f32.mrf.mxu0  ;;  %v4064_v31 = vld [vmem:[%s5828_s8 + $0xf0] sm:$0xf] }
 0x1d6   : > { %v4065_v49 = vor.u32 %v5067_v35, %v4064_v31  ;;  %v4072_v31 = vld [vmem:[%s5828_s8 + $0x100] sm:$0xf]  ;;  %v5069_v35 = vld [vmem:[%s5828_s8 + $0x104] sm:$0xf0] }
 0x1d8   : > { %v2248_v43 = vpop.f32.mrf.mxu3 }
 0x1d9   : > { %v6085_v47 = vadd.f32 %v2248_v43, %v2115_v38  ;;  %v5115_v38 = vld [vmem:[%s5828_s8 + $0x27c] sm:$0xf0]  ;;  %v4408_v43 = vld [vmem:[%s5828_s8 + $0x2a0] sm:$0xf0] }
 0x1da   : > { %v1637_v51 = vpop.f32.mrf.mxu1  ;;  %v4391_v50 = vor.u32 %v5115_v38, %v4390_v27  ;;  %v5117_v38 = vld [vmem:[%s5828_s8 + $0x28c] sm:$0xf0] }
 0x1db   : > { %v6092_v54 = vadd.f32 %v1637_v51, %v1504_v42  ;;  %v2117_v56 = vpop.f32.mrf.mxu2 }
 0x1dd   : > { %v1507_v63 = vpop.f32.mrf.mxu0 }
 0x1e0   : > { %v2250_v9 = vpop.f32.mrf.mxu3  ;;  %1546 = vmatmul.bf16.gmra.mxu0 %v4057_v57  ;;  %2159 = vmatmul.bf16.gmra.mxu2 %v4383_v62  ;;  %v4066_v57 = vld [vmem:[%s5828_s8 + $0xf8] sm:$0xf0] }
 0x1e1   : > { %v6098_v10 = vadd.f32 %v2250_v9, %v2117_v56  ;;  %v5066_v56 = vld [vmem:[%s5828_s8 + $0xf4] sm:$0xf]  ;;  %v5114_v62 = vld [vmem:[%s5828_s8 + $0x27c] sm:$0xf] }
 0x1e2   : > { %v1640_v16 = vpop.f32.mrf.mxu1  ;;  %v4069_v4 = vor.u32 %v5066_v56, %v4066_v57 }
 0x1e3   : > { %v6102_v20 = vadd.f32 %v1640_v16, %v1507_v63  ;;  %v2120_v22 = vpop.f32.mrf.mxu2  ;;  %v4392_v63 = vld [vmem:[%s5828_s8 + $0x280] sm:$0xf0] }
 0x1e4   : > { %v4395_v5 = vor.u32 %v5114_v62, %v4392_v63  ;;  %v5068_v62 = vld [vmem:[%s5828_s8 + $0x104] sm:$0xf]  ;;  %v4074_v63 = vld [vmem:[%s5828_s8 + $0x108] sm:$0xf0] }
 0x1e5   : > { %4208 = vmatmul.msk.bf16.gmra.mxu1 %vm1385_vm2, %v4061_v14  ;;  %4474 = vmatmul.msk.bf16.gmra.mxu3 %vm1385_vm2, %v4387_v15  ;;  %v1509_v23 = vpop.f32.mrf.mxu0  ;;  %v5118_v14 = vld [vmem:[%s5828_s8 + $0x29c] sm:$0xf] }
 0x1e8   : > { %v2253_v24 = vpop.f32.mrf.mxu3 }
 0x1e9   : > { %v6107_v30 = vadd.f32 %v2253_v24, %v2120_v22  ;;  %v4398_v24 = vld [vmem:[%s5828_s8 + $0x288] sm:$0xf] }
 0x1ea   : > { %v1642_v42 = vpop.f32.mrf.mxu1  ;;  %v4399_v56 = vor.u32 %v5117_v38, %v4398_v24  ;;  %v5070_v24 = vld [vmem:[%s5828_s8 + $0x114] sm:$0xf] }
 0x1eb   : > { %v6114_v46 = vadd.f32 %v1642_v42, %v1509_v23  ;;  %v2122_v48 = vpop.f32.mrf.mxu2 }
 0x1ed   : > { %v1512_v51 = vpop.f32.mrf.mxu0 }
 0x1f0   : > { %v2255_v0 = vpop.f32.mrf.mxu3  ;;  %1551 = vmatmul.bf16.gmra.mxu0 %v4065_v49  ;;  %2164 = vmatmul.bf16.gmra.mxu2 %v4391_v50 }
 0x1f1   : > { %v6120_v2 = vadd.f32 %v2255_v0, %v2122_v48  ;;  %v5116_v0 = vld [vmem:[%s5828_s8 + $0x28c] sm:$0xf]  ;;  %v4082_v48 = vld [vmem:[%s5828_s8 + $0x118] sm:$0xf0] }
 0x1f2   : > { %v1645_v9 = vpop.f32.mrf.mxu1 }
 0x1f3   : > { %v6124_v15 = vadd.f32 %v1645_v9, %v1512_v51  ;;  %v2125_v16 = vpop.f32.mrf.mxu2  ;;  %v4073_v51 = vor.u32 %v5069_v35, %v4072_v31 }
 0x1f5   : > { %4209 = vmatmul.msk.bf16.gmra.mxu1 %vm1385_vm2, %v4069_v4  ;;  %4475 = vmatmul.msk.bf16.gmra.mxu3 %vm1385_vm2, %v4395_v5  ;;  %v1514_v22 = vpop.f32.mrf.mxu0  ;;  %v4400_v4 = vld [vmem:[%s5828_s8 + $0x290] sm:$0xf0] }
 0x1f8   : > { %v2258_v23 = vpop.f32.mrf.mxu3 }
 0x1f9   : > { %v6129_v27 = vadd.f32 %v2258_v23, %v2125_v16  ;;  %v4077_v16 = vor.u32 %v5068_v62, %v4074_v63  ;;  %v5071_v62 = vld [vmem:[%s5828_s8 + $0x114] sm:$0xf0]  ;;  %v5119_v63 = vld [vmem:[%s5828_s8 + $0x29c] sm:$0xf0] }
 0x1fa   : > { %v1647_v42 = vpop.f32.mrf.mxu1 }
 0x1fb   : > { %v6136_v49 = vadd.f32 %v1647_v42, %v1514_v22  ;;  %v2127_v50 = vpop.f32.mrf.mxu2  ;;  %v4403_v22 = vor.u32 %v5116_v0, %v4400_v4 }
 0x1fd   : > { %v1517_v57 = vpop.f32.mrf.mxu0 }
 0x200   : > { %v2260_v5 = vpop.f32.mrf.mxu3  ;;  %1556 = vmatmul.bf16.gmra.mxu0 %v4073_v51  ;;  %2169 = vmatmul.bf16.gmra.mxu2 %v4399_v56  ;;  %v4080_v56 = vld [vmem:[%s5828_s8 + $0x110] sm:$0xf] }
 0x201   : > { %v6142_v9 = vadd.f32 %v2260_v5, %v2127_v50  ;;  %v4406_v50 = vld [vmem:[%s5828_s8 + $0x298] sm:$0xf] }
 0x202   : > { %v1650_v23 = vpop.f32.mrf.mxu1 }
 0x203   : > { %v6146_v31 = vadd.f32 %v1650_v23, %v1517_v57  ;;  %v2130_v35 = vpop.f32.mrf.mxu2  ;;  %v4085_v57 = vor.u32 %v5070_v24, %v4082_v48  ;;  %v5121_v24 = vld [vmem:[%s5828_s8 + $0x2ac] sm:$0xf0] }
 0x205   : > { %4210 = vmatmul.msk.bf16.gmra.mxu1 %vm1385_vm2, %v4077_v16  ;;  %4476 = vmatmul.msk.bf16.gmra.mxu3 %vm1385_vm2, %v4403_v22  ;;  %v1519_v38 = vpop.f32.mrf.mxu0  ;;  %v4081_v16 = vor.u32 %v5071_v62, %v4080_v56  ;;  %v4407_v22 = vor.u32 %v5119_v63, %v4406_v50 }
 0x208   : > { %v2263_v42 = vpop.f32.mrf.mxu3 }
 0x209   : > { %v6151_v51 = vadd.f32 %v2263_v42, %v2130_v35 }
 0x20a   : > { %v1652_v0 = vpop.f32.mrf.mxu1 }
 0x20b   : > { %v6158_v4 = vadd.f32 %v1652_v0, %v1519_v38  ;;  %v2132_v5 = vpop.f32.mrf.mxu2  ;;  %v4411_v38 = vor.u32 %v5118_v14, %v4408_v43  ;;  %v4088_v43 = vld [vmem:[%s5828_s8 + $0x120] sm:$0xf]  ;;  %v5073_v14 = vld [vmem:[%s5828_s8 + $0x124] sm:$0xf0] }
 0x20d   : > { %v1522_v23 = vpop.f32.mrf.mxu0 }
 0x210   : > { %v2265_v35 = vpop.f32.mrf.mxu3  ;;  %1561 = vmatmul.bf16.gmra.mxu0 %v4081_v16  ;;  %2174 = vmatmul.bf16.gmra.mxu2 %v4407_v22 }
 0x211   : > { %v6164_v42 = vadd.f32 %v2265_v35, %v2132_v5  ;;  %v4414_v5 = vld [vmem:[%s5828_s8 + $0x2a8] sm:$0xf] }
 0x212   : > { %v1655_v0 = vpop.f32.mrf.mxu1 }
 0x213   : > { %v6168_v56 = vadd.f32 %v1655_v0, %v1522_v23  ;;  %v2135_v62 = vpop.f32.mrf.mxu2  ;;  %v4089_v0 = vor.u32 %v5073_v14, %v4088_v43  ;;  %v4093_v23 = vor.u32 %v5072_v17, %v4090_v52  ;;  %v5123_v17 = vld [vmem:[%s5828_s8 + $0x2bc] sm:$0xf0] }
 0x215   : > { %4211 = vmatmul.msk.bf16.gmra.mxu1 %vm1385_vm2, %v4085_v57  ;;  %4477 = vmatmul.msk.bf16.gmra.mxu3 %vm1385_vm2, %v4411_v38  ;;  %v1524_v63 = vpop.f32.mrf.mxu0  ;;  %v4415_v38 = vor.u32 %v5121_v24, %v4414_v5 }
 0x218   : > { %v2268_v16 = vpop.f32.mrf.mxu3 }
 0x219   : > { %v6173_v48 = vadd.f32 %v2268_v16, %v2135_v62 }
 0x21a   : > { %v1657_v22 = vpop.f32.mrf.mxu1 }
 0x21b   : > { %v6180_v35 = vadd.f32 %v1657_v22, %v1524_v63  ;;  %v2137_v57 = vpop.f32.mrf.mxu2  ;;  %v4419_v63 = vor.u32 %v5120_v36, %v4416_v11  ;;  %v4096_v11 = vld [vmem:[%s5828_s8 + $0x130] sm:$0xf]  ;;  %v5075_v36 = vld [vmem:[%s5828_s8 + $0x134] sm:$0xf0] }
 0x21d   : > { %v1527_v50 = vpop.f32.mrf.mxu0 }
 0x220   : > { %v2270_v62 = vpop.f32.mrf.mxu3  ;;  %1566 = vmatmul.bf16.gmra.mxu0 %v4089_v0  ;;  %2179 = vmatmul.bf16.gmra.mxu2 %v4415_v38 }
 0x221   : > { %v6186_v16 = vadd.f32 %v2270_v62, %v2137_v57  ;;  %v4422_v57 = vld [vmem:[%s5828_s8 + $0x2b8] sm:$0xf] }
 0x222   : > { %v1660_v22 = vpop.f32.mrf.mxu1 }
 0x223   : > { %v6190_v43 = vadd.f32 %v1660_v22, %v1527_v50  ;;  %v2140_v14 = vpop.f32.mrf.mxu2  ;;  %v4097_v22 = vor.u32 %v5075_v36, %v4096_v11  ;;  %v4101_v50 = vor.u32 %v5074_v58, %v4098_v40  ;;  %v5125_v58 = vld [vmem:[%s5828_s8 + $0x2cc] sm:$0xf0] }
 0x225   : > { %4212 = vmatmul.msk.bf16.gmra.mxu1 %vm1385_vm2, %v4093_v23  ;;  %4478 = vmatmul.msk.bf16.gmra.mxu3 %vm1385_vm2, %v4419_v63  ;;  %v1529_v24 = vpop.f32.mrf.mxu0  ;;  %v4423_v63 = vor.u32 %v5123_v17, %v4422_v57 }
 0x228   : > { %v2273_v0 = vpop.f32.mrf.mxu3 }
 0x229   : > { %v6195_v52 = vadd.f32 %v2273_v0, %v2140_v14 }
 0x22a   : > { %v1662_v38 = vpop.f32.mrf.mxu1 }
 0x22b   : > { %v6202_v62 = vadd.f32 %v1662_v38, %v1529_v24  ;;  %v2142_v23 = vpop.f32.mrf.mxu2  ;;  %v4427_v24 = vor.u32 %v5122_v25, %v4424_v6  ;;  %v4104_v6 = vld [vmem:[%s5828_s8 + $0x140] sm:$0xf]  ;;  %v5077_v25 = vld [vmem:[%s5828_s8 + $0x144] sm:$0xf0] }
 0x22d   : > { %7043 = vst [vmem:[#allocation3_spill] sm:$0xff] %v6202_v62  ;;  %v1532_v5 = vpop.f32.mrf.mxu0 }
 0x230   : > { %v2275_v14 = vpop.f32.mrf.mxu3  ;;  %1571 = vmatmul.bf16.gmra.mxu0 %v4097_v22  ;;  %2184 = vmatmul.bf16.gmra.mxu2 %v4423_v63 }
 0x231   : > { %v6208_v0 = vadd.f32 %v2275_v14, %v2142_v23  ;;  %v4430_v23 = vld [vmem:[%s5828_s8 + $0x2c8] sm:$0xf] }
 0x232   : > { %v1665_v38 = vpop.f32.mrf.mxu1 }
 0x233   : > { %7044 = vst [vmem:[#allocation4_spill] sm:$0xff] %v6208_v0  ;;  %v6212_v11 = vadd.f32 %v1665_v38, %v1532_v5  ;;  %v2145_v36 = vpop.f32.mrf.mxu2  ;;  %v4105_v38 = vor.u32 %v5077_v25, %v4104_v6  ;;  %v4109_v5 = vor.u32 %v5076_v59, %v4106_v44  ;;  %v5127_v59 = vld [vmem:[%s5828_s8 + $0x2dc] sm:$0xf0] }
 0x235   : > { %7045 = vst [vmem:[#allocation5_spill] sm:$0xff] %v6212_v11  ;;  %4213 = vmatmul.msk.bf16.gmra.mxu1 %vm1385_vm2, %v4101_v50  ;;  %4479 = vmatmul.msk.bf16.gmra.mxu3 %vm1385_vm2, %v4427_v24  ;;  %v1534_v17 = vpop.f32.mrf.mxu0  ;;  %v4431_v24 = vor.u32 %v5125_v58, %v4430_v23  ;;  %v4440_v11 = vld [vmem:[%s5828_s8 + $0x2e0] sm:$0xf0] }
 0x238   : > { %v2278_v22 = vpop.f32.mrf.mxu3 }
 0x239   : > { %v6217_v40 = vadd.f32 %v2278_v22, %v2145_v36 }
 0x23a   : > { %v1667_v63 = vpop.f32.mrf.mxu1 }
 0x23b   : > { %7046 = vst [vmem:[#allocation6_spill] sm:$0xff] %v6217_v40  ;;  %v6224_v14 = vadd.f32 %v1667_v63, %v1534_v17  ;;  %v2147_v50 = vpop.f32.mrf.mxu2  ;;  %v4435_v17 = vor.u32 %v5124_v33, %v4432_v18  ;;  %v4112_v18 = vld [vmem:[%s5828_s8 + $0x150] sm:$0xf]  ;;  %v5079_v33 = vld [vmem:[%s5828_s8 + $0x154] sm:$0xf0] }
 0x23c   : > { %v5126_v40 = vld [vmem:[%s5828_s8 + $0x2dc] sm:$0xf] }
 0x23d   : > { %7047 = vst [vmem:[#allocation7_spill] sm:$0xff] %v6224_v14  ;;  %v1537_v57 = vpop.f32.mrf.mxu0  ;;  %v4114_v14 = vld [vmem:[%s5828_s8 + $0x158] sm:$0xf0] }
 0x240   : > { %v2280_v36 = vpop.f32.mrf.mxu3  ;;  %1576 = vmatmul.bf16.gmra.mxu0 %v4105_v38  ;;  %2189 = vmatmul.bf16.gmra.mxu2 %v4431_v24 }
 0x241   : > { %v6230_v22 = vadd.f32 %v2280_v36, %v2147_v50  ;;  %v4438_v50 = vld [vmem:[%s5828_s8 + $0x2d8] sm:$0xf] }
 0x242   : > { %v1670_v63 = vpop.f32.mrf.mxu1 }
 0x243   : > { %7048 = vst [vmem:[#allocation8_spill] sm:$0xff] %v6230_v22  ;;  %v6234_v6 = vadd.f32 %v1670_v63, %v1537_v57  ;;  %v2150_v25 = vpop.f32.mrf.mxu2  ;;  %v4113_v63 = vor.u32 %v5079_v33, %v4112_v18  ;;  %v5078_v22 = vld [vmem:[%s5828_s8 + $0x154] sm:$0xf] }
 0x244   : > { %v4117_v57 = vor.u32 %v5078_v22, %v4114_v14  ;;  %v5129_v22 = vld [vmem:[%s5828_s8 + $0x2ec] sm:$0xf0] }
 0x245   : > { %7049 = vst [vmem:[#allocation9_spill] sm:$0xff] %v6234_v6  ;;  %4214 = vmatmul.msk.bf16.gmra.mxu1 %vm1385_vm2, %v4109_v5  ;;  %4480 = vmatmul.msk.bf16.gmra.mxu3 %vm1385_vm2, %v4435_v17  ;;  %v1539_v58 = vpop.f32.mrf.mxu0  ;;  %v4439_v17 = vor.u32 %v5127_v59, %v4438_v50  ;;  %v4448_v6 = vld [vmem:[%s5828_s8 + $0x2f0] sm:$0xf0] }
 0x248   : > { %v2283_v38 = vpop.f32.mrf.mxu3 }
 0x249   : > { %v6239_v44 = vadd.f32 %v2283_v38, %v2150_v25 }
 0x24a   : > { %v1672_v24 = vpop.f32.mrf.mxu1 }
 0x24b   : > { %7050 = vst [vmem:[#allocation10_spill] sm:$0xff] %v6239_v44  ;;  %v6246_v36 = vadd.f32 %v1672_v24, %v1539_v58  ;;  %v2152_v5 = vpop.f32.mrf.mxu2  ;;  %v4443_v58 = vor.u32 %v5126_v40, %v4440_v11  ;;  %v4120_v11 = vld [vmem:[%s5828_s8 + $0x160] sm:$0xf]  ;;  %v5081_v40 = vld [vmem:[%s5828_s8 + $0x164] sm:$0xf0] }
 0x24c   : > { %v5128_v44 = vld [vmem:[%s5828_s8 + $0x2ec] sm:$0xf] }
 0x24d   : > { %7051 = vst [vmem:[#allocation11_spill] sm:$0xff] %v6246_v36  ;;  %v1542_v23 = vpop.f32.mrf.mxu0  ;;  %v4122_v36 = vld [vmem:[%s5828_s8 + $0x168] sm:$0xf0] }
 0x250   : > { %v2285_v25 = vpop.f32.mrf.mxu3  ;;  %1581 = vmatmul.bf16.gmra.mxu0 %v4113_v63  ;;  %2194 = vmatmul.bf16.gmra.mxu2 %v4439_v17 }
 0x251   : > { %v6252_v38 = vadd.f32 %v2285_v25, %v2152_v5  ;;  %v4446_v5 = vld [vmem:[%s5828_s8 + $0x2e8] sm:$0xf] }
 0x252   : > { %v1675_v24 = vpop.f32.mrf.mxu1 }
 0x253   : > { %7052 = vst [vmem:[#allocation12_spill] sm:$0xff] %v6252_v38  ;;  %v6256_v18 = vadd.f32 %v1675_v24, %v1542_v23  ;;  %v2155_v33 = vpop.f32.mrf.mxu2  ;;  %v4121_v24 = vor.u32 %v5081_v40, %v4120_v11  ;;  %v5080_v38 = vld [vmem:[%s5828_s8 + $0x164] sm:$0xf] }
 0x254   : > { %v4125_v23 = vor.u32 %v5080_v38, %v4122_v36  ;;  %v5131_v38 = vld [vmem:[%s5828_s8 + $0x2fc] sm:$0xf0] }
 0x255   : > { %7053 = vst [vmem:[#allocation13_spill] sm:$0xff] %v6256_v18  ;;  %4215 = vmatmul.msk.bf16.gmra.mxu1 %vm1385_vm2, %v4117_v57  ;;  %4481 = vmatmul.msk.bf16.gmra.mxu3 %vm1385_vm2, %v4443_v58  ;;  %v1544_v59 = vpop.f32.mrf.mxu0  ;;  %v4447_v58 = vor.u32 %v5129_v22, %v4446_v5 }
 0x258   : > { %v2288_v63 = vpop.f32.mrf.mxu3 }
 0x259   : > { %v6261_v14 = vadd.f32 %v2288_v63, %v2155_v33 }
 0x25a   : > { %v1677_v17 = vpop.f32.mrf.mxu1 }
 0x25b   : > { %7054 = vst [vmem:[#allocation14_spill] sm:$0xff] %v6261_v14  ;;  %v6268_v25 = vadd.f32 %v1677_v17, %v1544_v59  ;;  %v2157_v57 = vpop.f32.mrf.mxu2  ;;  %v4451_v59 = vor.u32 %v5128_v44, %v4448_v6  ;;  %v4128_v6 = vld [vmem:[%s5828_s8 + $0x170] sm:$0xf]  ;;  %v5083_v44 = vld [vmem:[%s5828_s8 + $0x174] sm:$0xf0] }
 0x25c   : > { %v5130_v14 = vld [vmem:[%s5828_s8 + $0x2fc] sm:$0xf] }
 0x25d   : > { %7055 = vst [vmem:[#allocation15_spill] sm:$0xff] %v6268_v25  ;;  %v1547_v50 = vpop.f32.mrf.mxu0  ;;  %v4130_v25 = vld [vmem:[%s5828_s8 + $0x178] sm:$0xf0] }
 0x260   : > { %v2290_v33 = vpop.f32.mrf.mxu3  ;;  %1586 = vmatmul.bf16.gmra.mxu0 %v4121_v24  ;;  %2199 = vmatmul.bf16.gmra.mxu2 %v4447_v58 }
 0x261   : > { %v6274_v63 = vadd.f32 %v2290_v33, %v2157_v57  ;;  %v4454_v57 = vld [vmem:[%s5828_s8 + $0x2f8] sm:$0xf] }
 0x262   : > { %v1680_v17 = vpop.f32.mrf.mxu1 }
 0x263   : > { %7056 = vst [vmem:[#allocation16_spill] sm:$0xff] %v6274_v63  ;;  %v6278_v11 = vadd.f32 %v1680_v17, %v1547_v50  ;;  %v2160_v40 = vpop.f32.mrf.mxu2  ;;  %v4129_v17 = vor.u32 %v5083_v44, %v4128_v6  ;;  %v5082_v63 = vld [vmem:[%s5828_s8 + $0x174] sm:$0xf] }
 0x264   : > { %v4133_v0 = vor.u32 %v5082_v63, %v4130_v25 }
 0x265   : > { %4216 = vmatmul.msk.bf16.gmra.mxu1 %vm1385_vm2, %v4125_v23  ;;  %4482 = vmatmul.msk.bf16.gmra.mxu3 %vm1385_vm2, %v4451_v59  ;;  %v1549_v22 = vpop.f32.mrf.mxu0  ;;  %v4455_v59 = vor.u32 %v5131_v38, %v4454_v57  ;;  %v1069_v38 = vld [vmem:[%s5828_s8 + $0x180] sm:$0xff] }
 0x268   : > { %v2293_v24 = vpop.f32.mrf.mxu3 }
 0x269   : > { %v6283_v36 = vadd.f32 %v2293_v24, %v2160_v40  ;;  %v4456_v40 = vld [vmem:[%s5828_s8 + $0x300] sm:$0xf0] }
 0x26a   : > { %v1682_v58 = vpop.f32.mrf.mxu1  ;;  %v4459_v62 = vor.u32 %v5130_v14, %v4456_v40 }
 0x26b   : > { %v6290_v33 = vadd.f32 %v1682_v58, %v1549_v22  ;;  %v2162_v23 = vpop.f32.mrf.mxu2  ;;  %v4267_v58 = vld [vmem:[%s5828_s8 + $0x308] sm:$0xff]  ;;  %v1216_v22 = vunpack.c.h.b16 %v1069_v38 }
 0x26d   : > { %7057 = vst [vmem:[#allocation17_spill] sm:$0xff] %v6290_v33  ;;  %v1552_v5 = vpop.f32.mrf.mxu0 }
 0x270   : > { %v2295_v24 = vpop.f32.mrf.mxu3  ;;  %1591 = vmatmul.bf16.gmra.mxu0 %v4129_v17  ;;  %2204 = vmatmul.bf16.gmra.mxu2 %v4455_v59  ;;  %v1215_v59 = vunpack.c.l.b16 %v1069_v38 }
 0x271   : > { %v6296_v18 = vadd.f32 %v2295_v24, %v2162_v23  ;;  %v1929_v23 = vunpack.c.l.b16 %v4267_v58 }
 0x272   : > { %v1685_v50 = vpop.f32.mrf.mxu1 }
 0x273   : > { %7058 = vst [vmem:[#allocation18_spill] sm:$0xff] %v6296_v18  ;;  %v6300_v6 = vadd.f32 %v1685_v50, %v1552_v5  ;;  %v2165_v57 = vpop.f32.mrf.mxu2  ;;  %v1265_v50 = vpack.c.b16 %v1215_v59, %v1215_v59  ;;  %v1979_v40 = vpack.c.b16 %v1929_v23, %v1929_v23 }
 0x275   : > { %7059 = vst [vmem:[#allocation19_spill] sm:$0xff] %v6300_v6  ;;  %4217 = vmatmul.msk.bf16.gmra.mxu1 %vm1385_vm2, %v4133_v0  ;;  %4483 = vmatmul.msk.bf16.gmra.mxu3 %vm1385_vm2, %v4459_v62  ;;  %v1554_v44 = vpop.f32.mrf.mxu0  ;;  %v1930_v62 = vunpack.c.h.b16 %v4267_v58  ;;  %v4804_v6 = vld [vmem:[%s5828_s8 + $0x4a0] sm:$0xf0] }
 0x277   : > { %v1980_v33 = vpack.c.b16 %v1930_v62, %v1930_v62 }
 0x278   : > { %v2298_v17 = vpop.f32.mrf.mxu3 }
 0x279   : > { %v6306_v24 = vadd.f32 %v2298_v17, %v2165_v57  ;;  %v1266_v17 = vpack.c.b16 %v1216_v22, %v1216_v22 }
 0x27a   : > { %v1687_v14 = vpop.f32.mrf.mxu1 }
 0x27b   : > { %7060 = vst [vmem:[#allocation20_spill] sm:$0xff] %v6306_v24  ;;  %v6310_v63 = vadd.f32 %v1687_v14, %v1554_v44  ;;  %v2167_v5 = vpop.f32.mrf.mxu2  ;;  %v4536_v14 = vld [vmem:[%s5828_s8 + $0x310] sm:$0xf]  ;;  %v5180_v24 = vld [vmem:[%s5828_s8 + $0x49c] sm:$0xf] }
 0x27d   : > { %7061 = vst [vmem:[#allocation21_spill] sm:$0xff] %v6310_v63  ;;  %v1557_v0 = vpop.f32.mrf.mxu0  ;;  %v4538_v63 = vld [vmem:[%s5828_s8 + $0x318] sm:$0xf0] }
 0x280   : > { %v2300_v18 = vpop.f32.mrf.mxu3  ;;  %1596 = vmatmul.bf16.gmra.mxu0 %v1265_v50  ;;  %2209 = vmatmul.bf16.gmra.mxu2 %v1979_v40  ;;  %v5181_v50 = vld [vmem:[%s5828_s8 + $0x49c] sm:$0xf0] }
 0x281   : > { %v6312_v57 = vadd.f32 %v2300_v18, %v2167_v5  ;;  %v4802_v18 = vld [vmem:[%s5828_s8 + $0x498] sm:$0xf] }
 0x282   : > { %v1690_v25 = vpop.f32.mrf.mxu1  ;;  %v5133_v5 = vld [vmem:[%s5828_s8 + $0x314] sm:$0xf0] }
 0x283   : > { %7062 = vst [vmem:[#allocation22_spill] sm:$0xff] %v6312_v57  ;;  %v6316_v59 = vadd.f32 %v1690_v25, %v1557_v0  ;;  %v2170_v23 = vpop.f32.mrf.mxu2  ;;  %v5132_v57 = vld [vmem:[%s5828_s8 + $0x314] sm:$0xf] }
 0x284   : > { %v4541_v25 = vor.u32 %v5132_v57, %v4538_v63  ;;  %v5183_v57 = vld [vmem:[%s5828_s8 + $0x4ac] sm:$0xf0] }
 0x285   : > { %7063 = vst [vmem:[#allocation23_spill] sm:$0xff] %v6316_v59  ;;  %4218 = vmatmul.msk.bf16.gmra.mxu1 %vm1385_vm2, %v1266_v17  ;;  %4484 = vmatmul.msk.bf16.gmra.mxu3 %vm1385_vm2, %v1980_v33  ;;  %v1559_v38 = vpop.f32.mrf.mxu0  ;;  %v4537_v17 = vor.u32 %v5133_v5, %v4536_v14  ;;  %v4803_v33 = vor.u32 %v5181_v50, %v4802_v18  ;;  %v4812_v59 = vld [vmem:[%s5828_s8 + $0x4b0] sm:$0xf0] }
 0x288   : > { %v2303_v58 = vpop.f32.mrf.mxu3 }
 0x289   : > { %v6321_v22 = vadd.f32 %v2303_v58, %v2170_v23 }
 0x28a   : > { %v1692_v40 = vpop.f32.mrf.mxu1 }
 0x28b   : > { %7064 = vst [vmem:[#allocation24_spill] sm:$0xff] %v6321_v22  ;;  %v6328_v0 = vadd.f32 %v1692_v40, %v1559_v38  ;;  %v2172_v62 = vpop.f32.mrf.mxu2  ;;  %v4807_v38 = vor.u32 %v5180_v24, %v4804_v6  ;;  %v4544_v6 = vld [vmem:[%s5828_s8 + $0x320] sm:$0xf]  ;;  %v5135_v24 = vld [vmem:[%s5828_s8 + $0x324] sm:$0xf0] }
 0x28c   : > { %v5182_v22 = vld [vmem:[%s5828_s8 + $0x4ac] sm:$0xf] }
 0x28d   : > { %7065 = vst [vmem:[#allocation25_spill] sm:$0xff] %v6328_v0  ;;  %v1562_v44 = vpop.f32.mrf.mxu0  ;;  %v4546_v0 = vld [vmem:[%s5828_s8 + $0x328] sm:$0xf0] }
 0x290   : > { %v2305_v23 = vpop.f32.mrf.mxu3  ;;  %2751 = vmatmul.bf16.vlgmr.msrb.gmra.mxu0 %v4537_v17  ;;  %3413 = vmatmul.bf16.vlgmr.msrb.gmra.mxu2 %v4803_v33 }
 0x291   : > { %v6334_v58 = vadd.f32 %v2305_v23, %v2172_v62  ;;  %v4810_v62 = vld [vmem:[%s5828_s8 + $0x4a8] sm:$0xf] }
 0x292   : > { %v1695_v40 = vpop.f32.mrf.mxu1 }
 0x293   : > { %7066 = vst [vmem:[#allocation26_spill] sm:$0xff] %v6334_v58  ;;  %v6338_v14 = vadd.f32 %v1695_v40, %v1562_v44  ;;  %v2175_v5 = vpop.f32.mrf.mxu2  ;;  %v4545_v40 = vor.u32 %v5135_v24, %v4544_v6  ;;  %v5134_v58 = vld [vmem:[%s5828_s8 + $0x324] sm:$0xf] }
 0x294   : > { %v4549_v44 = vor.u32 %v5134_v58, %v4546_v0  ;;  %v5185_v58 = vld [vmem:[%s5828_s8 + $0x4bc] sm:$0xf0] }
 0x295   : > { %7067 = vst [vmem:[#allocation27_spill] sm:$0xff] %v6338_v14  ;;  %4726 = vmatmul.msk.bf16.vlgmr.msrb.gmra.mxu1 %vm1385_vm2, %v4541_v25  ;;  %4992 = vmatmul.msk.bf16.vlgmr.msrb.gmra.mxu3 %vm1385_vm2, %v4807_v38  ;;  %v1564_v50 = vpop.f32.mrf.mxu0  ;;  %v4811_v38 = vor.u32 %v5183_v57, %v4810_v62  ;;  %v4820_v14 = vld [vmem:[%s5828_s8 + $0x4c0] sm:$0xf0] }
 0x298   : > { %v2308_v17 = vpop.f32.mrf.mxu3 }
 0x299   : > { %v6343_v63 = vadd.f32 %v2308_v17, %v2175_v5 }
 0x29a   : > { %v1697_v33 = vpop.f32.mrf.mxu1 }
 0x29b   : > { %7068 = vst [vmem:[#allocation28_spill] sm:$0xff] %v6343_v63  ;;  %v6350_v23 = vadd.f32 %v1697_v33, %v1564_v50  ;;  %v2177_v25 = vpop.f32.mrf.mxu2  ;;  %v4815_v50 = vor.u32 %v5182_v22, %v4812_v59  ;;  %v4552_v59 = vld [vmem:[%s5828_s8 + $0x330] sm:$0xf]  ;;  %v5137_v22 = vld [vmem:[%s5828_s8 + $0x334] sm:$0xf0] }
 0x29c   : > { %v5184_v63 = vld [vmem:[%s5828_s8 + $0x4bc] sm:$0xf] }
 0x29d   : > { %7069 = vst [vmem:[#allocation29_spill] sm:$0xff] %v6350_v23  ;;  %v1567_v18 = vpop.f32.mrf.mxu0  ;;  %v4554_v23 = vld [vmem:[%s5828_s8 + $0x338] sm:$0xf0] }
 0x2a0   : > { %v2310_v5 = vpop.f32.mrf.mxu3  ;;  %2756 = vmatmul.bf16.gmra.mxu0 %v4545_v40  ;;  %3418 = vmatmul.bf16.gmra.mxu2 %v4811_v38 }
 0x2a1   : > { %v6356_v17 = vadd.f32 %v2310_v5, %v2177_v25  ;;  %v4818_v25 = vld [vmem:[%s5828_s8 + $0x4b8] sm:$0xf] }
 0x2a2   : > { %v1700_v33 = vpop.f32.mrf.mxu1 }
 0x2a3   : > { %7070 = vst [vmem:[#allocation30_spill] sm:$0xff] %v6356_v17  ;;  %v6360_v6 = vadd.f32 %v1700_v33, %v1567_v18  ;;  %v2180_v24 = vpop.f32.mrf.mxu2  ;;  %v4553_v33 = vor.u32 %v5137_v22, %v4552_v59  ;;  %v5136_v17 = vld [vmem:[%s5828_s8 + $0x334] sm:$0xf] }
 0x2a4   : > { %v4557_v18 = vor.u32 %v5136_v17, %v4554_v23  ;;  %v5187_v17 = vld [vmem:[%s5828_s8 + $0x4cc] sm:$0xf0] }
 0x2a5   : > { %7071 = vst [vmem:[#allocation31_spill] sm:$0xff] %v6360_v6  ;;  %4727 = vmatmul.msk.bf16.gmra.mxu1 %vm1385_vm2, %v4549_v44  ;;  %4993 = vmatmul.msk.bf16.gmra.mxu3 %vm1385_vm2, %v4815_v50  ;;  %v1569_v57 = vpop.f32.mrf.mxu0  ;;  %v4819_v50 = vor.u32 %v5185_v58, %v4818_v25  ;;  %v4828_v6 = vld [vmem:[%s5828_s8 + $0x4d0] sm:$0xf0] }
 0x2a8   : > { %v2313_v40 = vpop.f32.mrf.mxu3 }
 0x2a9   : > { %v6365_v0 = vadd.f32 %v2313_v40, %v2180_v24 }
 0x2aa   : > { %v1702_v38 = vpop.f32.mrf.mxu1 }
 0x2ab   : > { %7072 = vst [vmem:[#allocation32_spill] sm:$0xff] %v6365_v0  ;;  %v6372_v5 = vadd.f32 %v1702_v38, %v1569_v57  ;;  %v2182_v44 = vpop.f32.mrf.mxu2  ;;  %v4823_v57 = vor.u32 %v5184_v63, %v4820_v14  ;;  %v4560_v14 = vld [vmem:[%s5828_s8 + $0x340] sm:$0xf]  ;;  %v5139_v63 = vld [vmem:[%s5828_s8 + $0x344] sm:$0xf0] }
 0x2ac   : > { %v5186_v0 = vld [vmem:[%s5828_s8 + $0x4cc] sm:$0xf] }
 0x2ad   : > { %7073 = vst [vmem:[#allocation33_spill] sm:$0xff] %v6372_v5  ;;  %v1572_v62 = vpop.f32.mrf.mxu0  ;;  %v4562_v5 = vld [vmem:[%s5828_s8 + $0x348] sm:$0xf0] }
 0x2b0   : > { %v2315_v24 = vpop.f32.mrf.mxu3  ;;  %2761 = vmatmul.bf16.gmra.mxu0 %v4553_v33  ;;  %3423 = vmatmul.bf16.gmra.mxu2 %v4819_v50 }
 0x2b1   : > { %v6378_v40 = vadd.f32 %v2315_v24, %v2182_v44  ;;  %v4826_v44 = vld [vmem:[%s5828_s8 + $0x4c8] sm:$0xf] }
 0x2b2   : > { %v1705_v38 = vpop.f32.mrf.mxu1 }
 0x2b3   : > { %7074 = vst [vmem:[#allocation34_spill] sm:$0xff] %v6378_v40  ;;  %v6382_v59 = vadd.f32 %v1705_v38, %v1572_v62  ;;  %v2185_v22 = vpop.f32.mrf.mxu2  ;;  %v4561_v38 = vor.u32 %v5139_v63, %v4560_v14  ;;  %v5138_v40 = vld [vmem:[%s5828_s8 + $0x344] sm:$0xf] }
 0x2b4   : > { %v4565_v62 = vor.u32 %v5138_v40, %v4562_v5  ;;  %v5189_v40 = vld [vmem:[%s5828_s8 + $0x4dc] sm:$0xf0] }
 0x2b5   : > { %7075 = vst [vmem:[#allocation35_spill] sm:$0xff] %v6382_v59  ;;  %4728 = vmatmul.msk.bf16.gmra.mxu1 %vm1385_vm2, %v4557_v18  ;;  %4994 = vmatmul.msk.bf16.gmra.mxu3 %vm1385_vm2, %v4823_v57  ;;  %v1574_v58 = vpop.f32.mrf.mxu0  ;;  %v4827_v57 = vor.u32 %v5187_v17, %v4826_v44  ;;  %v4836_v59 = vld [vmem:[%s5828_s8 + $0x4e0] sm:$0xf0] }
 0x2b8   : > { %v2318_v33 = vpop.f32.mrf.mxu3 }
 0x2b9   : > { %v6387_v23 = vadd.f32 %v2318_v33, %v2185_v22 }
 0x2ba   : > { %v1707_v50 = vpop.f32.mrf.mxu1 }
 0x2bb   : > { %7076 = vst [vmem:[#allocation36_spill] sm:$0xff] %v6387_v23  ;;  %v6394_v24 = vadd.f32 %v1707_v50, %v1574_v58  ;;  %v2187_v18 = vpop.f32.mrf.mxu2  ;;  %v4831_v58 = vor.u32 %v5186_v0, %v4828_v6  ;;  %v4568_v6 = vld [vmem:[%s5828_s8 + $0x350] sm:$0xf]  ;;  %v5141_v0 = vld [vmem:[%s5828_s8 + $0x354] sm:$0xf0] }
 0x2bc   : > { %v5188_v23 = vld [vmem:[%s5828_s8 + $0x4dc] sm:$0xf] }
 0x2bd   : > { %7077 = vst [vmem:[#allocation37_spill] sm:$0xff] %v6394_v24  ;;  %v1577_v25 = vpop.f32.mrf.mxu0  ;;  %v4570_v24 = vld [vmem:[%s5828_s8 + $0x358] sm:$0xf0] }
 0x2c0   : > { %v2320_v22 = vpop.f32.mrf.mxu3  ;;  %2766 = vmatmul.bf16.gmra.mxu0 %v4561_v38  ;;  %3428 = vmatmul.bf16.gmra.mxu2 %v4827_v57 }
 0x2c1   : > { %v6400_v33 = vadd.f32 %v2320_v22, %v2187_v18  ;;  %v4834_v18 = vld [vmem:[%s5828_s8 + $0x4d8] sm:$0xf] }
 0x2c2   : > { %v1710_v50 = vpop.f32.mrf.mxu1 }
 0x2c3   : > { %7078 = vst [vmem:[#allocation38_spill] sm:$0xff] %v6400_v33  ;;  %v6404_v14 = vadd.f32 %v1710_v50, %v1577_v25  ;;  %v2190_v63 = vpop.f32.mrf.mxu2  ;;  %v4569_v50 = vor.u32 %v5141_v0, %v4568_v6  ;;  %v5140_v33 = vld [vmem:[%s5828_s8 + $0x354] sm:$0xf] }
 0x2c4   : > { %v4573_v25 = vor.u32 %v5140_v33, %v4570_v24  ;;  %v5191_v33 = vld [vmem:[%s5828_s8 + $0x4ec] sm:$0xf0] }
 0x2c5   : > { %7079 = vst [vmem:[#allocation39_spill] sm:$0xff] %v6404_v14  ;;  %4729 = vmatmul.msk.bf16.gmra.mxu1 %vm1385_vm2, %v4565_v62  ;;  %4995 = vmatmul.msk.bf16.gmra.mxu3 %vm1385_vm2, %v4831_v58  ;;  %v1579_v17 = vpop.f32.mrf.mxu0  ;;  %v4835_v58 = vor.u32 %v5189_v40, %v4834_v18  ;;  %v4844_v14 = vld [vmem:[%s5828_s8 + $0x4f0] sm:$0xf0] }
 0x2c8   : > { %v2323_v38 = vpop.f32.mrf.mxu3 }
 0x2c9   : > { %v6409_v5 = vadd.f32 %v2323_v38, %v2190_v63 }
 0x2ca   : > { %v1712_v57 = vpop.f32.mrf.mxu1 }
 0x2cb   : > { %7080 = vst [vmem:[#allocation40_spill] sm:$0xff] %v6409_v5  ;;  %v6416_v22 = vadd.f32 %v1712_v57, %v1579_v17  ;;  %v2192_v62 = vpop.f32.mrf.mxu2  ;;  %v4839_v17 = vor.u32 %v5188_v23, %v4836_v59  ;;  %v4576_v59 = vld [vmem:[%s5828_s8 + $0x360] sm:$0xf]  ;;  %v5143_v23 = vld [vmem:[%s5828_s8 + $0x364] sm:$0xf0] }
 0x2cc   : > { %v5190_v5 = vld [vmem:[%s5828_s8 + $0x4ec] sm:$0xf] }
 0x2cd   : > { %7081 = vst [vmem:[#allocation41_spill] sm:$0xff] %v6416_v22  ;;  %v1582_v44 = vpop.f32.mrf.mxu0  ;;  %v4578_v22 = vld [vmem:[%s5828_s8 + $0x368] sm:$0xf0] }
 0x2d0   : > { %v2325_v63 = vpop.f32.mrf.mxu3  ;;  %2771 = vmatmul.bf16.gmra.mxu0 %v4569_v50  ;;  %3433 = vmatmul.bf16.gmra.mxu2 %v4835_v58 }
 0x2d1   : > { %v6422_v38 = vadd.f32 %v2325_v63, %v2192_v62  ;;  %v4842_v62 = vld [vmem:[%s5828_s8 + $0x4e8] sm:$0xf] }
 0x2d2   : > { %v1715_v57 = vpop.f32.mrf.mxu1 }
 0x2d3   : > { %7082 = vst [vmem:[#allocation42_spill] sm:$0xff] %v6422_v38  ;;  %v6426_v6 = vadd.f32 %v1715_v57, %v1582_v44  ;;  %v2195_v0 = vpop.f32.mrf.mxu2  ;;  %v4577_v57 = vor.u32 %v5143_v23, %v4576_v59  ;;  %v5142_v38 = vld [vmem:[%s5828_s8 + $0x364] sm:$0xf] }
 0x2d4   : > { %v4581_v44 = vor.u32 %v5142_v38, %v4578_v22  ;;  %v5193_v38 = vld [vmem:[%s5828_s8 + $0x4fc] sm:$0xf0] }
 0x2d5   : > { %7083 = vst [vmem:[#allocation43_spill] sm:$0xff] %v6426_v6  ;;  %4730 = vmatmul.msk.bf16.gmra.mxu1 %vm1385_vm2, %v4573_v25  ;;  %4996 = vmatmul.msk.bf16.gmra.mxu3 %vm1385_vm2, %v4839_v17  ;;  %v1584_v40 = vpop.f32.mrf.mxu0  ;;  %v4843_v17 = vor.u32 %v5191_v33, %v4842_v62  ;;  %v4852_v6 = vld [vmem:[%s5828_s8 + $0x500] sm:$0xf0] }
 0x2d8   : > { %v2328_v50 = vpop.f32.mrf.mxu3 }
 0x2d9   : > { %v6431_v24 = vadd.f32 %v2328_v50, %v2195_v0 }
 0x2da   : > { %v1717_v58 = vpop.f32.mrf.mxu1 }
 0x2db   : > { %7084 = vst [vmem:[#allocation44_spill] sm:$0xff] %v6431_v24  ;;  %v6438_v63 = vadd.f32 %v1717_v58, %v1584_v40  ;;  %v2197_v25 = vpop.f32.mrf.mxu2  ;;  %v4847_v40 = vor.u32 %v5190_v5, %v4844_v14  ;;  %v4584_v14 = vld [vmem:[%s5828_s8 + $0x370] sm:$0xf]  ;;  %v5145_v5 = vld [vmem:[%s5828_s8 + $0x374] sm:$0xf0] }
 0x2dc   : > { %v5192_v24 = vld [vmem:[%s5828_s8 + $0x4fc] sm:$0xf] }
 0x2dd   : > { %7085 = vst [vmem:[#allocation45_spill] sm:$0xff] %v6438_v63  ;;  %v1587_v18 = vpop.f32.mrf.mxu0  ;;  %v4586_v63 = vld [vmem:[%s5828_s8 + $0x378] sm:$0xf0] }
 0x2e0   : > { %v2330_v0 = vpop.f32.mrf.mxu3  ;;  %2776 = vmatmul.bf16.gmra.mxu0 %v4577_v57  ;;  %3438 = vmatmul.bf16.gmra.mxu2 %v4843_v17 }
 0x2e1   : > { %v6444_v50 = vadd.f32 %v2330_v0, %v2197_v25  ;;  %v4850_v25 = vld [vmem:[%s5828_s8 + $0x4f8] sm:$0xf] }
 0x2e2   : > { %v1720_v58 = vpop.f32.mrf.mxu1 }
 0x2e3   : > { %7086 = vst [vmem:[#allocation46_spill] sm:$0xff] %v6444_v50  ;;  %v6448_v59 = vadd.f32 %v1720_v58, %v1587_v18  ;;  %v2200_v23 = vpop.f32.mrf.mxu2  ;;  %v4585_v58 = vor.u32 %v5145_v5, %v4584_v14  ;;  %v5144_v50 = vld [vmem:[%s5828_s8 + $0x374] sm:$0xf] }
 0x2e4   : > { %v4589_v18 = vor.u32 %v5144_v50, %v4586_v63  ;;  %v5195_v50 = vld [vmem:[%s5828_s8 + $0x50c] sm:$0xf0] }
 0x2e5   : > { %7087 = vst [vmem:[#allocation47_spill] sm:$0xff] %v6448_v59  ;;  %4731 = vmatmul.msk.bf16.gmra.mxu1 %vm1385_vm2, %v4581_v44  ;;  %4997 = vmatmul.msk.bf16.gmra.mxu3 %vm1385_vm2, %v4847_v40  ;;  %v1589_v33 = vpop.f32.mrf.mxu0  ;;  %v4851_v40 = vor.u32 %v5193_v38, %v4850_v25  ;;  %v4860_v59 = vld [vmem:[%s5828_s8 + $0x510] sm:$0xf0] }
 0x2e8   : > { %v2333_v57 = vpop.f32.mrf.mxu3 }
 0x2e9   : > { %v6453_v22 = vadd.f32 %v2333_v57, %v2200_v23 }
 0x2ea   : > { %v1722_v17 = vpop.f32.mrf.mxu1 }
 0x2eb   : > { %7088 = vst [vmem:[#allocation48_spill] sm:$0xff] %v6453_v22  ;;  %v6460_v0 = vadd.f32 %v1722_v17, %v1589_v33  ;;  %v2202_v44 = vpop.f32.mrf.mxu2  ;;  %v4855_v33 = vor.u32 %v5192_v24, %v4852_v6  ;;  %v4592_v6 = vld [vmem:[%s5828_s8 + $0x380] sm:$0xf]  ;;  %v5147_v24 = vld [vmem:[%s5828_s8 + $0x384] sm:$0xf0] }
 0x2ec   : > { %v5194_v22 = vld [vmem:[%s5828_s8 + $0x50c] sm:$0xf] }
 0x2ed   : > { %7089 = vst [vmem:[#allocation49_spill] sm:$0xff] %v6460_v0  ;;  %v1592_v62 = vpop.f32.mrf.mxu0  ;;  %v4594_v0 = vld [vmem:[%s5828_s8 + $0x388] sm:$0xf0] }
 0x2f0   : > { %v2335_v23 = vpop.f32.mrf.mxu3  ;;  %2781 = vmatmul.bf16.gmra.mxu0 %v4585_v58  ;;  %3443 = vmatmul.bf16.gmra.mxu2 %v4851_v40 }
 0x2f1   : > { %v6466_v57 = vadd.f32 %v2335_v23, %v2202_v44  ;;  %v4858_v44 = vld [vmem:[%s5828_s8 + $0x508] sm:$0xf] }
 0x2f2   : > { %v1725_v17 = vpop.f32.mrf.mxu1 }
 0x2f3   : > { %7090 = vst [vmem:[#allocation50_spill] sm:$0xff] %v6466_v57  ;;  %v6470_v14 = vadd.f32 %v1725_v17, %v1592_v62  ;;  %v2205_v5 = vpop.f32.mrf.mxu2  ;;  %v4593_v17 = vor.u32 %v5147_v24, %v4592_v6  ;;  %v5146_v57 = vld [vmem:[%s5828_s8 + $0x384] sm:$0xf] }
 0x2f4   : > { %v4597_v62 = vor.u32 %v5146_v57, %v4594_v0  ;;  %v4866_v0 = vld [vmem:[%s5828_s8 + $0x518] sm:$0xf] }
 0x2f5   : > { %7091 = vst [vmem:[#allocation51_spill] sm:$0xff] %v6470_v14  ;;  %4732 = vmatmul.msk.bf16.gmra.mxu1 %vm1385_vm2, %v4589_v18  ;;  %4998 = vmatmul.msk.bf16.gmra.mxu3 %vm1385_vm2, %v4855_v33  ;;  %v1594_v38 = vpop.f32.mrf.mxu0  ;;  %v4859_v33 = vor.u32 %v5195_v50, %v4858_v44  ;;  %v5149_v57 = vld [vmem:[%s5828_s8 + $0x394] sm:$0xf0]  ;;  %v4884_v14 = vld [vmem:[%s5828_s8 + $0x540] sm:$0xf0] }
 0x2f8   : > { %v2338_v58 = vpop.f32.mrf.mxu3 }
 0x2f9   : > { %v6475_v63 = vadd.f32 %v2338_v58, %v2205_v5 }
 0x2fa   : > { %v1727_v40 = vpop.f32.mrf.mxu1 }
 0x2fb   : > { %7092 = vst [vmem:[#allocation52_spill] sm:$0xff] %v6475_v63  ;;  %v6482_v23 = vadd.f32 %v1727_v40, %v1594_v38  ;;  %v2207_v18 = vpop.f32.mrf.mxu2  ;;  %v4863_v38 = vor.u32 %v5194_v22, %v4860_v59  ;;  %v4600_v22 = vld [vmem:[%s5828_s8 + $0x390] sm:$0xf] }
 0x2fd   : > { %7093 = vst [vmem:[#allocation53_spill] sm:$0xff] %v6482_v23  ;;  %v1597_v25 = vpop.f32.mrf.mxu0  ;;  %v4868_v23 = vld [vmem:[%s5828_s8 + $0x520] sm:$0xf0] }
 0x300   : > { %v2340_v5 = vpop.f32.mrf.mxu3  ;;  %2786 = vmatmul.bf16.gmra.mxu0 %v4593_v17  ;;  %3448 = vmatmul.bf16.gmra.mxu2 %v4859_v33  ;;  %v5197_v17 = vld [vmem:[%s5828_s8 + $0x51c] sm:$0xf0] }
 0x301   : > { %v6488_v58 = vadd.f32 %v2340_v5, %v2207_v18 }
 0x302   : > { %v1730_v40 = vpop.f32.mrf.mxu1 }
 0x303   : > { %7094 = vst [vmem:[#allocation54_spill] sm:$0xff] %v6488_v58  ;;  %v6492_v6 = vadd.f32 %v1730_v40, %v1597_v25  ;;  %v2210_v24 = vpop.f32.mrf.mxu2  ;;  %v4867_v40 = vor.u32 %v5197_v17, %v4866_v0  ;;  %v4602_v58 = vld [vmem:[%s5828_s8 + $0x398] sm:$0xf0]  ;;  %v6515_v17 = vld [vmem:[%s6987_s2] ss:$0 sm:$0xff] }
 0x305   : > { %7095 = vst [vmem:[#allocation55_spill] sm:$0xff] %v6492_v6  ;;  %4733 = vmatmul.msk.bf16.gmra.mxu1 %vm1385_vm2, %v4597_v62  ;;  %4999 = vmatmul.msk.bf16.gmra.mxu3 %vm1385_vm2, %v4863_v38  ;;  %v1599_v50 = vpop.f32.mrf.mxu0  ;;  %v4601_v62 = vor.u32 %v5149_v57, %v4600_v22  ;;  %v5148_v38 = vld [vmem:[%s5828_s8 + $0x394] sm:$0xf] }
 0x306   : > { %v5196_v50 = vld [vmem:[%s5828_s8 + $0x51c] sm:$0xf] }
 0x308   : > { %v2343_v18 = vpop.f32.mrf.mxu3 }
 0x309   : > { %v6497_v59 = vadd.f32 %v2343_v18, %v2210_v24  ;;  %v4605_v18 = vor.u32 %v5148_v38, %v4602_v58  ;;  %v4874_v58 = vld [vmem:[%s5828_s8 + $0x528] sm:$0xf]  ;;  %v5199_v38 = vld [vmem:[%s5828_s8 + $0x52c] sm:$0xf0] }
 0x30a   : > { %v1732_v25 = vpop.f32.mrf.mxu1 }
 0x30b   : > { %7096 = vst [vmem:[#allocation56_spill] sm:$0xff] %v6497_v59  ;;  %v2212_v5 = vpop.f32.mrf.mxu2  ;;  %v4871_v25 = vor.u32 %v5196_v50, %v4868_v23  ;;  %v7097_v23 = vmax.f32 %v5970_v8, %v5975_v13  ;;  %v4875_v59 = vor.u32 %v5199_v38, %v4874_v58  ;;  %v5150_v13 = vld [vmem:[%s5828_s8 + $0x3a4] sm:$0xf] }
 0x30d   : > { %v2752_v44 = vpop.f32.mrf.mxu0 }
 0x310   : > { %v2345_v24 = vpop.f32.mrf.mxu3  ;;  %2791 = vmatmul.bf16.gmra.mxu0 %v4601_v62  ;;  %3453 = vmatmul.bf16.gmra.mxu2 %v4867_v40 }
 0x312   : > { %v2885_v33 = vpop.f32.mrf.mxu1 }
 0x313   : > { %v3414_v5 = vpop.f32.mrf.mxu2  ;;  %v2886_v0 = vadd.f32 %v2885_v33, %v2752_v44  ;;  %v4608_v44 = vld [vmem:[%s5828_s8 + $0x3a0] sm:$0xf]  ;;  %v5151_v33 = vld [vmem:[%s5828_s8 + $0x3a4] sm:$0xf0] }
 0x315   : > { %4734 = vmatmul.msk.bf16.gmra.mxu1 %vm1385_vm2, %v4605_v18  ;;  %5000 = vmatmul.msk.bf16.gmra.mxu3 %vm1385_vm2, %v4871_v25  ;;  %v2754_v22 = vpop.f32.mrf.mxu0  ;;  %v3009_v62 = vmax.f32 %v7097_v23, %v2886_v0  ;;  %v4609_v25 = vor.u32 %v5151_v33, %v4608_v44  ;;  %v5198_v0 = vld [vmem:[%s5828_s8 + $0x52c] sm:$0xf] }
 0x318   : > { %v3547_v57 = vpop.f32.mrf.mxu3 }
 0x319   : > { %v3548_v40 = vadd.f32 %v3547_v57, %v3414_v5  ;;  %v4610_v5 = vld [vmem:[%s5828_s8 + $0x3a8] sm:$0xf0]  ;;  %v4876_v57 = vld [vmem:[%s5828_s8 + $0x530] sm:$0xf0] }
 0x31a   : > { %v2887_v50 = vpop.f32.mrf.mxu1  ;;  %v4613_v44 = vor.u32 %v5150_v13, %v4610_v5  ;;  %v4879_v33 = vor.u32 %v5198_v0, %v4876_v57  ;;  %v7099_v13 = vmax.f32 %v5992_v34, %v5997_v39  ;;  %v4616_v0 = vld [vmem:[%s5828_s8 + $0x3b0] sm:$0xf]  ;;  %v5153_v57 = vld [vmem:[%s5828_s8 + $0x3b4] sm:$0xf0] }
 0x31b   : > { %v3671_v24 = vmax.f32 %v3009_v62, %v3548_v40  ;;  %v3416_v18 = vpop.f32.mrf.mxu2  ;;  %v2888_v63 = vadd.f32 %v2887_v50, %v2754_v22  ;;  %v7098_v22 = vmax.f32 %v5982_v19, %v5988_v29 }
 0x31d   : > { %v3724_v6 = vadd.f32 %v6515_v17, %v3671_v24  ;;  %v2757_v8 = vpop.f32.mrf.mxu0  ;;  %v3010_v58 = vmax.f32 %v7098_v22, %v2888_v63  ;;  %v4882_v63 = vld [vmem:[%s5828_s8 + $0x538] sm:$0xf] }
 0x31f   : > { %v3773_v23 = vmax.f32 %v3724_v6, 0.0 }
 0x320   : > { %v3549_v62 = vpop.f32.mrf.mxu3  ;;  %2796 = vmatmul.bf16.gmra.mxu0 %v4609_v25  ;;  %3458 = vmatmul.bf16.gmra.mxu2 %v4875_v59 }
 0x321   : > { %3823 = vst.msk [vmem:[%s6529_s23] sm:$0xff] %vm3822_vm3, %v3773_v23  ;;  %v3550_v40 = vadd.f32 %v3549_v62, %v3416_v18  ;;  %v5201_v18 = vld [vmem:[%s5828_s8 + $0x53c] sm:$0xf0] }
 0x322   : > { %v2890_v38 = vpop.f32.mrf.mxu1 }
 0x323   : > { %v3672_v50 = vmax.f32 %v3010_v58, %v3550_v40  ;;  %v3419_v6 = vpop.f32.mrf.mxu2  ;;  %v2891_v59 = vadd.f32 %v2890_v38, %v2757_v8  ;;  %v4617_v58 = vor.u32 %v5153_v57, %v4616_v0  ;;  %v4883_v40 = vor.u32 %v5201_v18, %v4882_v63 }
 0x325   : > { %v3725_v24 = vadd.f32 %v6515_v17, %v3672_v50  ;;  %4735 = vmatmul.msk.bf16.gmra.mxu1 %vm1385_vm2, %v4613_v44  ;;  %5001 = vmatmul.msk.bf16.gmra.mxu3 %vm1385_vm2, %v4879_v33  ;;  %v2759_v25 = vpop.f32.mrf.mxu0  ;;  %v3011_v5 = vmax.f32 %v7099_v13, %v2891_v59  ;;  %v5152_v50 = vld [vmem:[%s5828_s8 + $0x3b4] sm:$0xf] }
 0x327   : > { %v3774_v19 = vmax.f32 %v3725_v24, 0.0  ;;  %v4618_v24 = vld [vmem:[%s5828_s8 + $0x3b8] sm:$0xf0] }
 0x328   : > { %v3552_v29 = vpop.f32.mrf.mxu3 }
 0x329   : > { %3824 = vst.msk [vmem:[%s6529_s23 + $0x8] sm:$0xff] %vm3822_vm3, %v3774_v19  ;;  %v3553_v8 = vadd.f32 %v3552_v29, %v3419_v6  ;;  %v5200_v19 = vld [vmem:[%s5828_s8 + $0x53c] sm:$0xf]  ;;  %v7100_v6 = vmax.f32 %v6004_v45, %v6010_v55 }
 0x32a   : > { %v2892_v23 = vpop.f32.mrf.mxu1  ;;  %v4887_v63 = vor.u32 %v5200_v19, %v4884_v14  ;;  %v7101_v14 = vmax.f32 %v6014_v60, %v6019_v1 }
 0x32b   : > { %v3673_v62 = vmax.f32 %v3011_v5, %v3553_v8  ;;  %v3421_v22 = vpop.f32.mrf.mxu2  ;;  %v2893_v33 = vadd.f32 %v2892_v23, %v2759_v25  ;;  %v4621_v25 = vor.u32 %v5152_v50, %v4618_v24  ;;  %v4890_v23 = vld [vmem:[%s5828_s8 + $0x548] sm:$0xf] }
 0x32d   : > { %v3726_v44 = vadd.f32 %v6515_v17, %v3673_v62  ;;  %v2762_v38 = vpop.f32.mrf.mxu0  ;;  %v3012_v59 = vmax.f32 %v7100_v6, %v2893_v33  ;;  %v5203_v62 = vld [vmem:[%s5828_s8 + $0x54c] sm:$0xf0] }
 0x32e   : > { %v4891_v19 = vor.u32 %v5203_v62, %v4890_v23 }
 0x32f   : > { %v3775_v34 = vmax.f32 %v3726_v44, 0.0  ;;  %v5155_v44 = vld [vmem:[%s5828_s8 + $0x3c4] sm:$0xf0] }
 0x330   : > { %v3554_v39 = vpop.f32.mrf.mxu3  ;;  %2801 = vmatmul.bf16.gmra.mxu0 %v4617_v58  ;;  %3463 = vmatmul.bf16.gmra.mxu2 %v4883_v40  ;;  %v4624_v40 = vld [vmem:[%s5828_s8 + $0x3c0] sm:$0xf] }
 0x331   : > { %3825 = vst.msk [vmem:[%s6529_s23 + $0x10] sm:$0xff] %vm3822_vm3, %v3775_v34  ;;  %v3555_v29 = vadd.f32 %v3554_v39, %v3421_v22  ;;  %v4625_v24 = vor.u32 %v5155_v44, %v4624_v40  ;;  %v7103_v40 = vmax.f32 %v6036_v26, %v6041_v32 }
 0x332   : > { %v2895_v18 = vpop.f32.mrf.mxu1 }
 0x333   : > { %v3674_v13 = vmax.f32 %v3012_v59, %v3555_v29  ;;  %v3424_v5 = vpop.f32.mrf.mxu2  ;;  %v2896_v0 = vadd.f32 %v2895_v18, %v2762_v38  ;;  %v5154_v59 = vld [vmem:[%s5828_s8 + $0x3c4] sm:$0xf]  ;;  %v4626_v29 = vld [vmem:[%s5828_s8 + $0x3c8] sm:$0xf0]  ;;  %v7102_v18 = vmax.f32 %v6026_v7, %v6032_v21 }
 0x335   : > { %v3727_v8 = vadd.f32 %v6515_v17, %v3674_v13  ;;  %4736 = vmatmul.msk.bf16.gmra.mxu1 %vm1385_vm2, %v4621_v25  ;;  %5002 = vmatmul.msk.bf16.gmra.mxu3 %vm1385_vm2, %v4887_v63  ;;  %v2764_v57 = vpop.f32.mrf.mxu0  ;;  %v3013_v22 = vmax.f32 %v7101_v14, %v2896_v0  ;;  %v5202_v25 = vld [vmem:[%s5828_s8 + $0x54c] sm:$0xf]  ;;  %v4892_v63 = vld [vmem:[%s5828_s8 + $0x550] sm:$0xf0] }
 0x336   : > { %v4895_v0 = vor.u32 %v5202_v25, %v4892_v63  ;;  %v5156_v63 = vld [vmem:[%s5828_s8 + $0x3d4] sm:$0xf] }
 0x337   : > { %v3776_v45 = vmax.f32 %v3727_v8, 0.0  ;;  %v4629_v8 = vor.u32 %v5154_v59, %v4626_v29 }
 0x338   : > { %v3557_v55 = vpop.f32.mrf.mxu3 }
 0x339   : > { %3826 = vst.msk [vmem:[%s6529_s23 + $0x18] sm:$0xff] %vm3822_vm3, %v3776_v45  ;;  %v3558_v58 = vadd.f32 %v3557_v55, %v3424_v5 }
 0x33a   : > { %v2897_v33 = vpop.f32.mrf.mxu1 }
 0x33b   : > { %v3675_v38 = vmax.f32 %v3013_v22, %v3558_v58  ;;  %v3426_v50 = vpop.f32.mrf.mxu2  ;;  %v2898_v39 = vadd.f32 %v2897_v33, %v2764_v57  ;;  %v4898_v22 = vld [vmem:[%s5828_s8 + $0x558] sm:$0xf]  ;;  %v5205_v58 = vld [vmem:[%s5828_s8 + $0x55c] sm:$0xf0] }
 0x33d   : > { %v3728_v34 = vadd.f32 %v6515_v17, %v3675_v38  ;;  %v2767_v6 = vpop.f32.mrf.mxu0  ;;  %v3014_v13 = vmax.f32 %v7102_v18, %v2898_v39  ;;  %v4632_v38 = vld [vmem:[%s5828_s8 + $0x3d0] sm:$0xf]  ;;  %v4900_v18 = vld [vmem:[%s5828_s8 + $0x560] sm:$0xf0] }
 0x33f   : > { %v3777_v60 = vmax.f32 %v3728_v34, 0.0 }
 0x340   : > { %v3559_v1 = vpop.f32.mrf.mxu3  ;;  %2806 = vmatmul.bf16.gmra.mxu0 %v4625_v24  ;;  %3468 = vmatmul.bf16.gmra.mxu2 %v4891_v19 }
 0x341   : > { %3827 = vst.msk [vmem:[%s6529_s23 + $0x20] sm:$0xff] %vm3822_vm3, %v3777_v60  ;;  %v3560_v5 = vadd.f32 %v3559_v1, %v3426_v50  ;;  %v5157_v50 = vld [vmem:[%s5828_s8 + $0x3d4] sm:$0xf0]  ;;  %v4634_v60 = vld [vmem:[%s5828_s8 + $0x3d8] sm:$0xf0] }
 0x342   : > { %v2900_v57 = vpop.f32.mrf.mxu1  ;;  %v4633_v39 = vor.u32 %v5157_v50, %v4632_v38  ;;  %v5204_v1 = vld [vmem:[%s5828_s8 + $0x55c] sm:$0xf]  ;;  %v5159_v38 = vld [vmem:[%s5828_s8 + $0x3e4] sm:$0xf0] }
 0x343   : > { %v3676_v45 = vmax.f32 %v3014_v13, %v3560_v5  ;;  %v3429_v55 = vpop.f32.mrf.mxu2  ;;  %v2901_v62 = vadd.f32 %v2900_v57, %v2767_v6  ;;  %v4899_v6 = vor.u32 %v5205_v58, %v4898_v22  ;;  %v7104_v13 = vmax.f32 %v6048_v41, %v6054_v53  ;;  %v5207_v22 = vld [vmem:[%s5828_s8 + $0x56c] sm:$0xf0] }
 0x344   : > { %v4903_v57 = vor.u32 %v5204_v1, %v4900_v18  ;;  %v7105_v58 = vmax.f32 %v6058_v61, %v6063_v3  ;;  %v4908_v1 = vld [vmem:[%s5828_s8 + $0x570] sm:$0xf0]  ;;  %v7106_v18 = vmax.f32 %v6070_v12, %v6076_v28 }
 0x345   : > { %v3729_v23 = vadd.f32 %v6515_v17, %v3676_v45  ;;  %4737 = vmatmul.msk.bf16.gmra.mxu1 %vm1385_vm2, %v4629_v8  ;;  %5003 = vmatmul.msk.bf16.gmra.mxu3 %vm1385_vm2, %v4895_v0  ;;  %v2769_v14 = vpop.f32.mrf.mxu0  ;;  %v3015_v44 = vmax.f32 %v7103_v40, %v2901_v62  ;;  %v4637_v0 = vor.u32 %v5156_v63, %v4634_v60  ;;  %v4642_v63 = vld [vmem:[%s5828_s8 + $0x3e8] sm:$0xf0] }
 0x346   : > { %v5206_v60 = vld [vmem:[%s5828_s8 + $0x56c] sm:$0xf] }
 0x347   : > { %v3778_v7 = vmax.f32 %v3729_v23, 0.0 }
 0x348   : > { %v3562_v21 = vpop.f32.mrf.mxu3 }
 0x349   : > { %3828 = vst.msk [vmem:[%s6529_s23 + $0x28] sm:$0xff] %vm3822_vm3, %v3778_v7  ;;  %v3563_v33 = vadd.f32 %v3562_v21, %v3429_v55  ;;  %v4906_v21 = vld [vmem:[%s5828_s8 + $0x568] sm:$0xf] }
 0x34a   : > { %v2902_v24 = vpop.f32.mrf.mxu1 }
 0x34b   : > { %v3677_v19 = vmax.f32 %v3015_v44, %v3563_v33  ;;  %v3431_v34 = vpop.f32.mrf.mxu2  ;;  %v2903_v29 = vadd.f32 %v2902_v24, %v2769_v14  ;;  %v4640_v33 = vld [vmem:[%s5828_s8 + $0x3e0] sm:$0xf] }
 0x34d   : > { %v3730_v59 = vadd.f32 %v6515_v17, %v3677_v19  ;;  %v2772_v25 = vpop.f32.mrf.mxu0  ;;  %v3016_v5 = vmax.f32 %v7104_v13, %v2903_v29 }
 0x34f   : > { %v3779_v26 = vmax.f32 %v3730_v59, 0.0 }
 0x350   : > { %v3564_v32 = vpop.f32.mrf.mxu3  ;;  %2811 = vmatmul.bf16.gmra.mxu0 %v4633_v39  ;;  %3473 = vmatmul.bf16.gmra.mxu2 %v4899_v6  ;;  %v4907_v39 = vor.u32 %v5207_v22, %v4906_v21  ;;  %v4648_v21 = vld [vmem:[%s5828_s8 + $0x3f0] sm:$0xf]  ;;  %v5161_v22 = vld [vmem:[%s5828_s8 + $0x3f4] sm:$0xf0] }
 0x351   : > { %3829 = vst.msk [vmem:[%s6529_s23 + $0x30] sm:$0xff] %vm3822_vm3, %v3779_v26  ;;  %v3565_v8 = vadd.f32 %v3564_v32, %v3431_v34  ;;  %v4641_v34 = vor.u32 %v5159_v38, %v4640_v33  ;;  %v4649_v33 = vor.u32 %v5161_v22, %v4648_v21  ;;  %v5162_v22 = vld [vmem:[%s5828_s8 + $0x404] sm:$0xf] }
 0x352   : > { %v2905_v45 = vpop.f32.mrf.mxu1 }
 0x353   : > { %v3678_v55 = vmax.f32 %v3016_v5, %v3565_v8  ;;  %v3434_v23 = vpop.f32.mrf.mxu2  ;;  %v2906_v14 = vadd.f32 %v2905_v45, %v2772_v25  ;;  %v5158_v25 = vld [vmem:[%s5828_s8 + $0x3e4] sm:$0xf]  ;;  %v4911_v5 = vor.u32 %v5206_v60, %v4908_v1 }
 0x354   : > { %v4645_v13 = vor.u32 %v5158_v25, %v4642_v63 }
 0x355   : > { %v3731_v62 = vadd.f32 %v6515_v17, %v3678_v55  ;;  %4738 = vmatmul.msk.bf16.gmra.mxu1 %vm1385_vm2, %v4637_v0  ;;  %5004 = vmatmul.msk.bf16.gmra.mxu3 %vm1385_vm2, %v4903_v57  ;;  %v2774_v7 = vpop.f32.mrf.mxu0  ;;  %v3017_v40 = vmax.f32 %v7105_v58, %v2906_v14  ;;  %v5209_v14 = vld [vmem:[%s5828_s8 + $0x57c] sm:$0xf0] }
 0x357   : > { %v3780_v41 = vmax.f32 %v3731_v62, 0.0  ;;  %v4914_v62 = vld [vmem:[%s5828_s8 + $0x578] sm:$0xf] }
 0x358   : > { %v3567_v53 = vpop.f32.mrf.mxu3  ;;  %v4915_v38 = vor.u32 %v5209_v14, %v4914_v62 }
 0x359   : > { %3830 = vst.msk [vmem:[%s6529_s23 + $0x38] sm:$0xff] %vm3822_vm3, %v3780_v41  ;;  %v3568_v44 = vadd.f32 %v3567_v53, %v3434_v23 }
 0x35a   : > { %v2907_v50 = vpop.f32.mrf.mxu1 }
 0x35b   : > { %v3679_v24 = vmax.f32 %v3017_v40, %v3568_v44  ;;  %v3436_v19 = vpop.f32.mrf.mxu2  ;;  %v2908_v59 = vadd.f32 %v2907_v50, %v2774_v7  ;;  %v7107_v7 = vmax.f32 %v6080_v37, %v6085_v47 }
 0x35d   : > { %v3732_v6 = vadd.f32 %v6515_v17, %v3679_v24  ;;  %v2777_v29 = vpop.f32.mrf.mxu0  ;;  %v3018_v26 = vmax.f32 %v7106_v18, %v2908_v59  ;;  %v4916_v59 = vld [vmem:[%s5828_s8 + $0x580] sm:$0xf0] }
 0x35f   : > { %v3781_v61 = vmax.f32 %v3732_v6, 0.0  ;;  %v5208_v6 = vld [vmem:[%s5828_s8 + $0x57c] sm:$0xf] }
 0x360   : > { %v3569_v3 = vpop.f32.mrf.mxu3  ;;  %2816 = vmatmul.bf16.gmra.mxu0 %v4641_v34  ;;  %3478 = vmatmul.bf16.gmra.mxu2 %v4907_v39  ;;  %v5160_v34 = vld [vmem:[%s5828_s8 + $0x3f4] sm:$0xf]  ;;  %v4650_v39 = vld [vmem:[%s5828_s8 + $0x3f8] sm:$0xf0]  ;;  %v4919_v1 = vor.u32 %v5208_v6, %v4916_v59 }
 0x361   : > { %3831 = vst.msk [vmem:[%s6529_s23 + $0x40] sm:$0xff] %vm3822_vm3, %v3781_v61  ;;  %v3570_v32 = vadd.f32 %v3569_v3, %v3436_v19  ;;  %v4653_v60 = vor.u32 %v5160_v34, %v4650_v39 }
 0x362   : > { %v2910_v8 = vpop.f32.mrf.mxu1 }
 0x363   : > { %v3680_v0 = vmax.f32 %v3018_v26, %v3570_v32  ;;  %v3439_v57 = vpop.f32.mrf.mxu2  ;;  %v2911_v55 = vadd.f32 %v2910_v8, %v2777_v29  ;;  %v7108_v29 = vmax.f32 %v6092_v54, %v6098_v10  ;;  %v5211_v8 = vld [vmem:[%s5828_s8 + $0x58c] sm:$0xf0] }
 0x365   : > { %v3733_v45 = vadd.f32 %v6515_v17, %v3680_v0  ;;  %4739 = vmatmul.msk.bf16.gmra.mxu1 %vm1385_vm2, %v4645_v13  ;;  %5005 = vmatmul.msk.bf16.gmra.mxu3 %vm1385_vm2, %v4911_v5  ;;  %v2779_v23 = vpop.f32.mrf.mxu0  ;;  %v3019_v41 = vmax.f32 %v7107_v7, %v2911_v55  ;;  %v4922_v5 = vld [vmem:[%s5828_s8 + $0x588] sm:$0xf]  ;;  %v7109_v0 = vmax.f32 %v6102_v20, %v6107_v30  ;;  %v4656_v55 = vld [vmem:[%s5828_s8 + $0x400] sm:$0xf] }
 0x366   : > { %v4923_v7 = vor.u32 %v5211_v8, %v4922_v5 }
 0x367   : > { %v3782_v12 = vmax.f32 %v3733_v45, 0.0 }
 0x368   : > { %v3572_v28 = vpop.f32.mrf.mxu3 }
 0x369   : > { %3832 = vst.msk [vmem:[%s6529_s23 + $0x48] sm:$0xff] %vm3822_vm3, %v3782_v12  ;;  %v3573_v53 = vadd.f32 %v3572_v28, %v3439_v57 }
 0x36a   : > { %v2912_v58 = vpop.f32.mrf.mxu1 }
 0x36b   : > { %v3681_v40 = vmax.f32 %v3019_v41, %v3573_v53  ;;  %v3441_v44 = vpop.f32.mrf.mxu2  ;;  %v2913_v24 = vadd.f32 %v2912_v58, %v2779_v23  ;;  %v5163_v23 = vld [vmem:[%s5828_s8 + $0x404] sm:$0xf0]  ;;  %v4658_v58 = vld [vmem:[%s5828_s8 + $0x408] sm:$0xf0] }
 0x36c   : > { %v4657_v14 = vor.u32 %v5163_v23, %v4656_v55  ;;  %v4932_v55 = vld [vmem:[%s5828_s8 + $0x5a0] sm:$0xf0]  ;;  %v7112_v23 = vmax.f32 %v6136_v49, %v6142_v9 }
 0x36d   : > { %v3734_v50 = vadd.f32 %v6515_v17, %v3681_v40  ;;  %v2782_v19 = vpop.f32.mrf.mxu0  ;;  %v3020_v25 = vmax.f32 %v7108_v29, %v2913_v24  ;;  %v5210_v40 = vld [vmem:[%s5828_s8 + $0x58c] sm:$0xf]  ;;  %v4661_v24 = vor.u32 %v5162_v22, %v4658_v58  ;;  %v4930_v29 = vld [vmem:[%s5828_s8 + $0x598] sm:$0xf] }
 0x36f   : > { %v3783_v37 = vmax.f32 %v3734_v50, 0.0 }
 0x370   : > { %v3574_v47 = vpop.f32.mrf.mxu3  ;;  %2821 = vmatmul.bf16.gmra.mxu0 %v4649_v33  ;;  %3483 = vmatmul.bf16.gmra.mxu2 %v4915_v38  ;;  %v7110_v33 = vmax.f32 %v6114_v46, %v6120_v2 }
 0x371   : > { %3833 = vst.msk [vmem:[%s6529_s23 + $0x50] sm:$0xff] %vm3822_vm3, %v3783_v37  ;;  %v3575_v63 = vadd.f32 %v3574_v47, %v3441_v44  ;;  %v4924_v44 = vld [vmem:[%s5828_s8 + $0x590] sm:$0xf0] }
 0x372   : > { %v2915_v61 = vpop.f32.mrf.mxu1 }
 0x373   : > { %v3682_v3 = vmax.f32 %v3020_v25, %v3575_v63  ;;  %v3444_v18 = vpop.f32.mrf.mxu2  ;;  %v2916_v32 = vadd.f32 %v2915_v61, %v2782_v19  ;;  %v4927_v19 = vor.u32 %v5210_v40, %v4924_v44  ;;  %v5213_v25 = vld [vmem:[%s5828_s8 + $0x59c] sm:$0xf0]  ;;  %v7111_v63 = vmax.f32 %v6124_v15, %v6129_v27  ;;  %v4664_v61 = vld [vmem:[%s5828_s8 + $0x410] sm:$0xf]  ;;  %v4938_v40 = vld [vmem:[%s5828_s8 + $0x5a8] sm:$0xf] }
 0x374   : > { %v5215_v44 = vld [vmem:[%s5828_s8 + $0x5ac] sm:$0xf0] }
 0x375   : > { %v3735_v26 = vadd.f32 %v6515_v17, %v3682_v3  ;;  %4740 = vmatmul.msk.bf16.gmra.mxu1 %vm1385_vm2, %v4653_v60  ;;  %5006 = vmatmul.msk.bf16.gmra.mxu3 %vm1385_vm2, %v4919_v1  ;;  %v2784_v13 = vpop.f32.mrf.mxu0  ;;  %v3021_v57 = vmax.f32 %v7109_v0, %v2916_v32  ;;  %v5165_v3 = vld [vmem:[%s5828_s8 + $0x414] sm:$0xf0]  ;;  %v5164_v0 = vld [vmem:[%s5828_s8 + $0x414] sm:$0xf] }
 0x377   : > { %v3784_v54 = vmax.f32 %v3735_v26, 0.0 }
 0x378   : > { %v3577_v10 = vpop.f32.mrf.mxu3 }
 0x379   : > { %3834 = vst.msk [vmem:[%s6529_s23 + $0x58] sm:$0xff] %vm3822_vm3, %v3784_v54  ;;  %v3578_v45 = vadd.f32 %v3577_v10, %v3444_v18  ;;  %v4931_v54 = vor.u32 %v5213_v25, %v4930_v29  ;;  %v5214_v29 = vld [vmem:[%s5828_s8 + $0x5ac] sm:$0xf]  ;;  %v4940_v25 = vld [vmem:[%s5828_s8 + $0x5b0] sm:$0xf0] }
 0x37a   : > { %v2917_v12 = vpop.f32.mrf.mxu1 }
 0x37b   : > { %v3683_v28 = vmax.f32 %v3021_v57, %v3578_v45  ;;  %v3446_v62 = vpop.f32.mrf.mxu2  ;;  %v2918_v53 = vadd.f32 %v2917_v12, %v2784_v13  ;;  %v4665_v13 = vor.u32 %v5165_v3, %v4664_v61  ;;  %v4666_v57 = vld [vmem:[%s5828_s8 + $0x418] sm:$0xf0]  ;;  %v4943_v3 = vor.u32 %v5214_v29, %v4940_v25 }
 0x37c   : > { %v5212_v45 = vld [vmem:[%s5828_s8 + $0x59c] sm:$0xf] }
 0x37d   : > { %v3736_v41 = vadd.f32 %v6515_v17, %v3683_v28  ;;  %v2787_v21 = vpop.f32.mrf.mxu0  ;;  %v3022_v38 = vmax.f32 %v7110_v33, %v2918_v53 }
 0x37f   : > { %v3785_v20 = vmax.f32 %v3736_v41, 0.0 }
 0x380   : > { %v3579_v30 = vpop.f32.mrf.mxu3  ;;  %2826 = vmatmul.bf16.gmra.mxu0 %v4657_v14  ;;  %3488 = vmatmul.bf16.gmra.mxu2 %v4923_v7  ;;  %v4935_v14 = vor.u32 %v5212_v45, %v4932_v55  ;;  %v4680_v55 = vld [vmem:[%s5828_s8 + $0x430] sm:$0xf] }
 0x381   : > { %3835 = vst.msk [vmem:[%s6529_s23 + $0x60] sm:$0xff] %vm3822_vm3, %v3785_v20  ;;  %v3580_v50 = vadd.f32 %v3579_v30, %v3446_v62  ;;  %v4669_v62 = vor.u32 %v5164_v0, %v4666_v57  ;;  %v7113_v20 = vmax.f32 %v6146_v31, %v6151_v51  ;;  %v7115_v0 = vmax.f32 %v6168_v56, %v6173_v48 }
 0x382   : > { %v2920_v34 = vpop.f32.mrf.mxu1 }
 0x383   : > { %v3684_v39 = vmax.f32 %v3022_v38, %v3580_v50  ;;  %v3449_v6 = vpop.f32.mrf.mxu2  ;;  %v2921_v37 = vadd.f32 %v2920_v34, %v2787_v21  ;;  %v4672_v38 = vld [vmem:[%s5828_s8 + $0x420] sm:$0xf]  ;;  %v5167_v50 = vld [vmem:[%s5828_s8 + $0x424] sm:$0xf0] }
 0x385   : > { %v3737_v59 = vadd.f32 %v6515_v17, %v3684_v39  ;;  %4741 = vmatmul.msk.bf16.gmra.mxu1 %vm1385_vm2, %v4661_v24  ;;  %5007 = vmatmul.msk.bf16.gmra.mxu3 %vm1385_vm2, %v4927_v19  ;;  %v2789_v47 = vpop.f32.mrf.mxu0  ;;  %v3023_v60 = vmax.f32 %v7111_v63, %v2921_v37  ;;  %v4673_v39 = vor.u32 %v5167_v50, %v4672_v38 }
 0x386   : > { %v7114_v63 = vmax.f32 %v6158_v4, %v6164_v42 }
 0x387   : > { %v3786_v46 = vmax.f32 %v3737_v59, 0.0 }
 0x388   : > { %v3582_v2 = vpop.f32.mrf.mxu3 }
 0x389   : > { %3836 = vst.msk [vmem:[%s6529_s23 + $0x68] sm:$0xff] %vm3822_vm3, %v3786_v46  ;;  %v3583_v1 = vadd.f32 %v3582_v2, %v3449_v6  ;;  %v4939_v6 = vor.u32 %v5215_v44, %v4938_v40  ;;  %v5166_v46 = vld [vmem:[%s5828_s8 + $0x424] sm:$0xf]  ;;  %v4674_v2 = vld [vmem:[%s5828_s8 + $0x428] sm:$0xf0] }
 0x38a   : > { %v2922_v18 = vpop.f32.mrf.mxu1  ;;  %v4677_v61 = vor.u32 %v5166_v46, %v4674_v2  ;;  %v5171_v46 = vld [vmem:[%s5828_s8 + $0x444] sm:$0xf0] }
 0x38b   : > { %v3685_v26 = vmax.f32 %v3023_v60, %v3583_v1  ;;  %v3451_v32 = vpop.f32.mrf.mxu2  ;;  %v2923_v5 = vadd.f32 %v2922_v18, %v2789_v47 }
 0x38d   : > { %v3738_v10 = vadd.f32 %v6515_v17, %v3685_v26  ;;  %v2792_v8 = vpop.f32.mrf.mxu0  ;;  %v3024_v12 = vmax.f32 %v7112_v23, %v2923_v5  ;;  %v4946_v5 = vld [vmem:[%s5828_s8 + $0x5b8] sm:$0xf] }
 0x38f   : > { %v3787_v15 = vmax.f32 %v3738_v10, 0.0 }
 0x390   : > { %v3584_v27 = vpop.f32.mrf.mxu3  ;;  %2831 = vmatmul.bf16.gmra.mxu0 %v4665_v13  ;;  %3493 = vmatmul.bf16.gmra.mxu2 %v4931_v54 }
 0x391   : > { %3837 = vst.msk [vmem:[%s6529_s23 + $0x70] sm:$0xff] %vm3822_vm3, %v3787_v15  ;;  %v3585_v28 = vadd.f32 %v3584_v27, %v3451_v32  ;;  %v5169_v15 = vld [vmem:[%s5828_s8 + $0x434] sm:$0xf0] }
 0x392   : > { %v2925_v7 = vpop.f32.mrf.mxu1 }
 0x393   : > { %v3686_v41 = vmax.f32 %v3024_v12, %v3585_v28  ;;  %v3454_v53 = vpop.f32.mrf.mxu2  ;;  %v2926_v22 = vadd.f32 %v2925_v7, %v2792_v8  ;;  %v5217_v8 = vld [vmem:[%s5828_s8 + $0x5bc] sm:$0xf0]  ;;  %v4681_v28 = vor.u32 %v5169_v15, %v4680_v55 }
 0x395   : > { %v3739_v21 = vadd.f32 %v6515_v17, %v3686_v41  ;;  %4742 = vmatmul.msk.bf16.gmra.mxu1 %vm1385_vm2, %v4669_v62  ;;  %5008 = vmatmul.msk.bf16.gmra.mxu3 %vm1385_vm2, %v4935_v14  ;;  %v2794_v58 = vpop.f32.mrf.mxu0  ;;  %v3025_v30 = vmax.f32 %v7113_v20, %v2926_v22  ;;  %v4947_v62 = vor.u32 %v5217_v8, %v4946_v5  ;;  %v5216_v22 = vld [vmem:[%s5828_s8 + $0x5bc] sm:$0xf] }
 0x397   : > { %v3788_v49 = vmax.f32 %v3739_v21, 0.0  ;;  %v4682_v21 = vld [vmem:[%s5828_s8 + $0x438] sm:$0xf0] }
 0x398   : > { %v3587_v9 = vpop.f32.mrf.mxu3 }
 0x399   : > { %3838 = vst.msk [vmem:[%s6529_s23 + $0x78] sm:$0xff] %vm3822_vm3, %v3788_v49  ;;  %v3588_v33 = vadd.f32 %v3587_v9, %v3454_v53  ;;  %v5168_v53 = vld [vmem:[%s5828_s8 + $0x434] sm:$0xf]  ;;  %v7116_v49 = vmax.f32 %v6180_v35, %v6186_v16 }
 0x39a   : > { %v2927_v24 = vpop.f32.mrf.mxu1  ;;  %v4685_v44 = vor.u32 %v5168_v53, %v4682_v21  ;;  %v4696_v21 = vld [vmem:[%s5828_s8 + $0x450] sm:$0xf] }
 0x39b   : > { %v3687_v19 = vmax.f32 %v3025_v30, %v3588_v33  ;;  %v3456_v34 = vpop.f32.mrf.mxu2  ;;  %v2928_v37 = vadd.f32 %v2927_v24, %v2794_v58  ;;  %v4948_v58 = vld [vmem:[%s5828_s8 + $0x5c0] sm:$0xf0] }
 0x39c   : > { %v4951_v20 = vor.u32 %v5216_v22, %v4948_v58  ;;  %v5173_v22 = vld [vmem:[%s5828_s8 + $0x454] sm:$0xf0] }
 0x39d   : > { %v3740_v59 = vadd.f32 %v6515_v17, %v3687_v19  ;;  %v2797_v47 = vpop.f32.mrf.mxu0  ;;  %v3026_v60 = vmax.f32 %v7114_v63, %v2928_v37 }
 0x39f   : > { %v3789_v31 = vmax.f32 %v3740_v59, 0.0 }
 0x3a0   : > { %v3589_v51 = vpop.f32.mrf.mxu3  ;;  %2836 = vmatmul.bf16.gmra.mxu0 %v4673_v39  ;;  %3498 = vmatmul.bf16.gmra.mxu2 %v4939_v6  ;;  %v5219_v39 = vld [vmem:[%s5828_s8 + $0x5cc] sm:$0xf0]  ;;  %v7117_v6 = vmax.f32 %v6190_v43, %v6195_v52 }
 0x3a1   : > { %3839 = vst.msk [vmem:[%s6529_s23 + $0x80] sm:$0xff] %vm3822_vm3, %v3789_v31  ;;  %v3590_v1 = vadd.f32 %v3589_v51, %v3456_v34  ;;  %v4954_v34 = vld [vmem:[%s5828_s8 + $0x5c8] sm:$0xf] }
 0x3a2   : > { %v2930_v18 = vpop.f32.mrf.mxu1  ;;  %v4955_v51 = vor.u32 %v5219_v39, %v4954_v34 }
 0x3a3   : > { %v3688_v26 = vmax.f32 %v3026_v60, %v3590_v1  ;;  %v3459_v32 = vpop.f32.mrf.mxu2  ;;  %v2931_v54 = vadd.f32 %v2930_v18, %v2797_v47  ;;  %v4688_v47 = vld [vmem:[%s5828_s8 + $0x440] sm:$0xf]  ;;  %v5218_v18 = vld [vmem:[%s5828_s8 + $0x5cc] sm:$0xf] }
 0x3a4   : > { %v4689_v31 = vor.u32 %v5171_v46, %v4688_v47 }
 0x3a5   : > { %v3741_v13 = vadd.f32 %v6515_v17, %v3688_v26  ;;  %4743 = vmatmul.msk.bf16.gmra.mxu1 %vm1385_vm2, %v4677_v61  ;;  %5009 = vmatmul.msk.bf16.gmra.mxu3 %vm1385_vm2, %v4943_v3  ;;  %v2799_v10 = vpop.f32.mrf.mxu0  ;;  %v3027_v57 = vmax.f32 %v7115_v0, %v2931_v54  ;;  %v5170_v61 = vld [vmem:[%s5828_s8 + $0x444] sm:$0xf]  ;;  %v4690_v3 = vld [vmem:[%s5828_s8 + $0x448] sm:$0xf0]  ;;  %v4956_v26 = vld [vmem:[%s5828_s8 + $0x5d0] sm:$0xf0] }
 0x3a6   : > { %v4959_v5 = vor.u32 %v5218_v18, %v4956_v26 }
 0x3a7   : > { %v3790_v4 = vmax.f32 %v3741_v13, 0.0  ;;  %v7119_v13 = vld [vmem:[#allocation4_spill] sm:$0xff] }
 0x3a8   : > { %v3592_v42 = vpop.f32.mrf.mxu3 }
 0x3a9   : > { %3840 = vst.msk [vmem:[%s6529_s23 + $0x88] sm:$0xff] %vm3822_vm3, %v3790_v4  ;;  %v3593_v45 = vadd.f32 %v3592_v42, %v3459_v32  ;;  %v7118_v32 = vld [vmem:[#allocation3_spill] sm:$0xff]  ;;  %v4693_v42 = vor.u32 %v5170_v61, %v4690_v3  ;;  %v7127_v61 = vld [vmem:[#allocation9_spill] sm:$0xff]  ;;  %v7128_v3 = vld [vmem:[#allocation10_spill] sm:$0xff] }
 0x3aa   : > { %v2932_v27 = vpop.f32.mrf.mxu1  ;;  %v7120_v54 = vmax.f32 %v7118_v32, %v7119_v13  ;;  %v7129_v18 = vmax.f32 %v7127_v61, %v7128_v3  ;;  %v5175_v32 = vld [vmem:[%s5828_s8 + $0x464] sm:$0xf0] }
 0x3ab   : > { %v3689_v23 = vmax.f32 %v3027_v57, %v3593_v45  ;;  %v3461_v12 = vpop.f32.mrf.mxu2  ;;  %v2933_v7 = vadd.f32 %v2932_v27, %v2799_v10 }
 0x3ad   : > { %v3742_v14 = vadd.f32 %v6515_v17, %v3689_v23  ;;  %v2802_v41 = vpop.f32.mrf.mxu0  ;;  %v3028_v9 = vmax.f32 %v7116_v49, %v2933_v7  ;;  %v4697_v49 = vor.u32 %v5173_v22, %v4696_v21 }
 0x3af   : > { %v3791_v56 = vmax.f32 %v3742_v14, 0.0  ;;  %v7122_v14 = vld [vmem:[#allocation6_spill] sm:$0xff] }
 0x3b0   : > { %v3594_v48 = vpop.f32.mrf.mxu3  ;;  %2841 = vmatmul.bf16.gmra.mxu0 %v4681_v28  ;;  %3503 = vmatmul.bf16.gmra.mxu2 %v4947_v62  ;;  %v5221_v28 = vld [vmem:[%s5828_s8 + $0x5dc] sm:$0xf0]  ;;  %v7121_v62 = vld [vmem:[#allocation5_spill] sm:$0xff] }
 0x3b1   : > { %3841 = vst.msk [vmem:[%s6529_s23 + $0x90] sm:$0xff] %vm3822_vm3, %v3791_v56  ;;  %v3595_v40 = vadd.f32 %v3594_v48, %v3461_v12  ;;  %v4962_v12 = vld [vmem:[%s5828_s8 + $0x5d8] sm:$0xf]  ;;  %v7123_v7 = vmax.f32 %v7121_v62, %v7122_v14 }
 0x3b2   : > { %v2935_v30 = vpop.f32.mrf.mxu1 }
 0x3b3   : > { %v3690_v33 = vmax.f32 %v3028_v9, %v3595_v40  ;;  %v3464_v38 = vpop.f32.mrf.mxu2  ;;  %v2936_v24 = vadd.f32 %v2935_v30, %v2802_v41  ;;  %v4963_v9 = vor.u32 %v5221_v28, %v4962_v12  ;;  %v5172_v30 = vld [vmem:[%s5828_s8 + $0x454] sm:$0xf]  ;;  %v7130_v12 = vld [vmem:[#allocation11_spill] sm:$0xff]  ;;  %v7131_v28 = vld [vmem:[#allocation12_spill] sm:$0xff] }
 0x3b4   : > { %v7132_v62 = vmax.f32 %v7130_v12, %v7131_v28 }
 0x3b5   : > { %v3743_v50 = vadd.f32 %v6515_v17, %v3690_v33  ;;  %4744 = vmatmul.msk.bf16.gmra.mxu1 %vm1385_vm2, %v4685_v44  ;;  %5010 = vmatmul.msk.bf16.gmra.mxu3 %vm1385_vm2, %v4951_v20  ;;  %v2804_v19 = vpop.f32.mrf.mxu0  ;;  %v3029_v59 = vmax.f32 %v7117_v6, %v2936_v24  ;;  %v4698_v33 = vld [vmem:[%s5828_s8 + $0x458] sm:$0xf0] }
 0x3b7   : > { %v3792_v35 = vmax.f32 %v3743_v50, 0.0  ;;  %v4964_v50 = vld [vmem:[%s5828_s8 + $0x5e0] sm:$0xf0] }
 0x3b8   : > { %v3597_v16 = vpop.f32.mrf.mxu3 }
 0x3b9   : > { %3842 = vst.msk [vmem:[%s6529_s23 + $0x98] sm:$0xff] %vm3822_vm3, %v3792_v35  ;;  %v3598_v37 = vadd.f32 %v3597_v16, %v3464_v38  ;;  %v5220_v38 = vld [vmem:[%s5828_s8 + $0x5dc] sm:$0xf]  ;;  %v7124_v35 = vld [vmem:[#allocation7_spill] sm:$0xff]  ;;  %v7125_v16 = vld [vmem:[#allocation8_spill] sm:$0xff] }
 0x3ba   : > { %v2937_v2 = vpop.f32.mrf.mxu1  ;;  %v7126_v34 = vmax.f32 %v7124_v35, %v7125_v16  ;;  %v5177_v35 = vld [vmem:[%s5828_s8 + $0x474] sm:$0xf0] }
 0x3bb   : > { %v3691_v29 = vmax.f32 %v3029_v59, %v3598_v37  ;;  %v3466_v25 = vpop.f32.mrf.mxu2  ;;  %v2938_v60 = vadd.f32 %v2937_v2, %v2804_v19  ;;  %v4701_v59 = vor.u32 %v5172_v30, %v4698_v33  ;;  %v4967_v37 = vor.u32 %v5220_v38, %v4964_v50  ;;  %v7133_v30 = vld [vmem:[#allocation13_spill] sm:$0xff]  ;;  %v7134_v33 = vld [vmem:[#allocation14_spill] sm:$0xff] }
 0x3bc   : > { %v7135_v38 = vmax.f32 %v7133_v30, %v7134_v33 }
 0x3bd   : > { %v3744_v63 = vadd.f32 %v6515_v17, %v3691_v29  ;;  %v2807_v1 = vpop.f32.mrf.mxu0  ;;  %v3030_v10 = vmax.f32 %v7120_v54, %v2938_v60  ;;  %v4970_v60 = vld [vmem:[%s5828_s8 + $0x5e8] sm:$0xf] }
 0x3bf   : > { %v3793_v43 = vmax.f32 %v3744_v63, 0.0 }
 0x3c0   : > { %v3599_v52 = vpop.f32.mrf.mxu3  ;;  %2846 = vmatmul.bf16.gmra.mxu0 %v4689_v31  ;;  %3508 = vmatmul.bf16.gmra.mxu2 %v4955_v51 }
 0x3c1   : > { %3843 = vst.msk [vmem:[%s6529_s23 + $0xa0] sm:$0xff] %vm3822_vm3, %v3793_v43  ;;  %v3600_v4 = vadd.f32 %v3599_v52, %v3466_v25  ;;  %v4704_v52 = vld [vmem:[%s5828_s8 + $0x460] sm:$0xf] }
 0x3c2   : > { %v2940_v8 = vpop.f32.mrf.mxu1 }
 0x3c3   : > { %v3692_v0 = vmax.f32 %v3030_v10, %v3600_v4  ;;  %v3469_v57 = vpop.f32.mrf.mxu2  ;;  %v2941_v55 = vadd.f32 %v2940_v8, %v2807_v1  ;;  %v5223_v1 = vld [vmem:[%s5828_s8 + $0x5ec] sm:$0xf0]  ;;  %v4705_v4 = vor.u32 %v5175_v32, %v4704_v52 }
 0x3c5   : > { %v3745_v45 = vadd.f32 %v6515_v17, %v3692_v0  ;;  %4745 = vmatmul.msk.bf16.gmra.mxu1 %vm1385_vm2, %v4693_v42  ;;  %5011 = vmatmul.msk.bf16.gmra.mxu3 %vm1385_vm2, %v4959_v5  ;;  %v2809_v15 = vpop.f32.mrf.mxu0  ;;  %v3031_v41 = vmax.f32 %v7123_v7, %v2941_v55  ;;  %v4971_v42 = vor.u32 %v5223_v1, %v4970_v60  ;;  %v5222_v55 = vld [vmem:[%s5828_s8 + $0x5ec] sm:$0xf]  ;;  %v7136_v60 = vld [vmem:[#allocation15_spill] sm:$0xff] }
 0x3c6   : > { %v7137_v1 = vld [vmem:[#allocation16_spill] sm:$0xff] }
 0x3c7   : > { %v3794_v27 = vmax.f32 %v3745_v45, 0.0  ;;  %v4706_v45 = vld [vmem:[%s5828_s8 + $0x468] sm:$0xf0]  ;;  %v7138_v61 = vmax.f32 %v7136_v60, %v7137_v1 }
 0x3c8   : > { %v3602_v23 = vpop.f32.mrf.mxu3 }
 0x3c9   : > { %3844 = vst.msk [vmem:[%s6529_s23 + $0xa8] sm:$0xff] %vm3822_vm3, %v3794_v27  ;;  %v3603_v53 = vadd.f32 %v3602_v23, %v3469_v57  ;;  %v5174_v57 = vld [vmem:[%s5828_s8 + $0x464] sm:$0xf] }
 0x3ca   : > { %v2942_v58 = vpop.f32.mrf.mxu1 }
 0x3cb   : > { %v3693_v56 = vmax.f32 %v3031_v41, %v3603_v53  ;;  %v3471_v48 = vpop.f32.mrf.mxu2  ;;  %v2943_v44 = vadd.f32 %v2942_v58, %v2809_v15  ;;  %v4972_v15 = vld [vmem:[%s5828_s8 + $0x5f0] sm:$0xf0]  ;;  %v4709_v41 = vor.u32 %v5174_v57, %v4706_v45  ;;  %v7139_v57 = vmax.f32 %v6278_v11, %v6283_v36 }
 0x3cc   : > { %v4975_v53 = vor.u32 %v5222_v55, %v4972_v15  ;;  %v4720_v15 = vld [vmem:[%s5828_s8 + $0x480] sm:$0xf] }
 0x3cd   : > { %v3746_v40 = vadd.f32 %v6515_v17, %v3693_v56  ;;  %v2812_v20 = vpop.f32.mrf.mxu0  ;;  %v3032_v39 = vmax.f32 %v7126_v34, %v2943_v44  ;;  %v4978_v44 = vld [vmem:[%s5828_s8 + $0x5f8] sm:$0xf] }
 0x3cf   : > { %v3795_v24 = vmax.f32 %v3746_v40, 0.0 }
 0x3d0   : > { %v3604_v19 = vpop.f32.mrf.mxu3  ;;  %2851 = vmatmul.bf16.gmra.mxu0 %v4697_v49  ;;  %3513 = vmatmul.bf16.gmra.mxu2 %v4963_v9 }
 0x3d1   : > { %3845 = vst.msk [vmem:[%s6529_s23 + $0xb0] sm:$0xff] %vm3822_vm3, %v3795_v24  ;;  %v3605_v6 = vadd.f32 %v3604_v19, %v3471_v48  ;;  %v4712_v19 = vld [vmem:[%s5828_s8 + $0x470] sm:$0xf] }
 0x3d2   : > { %v2945_v47 = vpop.f32.mrf.mxu1 }
 0x3d3   : > { %v3694_v46 = vmax.f32 %v3032_v39, %v3605_v6  ;;  %v3474_v2 = vpop.f32.mrf.mxu2  ;;  %v2946_v25 = vadd.f32 %v2945_v47, %v2812_v20  ;;  %v5225_v20 = vld [vmem:[%s5828_s8 + $0x5fc] sm:$0xf0]  ;;  %v4713_v6 = vor.u32 %v5177_v35, %v4712_v19 }
 0x3d5   : > { %v3747_v29 = vadd.f32 %v6515_v17, %v3694_v46  ;;  %4746 = vmatmul.msk.bf16.gmra.mxu1 %vm1385_vm2, %v4701_v59  ;;  %5012 = vmatmul.msk.bf16.gmra.mxu3 %vm1385_vm2, %v4967_v37  ;;  %v2814_v31 = vpop.f32.mrf.mxu0  ;;  %v3033_v26 = vmax.f32 %v7129_v18, %v2946_v25  ;;  %v4979_v59 = vor.u32 %v5225_v20, %v4978_v44  ;;  %v5224_v25 = vld [vmem:[%s5828_s8 + $0x5fc] sm:$0xf] }
 0x3d7   : > { %v3796_v51 = vmax.f32 %v3747_v29, 0.0  ;;  %v4714_v29 = vld [vmem:[%s5828_s8 + $0x478] sm:$0xf0] }
 0x3d8   : > { %v3607_v63 = vpop.f32.mrf.mxu3 }
 0x3d9   : > { %3846 = vst.msk [vmem:[%s6529_s23 + $0xb8] sm:$0xff] %vm3822_vm3, %v3796_v51  ;;  %v3608_v43 = vadd.f32 %v3607_v63, %v3474_v2  ;;  %v5176_v2 = vld [vmem:[%s5828_s8 + $0x474] sm:$0xf] }
 0x3da   : > { %v2947_v13 = vpop.f32.mrf.mxu1 }
 0x3db   : > { %v3695_v54 = vmax.f32 %v3033_v26, %v3608_v43  ;;  %v3476_v10 = vpop.f32.mrf.mxu2  ;;  %v2948_v8 = vadd.f32 %v2947_v13, %v2814_v31  ;;  %v4980_v31 = vld [vmem:[%s5828_s8 + $0x600] sm:$0xf0]  ;;  %v6828_v13 = vld [vmem:[%s6987_s2] ss:$0 sm:$0xff] }
 0x3dc   : > { %v4983_v26 = vor.u32 %v5224_v25, %v4980_v31 }
 0x3dd   : > { %v3748_v5 = vadd.f32 %v6515_v17, %v3695_v54  ;;  %v2817_v0 = vpop.f32.mrf.mxu0  ;;  %v3034_v14 = vmax.f32 %v7132_v62, %v2948_v8  ;;  %v4986_v8 = vld [vmem:[%s5828_s8 + $0x608] sm:$0xf] }
 0x3df   : > { %v3797_v27 = vmax.f32 %v3748_v5, 0.0 }
 0x3e0   : > { %v3609_v23 = vpop.f32.mrf.mxu3  ;;  %2856 = vmatmul.bf16.gmra.mxu0 %v4705_v4  ;;  %3518 = vmatmul.bf16.gmra.mxu2 %v4971_v42 }
 0x3e1   : > { %3847 = vst.msk [vmem:[%s6529_s23 + $0xc0] sm:$0xff] %vm3822_vm3, %v3797_v27  ;;  %v3610_v7 = vadd.f32 %v3609_v23, %v3476_v10  ;;  %v5179_v27 = vld [vmem:[%s5828_s8 + $0x484] sm:$0xf0] }
 0x3e2   : > { %v2950_v21 = vpop.f32.mrf.mxu1  ;;  %v4721_v62 = vor.u32 %v5179_v27, %v4720_v15 }
 0x3e3   : > { %v3696_v22 = vmax.f32 %v3034_v14, %v3610_v7  ;;  %v3479_v58 = vpop.f32.mrf.mxu2  ;;  %v2951_v48 = vadd.f32 %v2950_v21, %v2817_v0  ;;  %v5227_v0 = vld [vmem:[%s5828_s8 + $0x60c] sm:$0xf0]  ;;  %v5178_v21 = vld [vmem:[%s5828_s8 + $0x484] sm:$0xf] }
 0x3e4   : > { %v4987_v14 = vor.u32 %v5227_v0, %v4986_v8 }
 0x3e5   : > { %v3749_v56 = vadd.f32 %v6515_v17, %v3696_v22  ;;  %4747 = vmatmul.msk.bf16.gmra.mxu1 %vm1385_vm2, %v4709_v41  ;;  %5013 = vmatmul.msk.bf16.gmra.mxu3 %vm1385_vm2, %v4975_v53  ;;  %v2819_v49 = vpop.f32.mrf.mxu0  ;;  %v3035_v50 = vmax.f32 %v7135_v38, %v2951_v48  ;;  %v4722_v22 = vld [vmem:[%s5828_s8 + $0x488] sm:$0xf0]  ;;  %v7140_v48 = vld [vmem:[#allocation17_spill] sm:$0xff] }
 0x3e6   : > { %v4725_v20 = vor.u32 %v5178_v21, %v4722_v22 }
 0x3e7   : > { %v3798_v9 = vmax.f32 %v3749_v56, 0.0  ;;  %v4988_v56 = vld [vmem:[%s5828_s8 + $0x610] sm:$0xf0] }
 0x3e8   : > { %v3612_v40 = vpop.f32.mrf.mxu3 }
 0x3e9   : > { %3848 = vst.msk [vmem:[%s6529_s23 + $0xc8] sm:$0xff] %vm3822_vm3, %v3798_v9  ;;  %v3613_v24 = vadd.f32 %v3612_v40, %v3479_v58  ;;  %v5226_v58 = vld [vmem:[%s5828_s8 + $0x60c] sm:$0xf] }
 0x3ea   : > { %v2952_v16 = vpop.f32.mrf.mxu1  ;;  %v4991_v30 = vor.u32 %v5226_v58, %v4988_v56 }
 0x3eb   : > { %v3697_v34 = vmax.f32 %v3035_v50, %v3613_v24  ;;  %v3481_v39 = vpop.f32.mrf.mxu2  ;;  %v2953_v47 = vadd.f32 %v2952_v16, %v2819_v49  ;;  %v7141_v49 = vld [vmem:[#allocation18_spill] sm:$0xff]  ;;  %v4533_v16 = vld [vmem:[%s5828_s8 + $0x490] sm:$0xff] }
 0x3ec   : > { %v7142_v9 = vmax.f32 %v7140_v48, %v7141_v49  ;;  %v7152_v49 = vld [vmem:[#allocation25_spill] sm:$0xff] }
 0x3ed   : > { %v3750_v37 = vadd.f32 %v6515_v17, %v3697_v34  ;;  %v2822_v46 = vpop.f32.mrf.mxu0  ;;  %v3036_v3 = vmax.f32 %v7138_v61, %v2953_v47  ;;  %v4717_v17 = vor.u32 %v5176_v2, %v4714_v29  ;;  %v4799_v34 = vld [vmem:[%s5828_s8 + $0x618] sm:$0xff]  ;;  %v7143_v47 = vld [vmem:[#allocation19_spill] sm:$0xff] }
 0x3ef   : > { %v3799_v51 = vmax.f32 %v3750_v37, 0.0  ;;  %v3253_v37 = vunpack.c.l.b16 %v4799_v34 }
 0x3f0   : > { %v3614_v63 = vpop.f32.mrf.mxu3  ;;  %2861 = vmatmul.bf16.gmra.mxu0 %v4713_v6  ;;  %3523 = vmatmul.bf16.gmra.mxu2 %v4979_v59  ;;  %v2591_v59 = vunpack.c.l.b16 %v4533_v16 }
 0x3f1   : > { %3849 = vst.msk [vmem:[%s6529_s23 + $0xd0] sm:$0xff] %vm3822_vm3, %v3799_v51  ;;  %v3615_v18 = vadd.f32 %v3614_v63, %v3481_v39  ;;  %v3303_v1 = vpack.c.b16 %v3253_v37, %v3253_v37 }
 0x3f2   : > { %v2955_v43 = vpop.f32.mrf.mxu1  ;;  %v2641_v60 = vpack.c.b16 %v2591_v59, %v2591_v59 }
 0x3f3   : > { %v3698_v52 = vmax.f32 %v3036_v3, %v3615_v18  ;;  %v3484_v32 = vpop.f32.mrf.mxu2  ;;  %v2956_v10 = vadd.f32 %v2955_v43, %v2822_v46  ;;  %v7144_v46 = vld [vmem:[#allocation20_spill] sm:$0xff] }
 0x3f4   : > { %v7145_v2 = vmax.f32 %v7143_v47, %v7144_v46 }
 0x3f5   : > { %v3751_v54 = vadd.f32 %v6828_v13, %v3698_v52  ;;  %4748 = vmatmul.msk.bf16.gmra.mxu1 %vm1385_vm2, %v4717_v17  ;;  %5014 = vmatmul.msk.bf16.gmra.mxu3 %vm1385_vm2, %v4983_v26  ;;  %v2824_v4 = vpop.f32.mrf.mxu0  ;;  %v3037_v45 = vmax.f32 %v7139_v57, %v2956_v10  ;;  %v2592_v17 = vunpack.c.h.b16 %v4533_v16  ;;  %v3254_v26 = vunpack.c.h.b16 %v4799_v34  ;;  %v7155_v34 = vld [vmem:[#allocation27_spill] sm:$0xff] }
 0x3f7   : > { %v3800_v42 = vmax.f32 %v3751_v54, 0.0  ;;  %v7147_v54 = vld [vmem:[#allocation22_spill] sm:$0xff]  ;;  %v3304_v8 = vpack.c.b16 %v3254_v26, %v3254_v26 }
 0x3f8   : > { %v3617_v5 = vpop.f32.mrf.mxu3 }
 0x3f9   : > { %3850 = vst.msk [vmem:[%s6529_s23 + $0xd8] sm:$0xff] %vm3822_vm3, %v3800_v42  ;;  %v3618_v55 = vadd.f32 %v3617_v5, %v3484_v32  ;;  %v7146_v32 = vld [vmem:[#allocation21_spill] sm:$0xff]  ;;  %v2642_v5 = vpack.c.b16 %v2592_v17, %v2592_v17 }
 0x3fa   : > { %v2957_v23 = vpop.f32.mrf.mxu1  ;;  %v7148_v10 = vmax.f32 %v7146_v32, %v7147_v54 }
 0x3fb   : > { %v3699_v12 = vmax.f32 %v3037_v45, %v3618_v55  ;;  %v3486_v28 = vpop.f32.mrf.mxu2  ;;  %v2958_v41 = vadd.f32 %v2957_v23, %v2824_v4 }
 0x3fd   : > { %v3752_v7 = vadd.f32 %v6828_v13, %v3699_v12  ;;  %v2827_v53 = vpop.f32.mrf.mxu0  ;;  %v3038_v40 = vmax.f32 %v7142_v9, %v2958_v41  ;;  %v7153_v9 = vld [vmem:[#allocation26_spill] sm:$0xff] }
 0x3ff   : > { %v3801_v11 = vmax.f32 %v3752_v7, 0.0 }
 0x400   : > { %v3619_v36 = vpop.f32.mrf.mxu3  ;;  %2866 = vmatmul.bf16.gmra.mxu0 %v4721_v62  ;;  %3528 = vmatmul.bf16.gmra.mxu2 %v4987_v14  ;;  %v7150_v62 = vld [vmem:[#allocation24_spill] sm:$0xff] }
 0x401   : > { %3851 = vst.msk [vmem:[%s6529_s23 + $0xe0] sm:$0xff] %vm3822_vm3, %v3801_v11  ;;  %v3620_v44 = vadd.f32 %v3619_v36, %v3486_v28  ;;  %v7149_v28 = vld [vmem:[#allocation23_spill] sm:$0xff] }
 0x402   : > { %v2960_v33 = vpop.f32.mrf.mxu1  ;;  %v7151_v14 = vmax.f32 %v7149_v28, %v7150_v62 }
 0x403   : > { %v3700_v38 = vmax.f32 %v3038_v40, %v3620_v44  ;;  %v3489_v50 = vpop.f32.mrf.mxu2  ;;  %v2961_v19 = vadd.f32 %v2960_v33, %v2827_v53  ;;  %v7154_v40 = vmax.f32 %v7152_v49, %v7153_v9 }
 0x405   : > { %v3753_v24 = vadd.f32 %v6828_v13, %v3700_v38  ;;  %4749 = vmatmul.msk.bf16.gmra.mxu1 %vm1385_vm2, %v4725_v20  ;;  %5015 = vmatmul.msk.bf16.gmra.mxu3 %vm1385_vm2, %v4991_v30  ;;  %v2829_v35 = vpop.f32.mrf.mxu0  ;;  %v3039_v29 = vmax.f32 %v7145_v2, %v2961_v19 }
 0x407   : > { %v3802_v39 = vmax.f32 %v3753_v24, 0.0 }
 0x408   : > { %v3622_v6 = vpop.f32.mrf.mxu3 }
 0x409   : > { %3852 = vst.msk [vmem:[%s6529_s23 + $0xe8] sm:$0xff] %vm3822_vm3, %v3802_v39  ;;  %v3623_v25 = vadd.f32 %v3622_v6, %v3489_v50  ;;  %v7156_v39 = vld [vmem:[#allocation28_spill] sm:$0xff] }
 0x40a   : > { %v2962_v31 = vpop.f32.mrf.mxu1  ;;  %v7157_v6 = vmax.f32 %v7155_v34, %v7156_v39 }
 0x40b   : > { %v3701_v51 = vmax.f32 %v3039_v29, %v3623_v25  ;;  %v3491_v63 = vpop.f32.mrf.mxu2  ;;  %v2963_v3 = vadd.f32 %v2962_v31, %v2829_v35 }
 0x40d   : > { %v3754_v61 = vadd.f32 %v6828_v13, %v3701_v51  ;;  %v2832_v18 = vpop.f32.mrf.mxu0  ;;  %v3040_v4 = vmax.f32 %v7148_v10, %v2963_v3 }
 0x40f   : > { %v3803_v43 = vmax.f32 %v3754_v61, 0.0 }
 0x410   : > { %v3624_v52 = vpop.f32.mrf.mxu3  ;;  %2871 = vmatmul.bf16.gmra.mxu0 %v2641_v60  ;;  %3533 = vmatmul.bf16.gmra.mxu2 %v3303_v1  ;;  %v7158_v60 = vld [vmem:[#allocation29_spill] sm:$0xff]  ;;  %v7159_v1 = vld [vmem:[#allocation30_spill] sm:$0xff] }
 0x411   : > { %3853 = vst.msk [vmem:[%s6529_s23 + $0xf0] sm:$0xff] %vm3822_vm3, %v3803_v43  ;;  %v3625_v42 = vadd.f32 %v3624_v52, %v3491_v63  ;;  %v7160_v61 = vmax.f32 %v7158_v60, %v7159_v1 }
 0x412   : > { %v2965_v0 = vpop.f32.mrf.mxu1 }
 0x413   : > { %v3702_v57 = vmax.f32 %v3040_v4, %v3625_v42  ;;  %v3494_v45 = vpop.f32.mrf.mxu2  ;;  %v2966_v15 = vadd.f32 %v2965_v0, %v2832_v18  ;;  %v7161_v42 = vld [vmem:[#allocation31_spill] sm:$0xff] }
 0x415   : > { %v3755_v55 = vadd.f32 %v6828_v13, %v3702_v57  ;;  %4750 = vmatmul.msk.bf16.gmra.mxu1 %vm1385_vm2, %v2642_v5  ;;  %5016 = vmatmul.msk.bf16.gmra.mxu3 %vm1385_vm2, %v3304_v8  ;;  %v2834_v27 = vpop.f32.mrf.mxu0  ;;  %v3041_v7 = vmax.f32 %v7151_v14, %v2966_v15  ;;  %v7162_v5 = vld [vmem:[#allocation32_spill] sm:$0xff]  ;;  %v7164_v14 = vld [vmem:[#allocation33_spill] sm:$0xff] }
 0x416   : > { %v7163_v8 = vmax.f32 %v7161_v42, %v7162_v5 }
 0x417   : > { %v3804_v23 = vmax.f32 %v3755_v55, 0.0 }
 0x418   : > { %v3627_v12 = vpop.f32.mrf.mxu3 }
 0x419   : > { %3854 = vst.msk [vmem:[%s6529_s23 + $0xf8] sm:$0xff] %vm3822_vm3, %v3804_v23  ;;  %v3628_v41 = vadd.f32 %v3627_v12, %v3494_v45 }
 0x41a   : > { %v2967_v53 = vpop.f32.mrf.mxu1 }
 0x41b   : > { %v3703_v21 = vmax.f32 %v3041_v7, %v3628_v41  ;;  %v3496_v22 = vpop.f32.mrf.mxu2  ;;  %v2968_v56 = vadd.f32 %v2967_v53, %v2834_v27  ;;  %v7165_v7 = vld [vmem:[#allocation34_spill] sm:$0xff] }
 0x41c   : > { %v7166_v41 = vmax.f32 %v7164_v14, %v7165_v7 }
 0x41d   : > { %v3756_v58 = vadd.f32 %v6828_v13, %v3703_v21  ;;  %v2837_v11 = vpop.f32.mrf.mxu0  ;;  %v3042_v44 = vmax.f32 %v7154_v40, %v2968_v56  ;;  %v7167_v40 = vld [vmem:[#allocation35_spill] sm:$0xff] }
 0x41f   : > { %v3805_v36 = vmax.f32 %v3756_v58, 0.0 }
 0x420   : > { %v3629_v48 = vpop.f32.mrf.mxu3 }
 0x421   : > { %3855 = vst.msk [vmem:[%s6529_s23 + $0x100] sm:$0xff] %vm3822_vm3, %v3805_v36  ;;  %v3630_v20 = vadd.f32 %v3629_v48, %v3496_v22 }
 0x422   : > { %v2970_v30 = vpop.f32.mrf.mxu1 }
 0x423   : > { %v3704_v33 = vmax.f32 %v3042_v44, %v3630_v20  ;;  %v3499_v38 = vpop.f32.mrf.mxu2  ;;  %v2971_v24 = vadd.f32 %v2970_v30, %v2837_v11  ;;  %v7168_v44 = vld [vmem:[#allocation36_spill] sm:$0xff] }
 0x424   : > { %v7169_v20 = vmax.f32 %v7167_v40, %v7168_v44 }
 0x425   : > { %v3757_v50 = vadd.f32 %v6828_v13, %v3704_v33  ;;  %v2839_v19 = vpop.f32.mrf.mxu0  ;;  %v3043_v59 = vmax.f32 %v7157_v6, %v2971_v24  ;;  %v7170_v6 = vld [vmem:[#allocation37_spill] sm:$0xff] }
 0x427   : > { %v3806_v35 = vmax.f32 %v3757_v50, 0.0 }
 0x428   : > { %v3632_v16 = vpop.f32.mrf.mxu3 }
 0x429   : > { %3856 = vst.msk [vmem:[%s6529_s23 + $0x108] sm:$0xff] %vm3822_vm3, %v3806_v35  ;;  %v3633_v37 = vadd.f32 %v3632_v16, %v3499_v38 }
 0x42a   : > { %v2972_v47 = vpop.f32.mrf.mxu1 }
 0x42b   : > { %v3705_v46 = vmax.f32 %v3043_v59, %v3633_v37  ;;  %v3501_v2 = vpop.f32.mrf.mxu2  ;;  %v2973_v25 = vadd.f32 %v2972_v47, %v2839_v19  ;;  %v7171_v59 = vld [vmem:[#allocation38_spill] sm:$0xff] }
 0x42c   : > { %v7172_v37 = vmax.f32 %v7170_v6, %v7171_v59 }
 0x42d   : > { %v3758_v29 = vadd.f32 %v6828_v13, %v3705_v46  ;;  %v2842_v31 = vpop.f32.mrf.mxu0  ;;  %v3044_v3 = vmax.f32 %v7160_v61, %v2973_v25  ;;  %v7173_v61 = vld [vmem:[#allocation39_spill] sm:$0xff] }
 0x42f   : > { %v3807_v51 = vmax.f32 %v3758_v29, 0.0 }
 0x430   : > { %v3634_v63 = vpop.f32.mrf.mxu3 }
 0x431   : > { %3857 = vst.msk [vmem:[%s6529_s23 + $0x110] sm:$0xff] %vm3822_vm3, %v3807_v51  ;;  %v3635_v18 = vadd.f32 %v3634_v63, %v3501_v2 }
 0x432   : > { %v2975_v17 = vpop.f32.mrf.mxu1 }
 0x433   : > { %v3706_v26 = vmax.f32 %v3044_v3, %v3635_v18  ;;  %v3504_v43 = vpop.f32.mrf.mxu2  ;;  %v2976_v32 = vadd.f32 %v2975_v17, %v2842_v31  ;;  %v7174_v3 = vld [vmem:[#allocation40_spill] sm:$0xff] }
 0x434   : > { %v7175_v18 = vmax.f32 %v7173_v61, %v7174_v3 }
 0x435   : > { %v3759_v52 = vadd.f32 %v6828_v13, %v3706_v26  ;;  %v2844_v54 = vpop.f32.mrf.mxu0  ;;  %v3045_v0 = vmax.f32 %v7163_v8, %v2976_v32  ;;  %v7176_v8 = vld [vmem:[#allocation41_spill] sm:$0xff] }
 0x437   : > { %v3808_v10 = vmax.f32 %v3759_v52, 0.0 }
 0x438   : > { %v3637_v4 = vpop.f32.mrf.mxu3 }
 0x439   : > { %3858 = vst.msk [vmem:[%s6529_s23 + $0x118] sm:$0xff] %vm3822_vm3, %v3808_v10  ;;  %v3638_v57 = vadd.f32 %v3637_v4, %v3504_v43 }
 0x43a   : > { %v2977_v45 = vpop.f32.mrf.mxu1 }
 0x43b   : > { %v3707_v55 = vmax.f32 %v3045_v0, %v3638_v57  ;;  %v3506_v15 = vpop.f32.mrf.mxu2  ;;  %v2978_v23 = vadd.f32 %v2977_v45, %v2844_v54  ;;  %v7177_v0 = vld [vmem:[#allocation42_spill] sm:$0xff] }
 0x43c   : > { %v7178_v57 = vmax.f32 %v7176_v8, %v7177_v0 }
 0x43d   : > { %v3760_v27 = vadd.f32 %v6828_v13, %v3707_v55  ;;  %v2847_v12 = vpop.f32.mrf.mxu0  ;;  %v3046_v53 = vmax.f32 %v7166_v41, %v2978_v23  ;;  %v7179_v41 = vld [vmem:[#allocation43_spill] sm:$0xff] }
 0x43f   : > { %v3809_v28 = vmax.f32 %v3760_v27, 0.0 }
 0x440   : > { %v3639_v62 = vpop.f32.mrf.mxu3 }
 0x441   : > { %3859 = vst.msk [vmem:[%s6529_s23 + $0x120] sm:$0xff] %vm3822_vm3, %v3809_v28  ;;  %v3640_v21 = vadd.f32 %v3639_v62, %v3506_v15 }
 0x442   : > { %v2980_v22 = vpop.f32.mrf.mxu1 }
 0x443   : > { %v3708_v58 = vmax.f32 %v3046_v53, %v3640_v21  ;;  %v3509_v56 = vpop.f32.mrf.mxu2  ;;  %v2981_v36 = vadd.f32 %v2980_v22, %v2847_v12  ;;  %v7180_v53 = vld [vmem:[#allocation44_spill] sm:$0xff] }
 0x444   : > { %v7181_v21 = vmax.f32 %v7179_v41, %v7180_v53 }
 0x445   : > { %v3761_v11 = vadd.f32 %v6828_v13, %v3708_v58  ;;  %v2849_v48 = vpop.f32.mrf.mxu0  ;;  %v3047_v30 = vmax.f32 %v7169_v20, %v2981_v36  ;;  %v7182_v20 = vld [vmem:[#allocation45_spill] sm:$0xff] }
 0x447   : > { %v3810_v49 = vmax.f32 %v3761_v11, 0.0 }
 0x448   : > { %v3642_v9 = vpop.f32.mrf.mxu3 }
 0x449   : > { %3860 = vst.msk [vmem:[%s6529_s23 + $0x128] sm:$0xff] %vm3822_vm3, %v3810_v49  ;;  %v3643_v33 = vadd.f32 %v3642_v9, %v3509_v56 }
 0x44a   : > { %v2982_v38 = vpop.f32.mrf.mxu1 }
 0x44b   : > { %v3709_v50 = vmax.f32 %v3047_v30, %v3643_v33  ;;  %v3511_v24 = vpop.f32.mrf.mxu2  ;;  %v2983_v35 = vadd.f32 %v2982_v38, %v2849_v48  ;;  %v7183_v30 = vld [vmem:[#allocation46_spill] sm:$0xff] }
 0x44c   : > { %v7184_v33 = vmax.f32 %v7182_v20, %v7183_v30 }
 0x44d   : > { %v3762_v19 = vadd.f32 %v6828_v13, %v3709_v50  ;;  %v2852_v16 = vpop.f32.mrf.mxu0  ;;  %v3048_v47 = vmax.f32 %v7172_v37, %v2983_v35  ;;  %v7185_v37 = vld [vmem:[#allocation47_spill] sm:$0xff] }
 0x44f   : > { %v3811_v34 = vmax.f32 %v3762_v19, 0.0 }
 0x450   : > { %v3644_v39 = vpop.f32.mrf.mxu3 }
 0x451   : > { %3861 = vst.msk [vmem:[%s6529_s23 + $0x130] sm:$0xff] %vm3822_vm3, %v3811_v34  ;;  %v3645_v46 = vadd.f32 %v3644_v39, %v3511_v24 }
 0x452   : > { %v2985_v2 = vpop.f32.mrf.mxu1 }
 0x453   : > { %v3710_v29 = vmax.f32 %v3048_v47, %v3645_v46  ;;  %v3514_v25 = vpop.f32.mrf.mxu2  ;;  %v2986_v51 = vadd.f32 %v2985_v2, %v2852_v16  ;;  %v7186_v47 = vld [vmem:[#allocation48_spill] sm:$0xff] }
 0x454   : > { %v7187_v46 = vmax.f32 %v7185_v37, %v7186_v47 }
 0x455   : > { %v3763_v31 = vadd.f32 %v6828_v13, %v3710_v29  ;;  %v2854_v63 = vpop.f32.mrf.mxu0  ;;  %v3049_v17 = vmax.f32 %v7175_v18, %v2986_v51  ;;  %v7188_v18 = vld [vmem:[#allocation49_spill] sm:$0xff] }
 0x457   : > { %v3812_v60 = vmax.f32 %v3763_v31, 0.0 }
 0x458   : > { %v3647_v1 = vpop.f32.mrf.mxu3 }
 0x459   : > { %3862 = vst.msk [vmem:[%s6529_s23 + $0x138] sm:$0xff] %vm3822_vm3, %v3812_v60  ;;  %v3648_v26 = vadd.f32 %v3647_v1, %v3514_v25 }
 0x45a   : > { %v2987_v43 = vpop.f32.mrf.mxu1 }
 0x45b   : > { %v3711_v52 = vmax.f32 %v3049_v17, %v3648_v26  ;;  %v3516_v32 = vpop.f32.mrf.mxu2  ;;  %v2988_v10 = vadd.f32 %v2987_v43, %v2854_v63  ;;  %v7189_v17 = vld [vmem:[#allocation50_spill] sm:$0xff] }
 0x45c   : > { %v7190_v26 = vmax.f32 %v7188_v18, %v7189_v17 }
 0x45d   : > { %v3764_v54 = vadd.f32 %v6828_v13, %v3711_v52  ;;  %v2857_v4 = vpop.f32.mrf.mxu0  ;;  %v3050_v45 = vmax.f32 %v7178_v57, %v2988_v10  ;;  %v7191_v57 = vld [vmem:[#allocation51_spill] sm:$0xff] }
 0x45f   : > { %v3813_v42 = vmax.f32 %v3764_v54, 0.0 }
 0x460   : > { %v3649_v5 = vpop.f32.mrf.mxu3 }
 0x461   : > { %3863 = vst.msk [vmem:[%s6529_s23 + $0x140] sm:$0xff] %vm3822_vm3, %v3813_v42  ;;  %v3650_v55 = vadd.f32 %v3649_v5, %v3516_v32 }
 0x462   : > { %v2990_v15 = vpop.f32.mrf.mxu1 }
 0x463   : > { %v3712_v27 = vmax.f32 %v3050_v45, %v3650_v55  ;;  %v3519_v23 = vpop.f32.mrf.mxu2  ;;  %v2991_v28 = vadd.f32 %v2990_v15, %v2857_v4  ;;  %v7192_v45 = vld [vmem:[#allocation52_spill] sm:$0xff] }
 0x464   : > { %v7193_v55 = vmax.f32 %v7191_v57, %v7192_v45 }
 0x465   : > { %v3765_v12 = vadd.f32 %v6828_v13, %v3712_v27  ;;  %v2859_v62 = vpop.f32.mrf.mxu0  ;;  %v3051_v22 = vmax.f32 %v7181_v21, %v2991_v28  ;;  %v7194_v21 = vld [vmem:[#allocation53_spill] sm:$0xff] }
 0x467   : > { %v3814_v14 = vmax.f32 %v3765_v12, 0.0 }
 0x468   : > { %v3652_v7 = vpop.f32.mrf.mxu3 }
 0x469   : > { %3864 = vst.msk [vmem:[%s6529_s23 + $0x148] sm:$0xff] %vm3822_vm3, %v3814_v14  ;;  %v3653_v58 = vadd.f32 %v3652_v7, %v3519_v23 }
 0x46a   : > { %v2992_v56 = vpop.f32.mrf.mxu1 }
 0x46b   : > { %v3713_v11 = vmax.f32 %v3051_v22, %v3653_v58  ;;  %v3521_v36 = vpop.f32.mrf.mxu2  ;;  %v2993_v49 = vadd.f32 %v2992_v56, %v2859_v62  ;;  %v7195_v22 = vld [vmem:[#allocation54_spill] sm:$0xff] }
 0x46c   : > { %v7196_v58 = vmax.f32 %v7194_v21, %v7195_v22 }
 0x46d   : > { %v3766_v48 = vadd.f32 %v6828_v13, %v3713_v11  ;;  %v2862_v9 = vpop.f32.mrf.mxu0  ;;  %v3052_v38 = vmax.f32 %v7184_v33, %v2993_v49  ;;  %v7197_v33 = vld [vmem:[#allocation55_spill] sm:$0xff] }
 0x46f   : > { %v3815_v40 = vmax.f32 %v3766_v48, 0.0 }
 0x470   : > { %v3654_v44 = vpop.f32.mrf.mxu3 }
 0x471   : > { %3865 = vst.msk [vmem:[%s6529_s23 + $0x150] sm:$0xff] %vm3822_vm3, %v3815_v40  ;;  %v3655_v50 = vadd.f32 %v3654_v44, %v3521_v36 }
 0x472   : > { %v2995_v24 = vpop.f32.mrf.mxu1 }
 0x473   : > { %v3714_v19 = vmax.f32 %v3052_v38, %v3655_v50  ;;  %v3524_v35 = vpop.f32.mrf.mxu2  ;;  %v2996_v34 = vadd.f32 %v2995_v24, %v2862_v9  ;;  %v7198_v38 = vld [vmem:[#allocation56_spill] sm:$0xff] }
 0x474   : > { %v7199_v50 = vmax.f32 %v7197_v33, %v7198_v38 }
 0x475   : > { %v3767_v16 = vadd.f32 %v6828_v13, %v3714_v19  ;;  %v2864_v39 = vpop.f32.mrf.mxu0  ;;  %v3053_v2 = vmax.f32 %v7187_v46, %v2996_v34 }
 0x477   : > { %v3816_v6 = vmax.f32 %v3767_v16, 0.0 }
 0x478   : > { %v3657_v59 = vpop.f32.mrf.mxu3 }
 0x479   : > { %3866 = vst.msk [vmem:[%s6529_s23 + $0x158] sm:$0xff] %vm3822_vm3, %v3816_v6  ;;  %v3658_v29 = vadd.f32 %v3657_v59, %v3524_v35 }
 0x47a   : > { %v2997_v25 = vpop.f32.mrf.mxu1 }
 0x47b   : > { %v3715_v31 = vmax.f32 %v3053_v2, %v3658_v29  ;;  %v3526_v51 = vpop.f32.mrf.mxu2  ;;  %v2998_v60 = vadd.f32 %v2997_v25, %v2864_v39 }
 0x47d   : > { %v3768_v63 = vadd.f32 %v6828_v13, %v3715_v31  ;;  %v2867_v1 = vpop.f32.mrf.mxu0  ;;  %v3054_v43 = vmax.f32 %v7190_v26, %v2998_v60 }
 0x47f   : > { %v3817_v61 = vmax.f32 %v3768_v63, 0.0 }
 0x480   : > { %v3659_v3 = vpop.f32.mrf.mxu3 }
 0x481   : > { %3867 = vst.msk [vmem:[%s6529_s23 + $0x160] sm:$0xff] %vm3822_vm3, %v3817_v61  ;;  %v3660_v52 = vadd.f32 %v3659_v3, %v3526_v51 }
 0x482   : > { %v3000_v32 = vpop.f32.mrf.mxu1 }
 0x483   : > { %v3716_v54 = vmax.f32 %v3054_v43, %v3660_v52  ;;  %v3529_v10 = vpop.f32.mrf.mxu2  ;;  %v3001_v42 = vadd.f32 %v3000_v32, %v2867_v1 }
 0x485   : > { %v3769_v4 = vadd.f32 %v6828_v13, %v3716_v54  ;;  %v2869_v5 = vpop.f32.mrf.mxu0  ;;  %v3055_v15 = vmax.f32 %v7193_v55, %v3001_v42 }
 0x487   : > { %v3818_v8 = vmax.f32 %v3769_v4, 0.0 }
 0x488   : > { %v3662_v0 = vpop.f32.mrf.mxu3 }
 0x489   : > { %3868 = vst.msk [vmem:[%s6529_s23 + $0x168] sm:$0xff] %vm3822_vm3, %v3818_v8  ;;  %v3663_v27 = vadd.f32 %v3662_v0, %v3529_v10 }
 0x48a   : > { %v3002_v23 = vpop.f32.mrf.mxu1 }
 0x48b   : > { %v3717_v12 = vmax.f32 %v3055_v15, %v3663_v27  ;;  %v3531_v28 = vpop.f32.mrf.mxu2  ;;  %v3003_v14 = vadd.f32 %v3002_v23, %v2869_v5 }
 0x48d   : > { %v3770_v62 = vadd.f32 %v6828_v13, %v3717_v12  ;;  %v2872_v7 = vpop.f32.mrf.mxu0  ;;  %v3056_v56 = vmax.f32 %v7196_v58, %v3003_v14 }
 0x48f   : > { %v3819_v41 = vmax.f32 %v3770_v62, 0.0 }
 0x490   : > { %v3664_v53 = vpop.f32.mrf.mxu3 }
 0x491   : > { %3869 = vst.msk [vmem:[%s6529_s23 + $0x170] sm:$0xff] %vm3822_vm3, %v3819_v41  ;;  %v3665_v11 = vadd.f32 %v3664_v53, %v3531_v28 }
 0x492   : > { %v3005_v36 = vpop.f32.mrf.mxu1 }
 0x493   : > { %v3718_v48 = vmax.f32 %v3056_v56, %v3665_v11  ;;  %v3534_v49 = vpop.f32.mrf.mxu2  ;;  %v3006_v40 = vadd.f32 %v3005_v36, %v2872_v7 }
 0x495   : > { %v3771_v9 = vadd.f32 %v6828_v13, %v3718_v48  ;;  %v2874_v44 = vpop.f32.mrf.mxu0  ;;  %v3057_v24 = vmax.f32 %v7199_v50, %v3006_v40 }
 0x497   : > { %v3820_v20 = vmax.f32 %v3771_v9, 0.0 }
 0x498   : > { %v3667_v30 = vpop.f32.mrf.mxu3 }
 0x499   : > { %3870 = vst.msk [vmem:[%s6529_s23 + $0x178] sm:$0xff] %vm3822_vm3, %v3820_v20  ;;  %v3668_v19 = vadd.f32 %v3667_v30, %v3534_v49 }
 0x49a   : > { %v3007_v35 = vpop.f32.mrf.mxu1 }
 0x49b   : > { %v3719_v16 = vmax.f32 %v3057_v24, %v3668_v19  ;;  %v3536_v34 = vpop.f32.mrf.mxu2 }
 0x49d   : > { %v3772_v39 = vadd.f32 %v6828_v13, %v3719_v16 }
 0x49f   : > { %v3821_v6 = vmax.f32 %v3772_v39, 0.0 }
 0x4a0   : > { %v3669_v59 = vpop.f32.mrf.mxu3 }
 0x4a1   : > { %3871 = vst.msk [vmem:[%s6529_s23 + $0x180] sm:$0xff] %vm3822_vm3, %v3821_v6 }
 0x4a2 PF: > { %p10_p9 = scmp.ge.s32.totalorder %s5320_s16, 6   ;;  %s7200_s12 = smov %s5276_s13 }
 0x4a3   : > { %s7201_s13 = smov %s5329_s19  ;;  %s7202_s14 = smov %s5320_s16 }
 0x4a4   :  { %12 = sbr.rel (!%p10_p9) target bundleno = 2 (0x2), region = 108 }

// kernel: actor_forward.4
= control target key start
LH: loop header
LB: loop body
LE: loop exit
PB: predicated region body
PF: predicated region fallthrough
CT: control target
= control target key end

     0   :  { %vm365_vm0 = vcmask 64512   ;;  %vm378_vm1 = vcmask 58368   ;;  %s717_s1 = inlined_call_operand.vmem [shape: f32[128,8], index: 1, kind: input, shape index: {}]   ;;  %s718_s0 = inlined_call_operand.vmem [shape: f32[4,98,128], index: 0, kind: input, shape index: {}]   ;;  %s719_s2 = inlined_call_operand.vmem [shape: f32[1,8], index: 2, kind: input, shape index: {}]   ;;  %s720_s3 = inlined_call_operand.vmem [shape: f32[98,8], index: 3, kind: output, shape index: {}]  }
   0x1   :  { %v29_v0 = vld [vmem:[%s717_s1 + $0x78] sm:$0xff]  ;;  %v28_v1 = vld [vmem:[%s717_s1 + $0x70] sm:$0xff]  ;;  %v27_v2 = vld [vmem:[%s717_s1 + $0x68] sm:$0xff] }
   0x2   :  { %196 = vmatpush.msra.mxu2 %v29_v0  ;;  %279 = vmatpush.msra.mxu3 %v29_v0  ;;  %v26_v3 = vld [vmem:[%s717_s1 + $0x60] sm:$0xff]  ;;  %v25_v4 = vld [vmem:[%s717_s1 + $0x58] sm:$0xff]  ;;  %v24_v5 = vld [vmem:[%s717_s1 + $0x50] sm:$0xff] }
   0x3   :  { %43 = vmatpush.msra.mxu0 %v29_v0  ;;  %113 = vmatpush.msra.mxu1 %v29_v0  ;;  %v23_v6 = vld [vmem:[%s717_s1 + $0x48] sm:$0xff]  ;;  %v22_v7 = vld [vmem:[%s717_s1 + $0x40] sm:$0xff]  ;;  %v21_v8 = vld [vmem:[%s717_s1 + $0x38] sm:$0xff] }
   0x4   :  { %197 = vmatpush.msra.mxu2 %v28_v1  ;;  %280 = vmatpush.msra.mxu3 %v28_v1  ;;  %v20_v9 = vld [vmem:[%s717_s1 + $0x30] sm:$0xff]  ;;  %v19_v10 = vld [vmem:[%s717_s1 + $0x28] sm:$0xff]  ;;  %v18_v11 = vld [vmem:[%s717_s1 + $0x20] sm:$0xff] }
   0x5   :  { %44 = vmatpush.msra.mxu0 %v28_v1  ;;  %114 = vmatpush.msra.mxu1 %v28_v1  ;;  %v17_v12 = vld [vmem:[%s717_s1 + $0x18] sm:$0xff]  ;;  %v16_v13 = vld [vmem:[%s717_s1 + $0x10] sm:$0xff]  ;;  %v15_v14 = vld [vmem:[%s717_s1 + $0x8] sm:$0xff] }
   0x6   :  { %198 = vmatpush.msra.mxu2 %v27_v2  ;;  %281 = vmatpush.msra.mxu3 %v27_v2  ;;  %v14_v15 = vld [vmem:[%s717_s1] sm:$0xff]  ;;  %v397_v16 = vld [vmem:[%s718_s0 + $0xd0] sm:$0xff]  ;;  %v410_v17 = vld [vmem:[%s718_s0 + $0x138] sm:$0xff] }
   0x7   :  { %45 = vmatpush.msra.mxu0 %v27_v2  ;;  %115 = vmatpush.msra.mxu1 %v27_v2  ;;  %v30_v18 = vld [vmem:[%s718_s0] sm:$0xff]  ;;  %v384_v19 = vld [vmem:[%s718_s0 + $0x68] sm:$0xff]  ;;  %v398_v20 = vld [vmem:[%s718_s0 + $0xd8] sm:$0xff] }
   0x8   :  { %199 = vmatpush.msra.mxu2 %v26_v3  ;;  %282 = vmatpush.msra.mxu3 %v26_v3  ;;  %v411_v21 = vld [vmem:[%s718_s0 + $0x140] sm:$0xff]  ;;  %v31_v22 = vld [vmem:[%s718_s0 + $0x8] sm:$0xff]  ;;  %v385_v23 = vld [vmem:[%s718_s0 + $0x70] sm:$0xff] }
   0x9   :  { %46 = vmatpush.msra.mxu0 %v26_v3  ;;  %116 = vmatpush.msra.mxu1 %v26_v3  ;;  %v399_v24 = vld [vmem:[%s718_s0 + $0xe0] sm:$0xff]  ;;  %v412_v25 = vld [vmem:[%s718_s0 + $0x148] sm:$0xff]  ;;  %v32_v26 = vld [vmem:[%s718_s0 + $0x10] sm:$0xff] }
   0xa   :  { %200 = vmatpush.msra.mxu2 %v25_v4  ;;  %283 = vmatpush.msra.mxu3 %v25_v4  ;;  %v386_v27 = vld [vmem:[%s718_s0 + $0x78] sm:$0xff]  ;;  %v400_v28 = vld [vmem:[%s718_s0 + $0xe8] sm:$0xff]  ;;  %v413_v29 = vld [vmem:[%s718_s0 + $0x150] sm:$0xff] }
   0xb   :  { %47 = vmatpush.msra.mxu0 %v25_v4  ;;  %117 = vmatpush.msra.mxu1 %v25_v4  ;;  %v33_v30 = vld [vmem:[%s718_s0 + $0x18] sm:$0xff]  ;;  %v387_v31 = vld [vmem:[%s718_s0 + $0x80] sm:$0xff]  ;;  %v401_v32 = vld [vmem:[%s718_s0 + $0xf0] sm:$0xff] }
   0xc   :  { %201 = vmatpush.msra.mxu2 %v24_v5  ;;  %284 = vmatpush.msra.mxu3 %v24_v5  ;;  %v414_v33 = vld [vmem:[%s718_s0 + $0x158] sm:$0xff]  ;;  %v34_v34 = vld [vmem:[%s718_s0 + $0x20] sm:$0xff]  ;;  %v388_v35 = vld [vmem:[%s718_s0 + $0x88] sm:$0xff] }
   0xd   :  { %48 = vmatpush.msra.mxu0 %v24_v5  ;;  %118 = vmatpush.msra.mxu1 %v24_v5  ;;  %v402_v36 = vld [vmem:[%s718_s0 + $0xf8] sm:$0xff]  ;;  %v415_v37 = vld [vmem:[%s718_s0 + $0x160] sm:$0xff]  ;;  %v35_v38 = vld [vmem:[%s718_s0 + $0x28] sm:$0xff] }
   0xe   :  { %202 = vmatpush.msra.mxu2 %v23_v6  ;;  %285 = vmatpush.msra.mxu3 %v23_v6  ;;  %v389_v39 = vld [vmem:[%s718_s0 + $0x90] sm:$0xff]  ;;  %v403_v40 = vld [vmem:[%s718_s0 + $0x100] sm:$0xff]  ;;  %v416_v41 = vld [vmem:[%s718_s0 + $0x168] sm:$0xff] }
   0xf   :  { %49 = vmatpush.msra.mxu0 %v23_v6  ;;  %119 = vmatpush.msra.mxu1 %v23_v6  ;;  %v36_v42 = vld [vmem:[%s718_s0 + $0x30] sm:$0xff]  ;;  %v390_v43 = vld [vmem:[%s718_s0 + $0x98] sm:$0xff]  ;;  %v404_v44 = vld [vmem:[%s718_s0 + $0x108] sm:$0xff] }
  0x10   :  { %203 = vmatpush.msra.mxu2 %v22_v7  ;;  %286 = vmatpush.msra.mxu3 %v22_v7  ;;  %v417_v45 = vld [vmem:[%s718_s0 + $0x170] sm:$0xff]  ;;  %v37_v46 = vld [vmem:[%s718_s0 + $0x38] sm:$0xff]  ;;  %v391_v47 = vld [vmem:[%s718_s0 + $0xa0] sm:$0xff] }
  0x11   :  { %50 = vmatpush.msra.mxu0 %v22_v7  ;;  %120 = vmatpush.msra.mxu1 %v22_v7  ;;  %v405_v48 = vld [vmem:[%s718_s0 + $0x110] sm:$0xff]  ;;  %v418_v49 = vld [vmem:[%s718_s0 + $0x178] sm:$0xff]  ;;  %v38_v50 = vld [vmem:[%s718_s0 + $0x40] sm:$0xff] }
  0x12   :  { %204 = vmatpush.msra.mxu2 %v21_v8  ;;  %287 = vmatpush.msra.mxu3 %v21_v8  ;;  %v392_v51 = vld [vmem:[%s718_s0 + $0xa8] sm:$0xff]  ;;  %v406_v52 = vld [vmem:[%s718_s0 + $0x118] sm:$0xff]  ;;  %v419_v53 = vld [vmem:[%s718_s0 + $0x180] sm:$0xff] }
  0x13   :  { %51 = vmatpush.msra.mxu0 %v21_v8  ;;  %121 = vmatpush.msra.mxu1 %v21_v8  ;;  %v39_v54 = vld [vmem:[%s718_s0 + $0x48] sm:$0xff]  ;;  %v393_v55 = vld [vmem:[%s718_s0 + $0xb0] sm:$0xff]  ;;  %v407_v56 = vld [vmem:[%s718_s0 + $0x120] sm:$0xff] }
  0x14   :  { %205 = vmatpush.msra.mxu2 %v20_v9  ;;  %288 = vmatpush.msra.mxu3 %v20_v9  ;;  %v420_v57 = vld [vmem:[%s718_s0 + $0x188] sm:$0xff]  ;;  %v40_v58 = vld [vmem:[%s718_s0 + $0x50] sm:$0xff]  ;;  %v394_v59 = vld [vmem:[%s718_s0 + $0xb8] sm:$0xff] }
  0x15   :  { %52 = vmatpush.msra.mxu0 %v20_v9  ;;  %122 = vmatpush.msra.mxu1 %v20_v9  ;;  %v408_v60 = vld [vmem:[%s718_s0 + $0x128] sm:$0xff]  ;;  %v421_v61 = vld [vmem:[%s718_s0 + $0x190] sm:$0xff]  ;;  %v41_v62 = vld [vmem:[%s718_s0 + $0x58] sm:$0xff] }
  0x16   :  { %206 = vmatpush.msra.mxu2 %v19_v10  ;;  %289 = vmatpush.msra.mxu3 %v19_v10  ;;  %v395_v63 = vld [vmem:[%s718_s0 + $0xc0] sm:$0xff]  ;;  %v409_v0 = vld [vmem:[%s718_s0 + $0x130] sm:$0x3]  ;;  %v422_v1 = vld [vmem:[%s718_s0 + $0x198] sm:$0x3] }
  0x17   :  { %53 = vmatpush.msra.mxu0 %v19_v10  ;;  %123 = vmatpush.msra.mxu1 %v19_v10  ;;  %v42_v2 = vld [vmem:[%s718_s0 + $0x60] sm:$0x3]  ;;  %v396_v3 = vld [vmem:[%s718_s0 + $0xc8] sm:$0x3] }
  0x18   :  { %207 = vmatpush.msra.mxu2 %v18_v11  ;;  %290 = vmatpush.msra.mxu3 %v18_v11  ;;  %v651_v10 = vld [vmem:[%s719_s2] ss:$0 sm:$0xff] }
  0x19   :  { %54 = vmatpush.msra.mxu0 %v18_v11  ;;  %124 = vmatpush.msra.mxu1 %v18_v11 }
  0x1a   :  { %208 = vmatpush.msra.mxu2 %v17_v12  ;;  %291 = vmatpush.msra.mxu3 %v17_v12 }
  0x1b   :  { %55 = vmatpush.msra.mxu0 %v17_v12  ;;  %125 = vmatpush.msra.mxu1 %v17_v12 }
  0x1c   :  { %209 = vmatpush.msra.mxu2 %v16_v13  ;;  %292 = vmatpush.msra.mxu3 %v16_v13 }
  0x1d   :  { %56 = vmatpush.msra.mxu0 %v16_v13  ;;  %126 = vmatpush.msra.mxu1 %v16_v13 }
  0x1e   :  { %210 = vmatpush.msra.mxu2 %v15_v14  ;;  %293 = vmatpush.msra.mxu3 %v15_v14 }
  0x1f   :  { %57 = vmatpush.msra.mxu0 %v15_v14  ;;  %127 = vmatpush.msra.mxu1 %v15_v14 }
  0x20   :  { %211 = vmatpush.msra.mxu2 %v14_v15  ;;  %294 = vmatpush.msra.mxu3 %v14_v15 }
  0x21   :  { %212 = vmatmul.f32.vlgmr.msra.gmra.mxu2 %v397_v16  ;;  %295 = vmatmul.f32.vlgmr.msra.gmra.mxu3 %v410_v17 }
  0x22   :  { %58 = vmatpush.msra.mxu0 %v14_v15  ;;  %128 = vmatpush.msra.mxu1 %v14_v15 }
  0x23   :  { %59 = vmatmul.f32.vlgmr.msra.gmra.mxu0 %v30_v18  ;;  %129 = vmatmul.f32.vlgmr.msra.gmra.mxu1 %v384_v19 }
  0x29   :  { %215 = vmatmul.f32.gmra.mxu2 %v398_v20  ;;  %298 = vmatmul.f32.gmra.mxu3 %v411_v21 }
  0x2b   :  { %62 = vmatmul.f32.gmra.mxu0 %v31_v22  ;;  %132 = vmatmul.f32.gmra.mxu1 %v385_v23 }
  0x31   :  { %218 = vmatmul.f32.gmra.mxu2 %v399_v24  ;;  %301 = vmatmul.f32.gmra.mxu3 %v412_v25 }
  0x33   :  { %65 = vmatmul.f32.gmra.mxu0 %v32_v26  ;;  %135 = vmatmul.f32.gmra.mxu1 %v386_v27 }
  0x39   :  { %221 = vmatmul.f32.gmra.mxu2 %v400_v28  ;;  %304 = vmatmul.f32.gmra.mxu3 %v413_v29 }
  0x3b   :  { %68 = vmatmul.f32.gmra.mxu0 %v33_v30  ;;  %138 = vmatmul.f32.gmra.mxu1 %v387_v31 }
  0x41   :  { %224 = vmatmul.f32.gmra.mxu2 %v401_v32  ;;  %307 = vmatmul.f32.gmra.mxu3 %v414_v33 }
  0x43   :  { %71 = vmatmul.f32.gmra.mxu0 %v34_v34  ;;  %141 = vmatmul.f32.gmra.mxu1 %v388_v35 }
  0x49   :  { %227 = vmatmul.f32.gmra.mxu2 %v402_v36  ;;  %310 = vmatmul.f32.gmra.mxu3 %v415_v37 }
  0x4b   :  { %74 = vmatmul.f32.gmra.mxu0 %v35_v38  ;;  %144 = vmatmul.f32.gmra.mxu1 %v389_v39 }
  0x51   :  { %230 = vmatmul.f32.gmra.mxu2 %v403_v40  ;;  %313 = vmatmul.f32.gmra.mxu3 %v416_v41 }
  0x53   :  { %77 = vmatmul.f32.gmra.mxu0 %v36_v42  ;;  %147 = vmatmul.f32.gmra.mxu1 %v390_v43 }
  0x59   :  { %233 = vmatmul.f32.gmra.mxu2 %v404_v44  ;;  %316 = vmatmul.f32.gmra.mxu3 %v417_v45 }
  0x5b   :  { %80 = vmatmul.f32.gmra.mxu0 %v37_v46  ;;  %150 = vmatmul.f32.gmra.mxu1 %v391_v47 }
  0x61   :  { %236 = vmatmul.f32.gmra.mxu2 %v405_v48  ;;  %319 = vmatmul.f32.gmra.mxu3 %v418_v49 }
  0x63   :  { %83 = vmatmul.f32.gmra.mxu0 %v38_v50  ;;  %153 = vmatmul.f32.gmra.mxu1 %v392_v51 }
  0x69   :  { %239 = vmatmul.f32.gmra.mxu2 %v406_v52  ;;  %322 = vmatmul.f32.gmra.mxu3 %v419_v53 }
  0x6b   :  { %86 = vmatmul.f32.gmra.mxu0 %v39_v54  ;;  %156 = vmatmul.f32.gmra.mxu1 %v393_v55 }
  0x71   :  { %242 = vmatmul.f32.gmra.mxu2 %v407_v56  ;;  %325 = vmatmul.f32.gmra.mxu3 %v420_v57 }
  0x73   :  { %89 = vmatmul.f32.gmra.mxu0 %v40_v58  ;;  %159 = vmatmul.f32.gmra.mxu1 %v394_v59 }
  0x79   :  { %245 = vmatmul.f32.gmra.mxu2 %v408_v60  ;;  %328 = vmatmul.f32.gmra.mxu3 %v421_v61 }
  0x7b   :  { %92 = vmatmul.f32.gmra.mxu0 %v41_v62  ;;  %162 = vmatmul.f32.gmra.mxu1 %v395_v63 }
  0x81   :  { %248 = vmatmul.f32.gmra.mxu2 %v409_v0  ;;  %331 = vmatmul.f32.gmra.mxu3 %v422_v1 }
  0x83   :  { %95 = vmatmul.f32.gmra.mxu0 %v42_v2  ;;  %165 = vmatmul.f32.gmra.mxu1 %v396_v3 }
  0xa0   :  { %v60_v4 = vpop.f32.mrf.mxu0  ;;  %v130_v5 = vpop.f32.mrf.mxu1 }
  0xa1   :  { %v169_v6 = vmax.f32 %v60_v4, %v130_v5 }
  0xa4   :  { %v213_v7 = vpop.f32.mrf.mxu2  ;;  %v296_v8 = vpop.f32.mrf.mxu3 }
  0xa5   :  { %v252_v9 = vmax.f32 %v169_v6, %v213_v7 }
  0xa7   :  { %v335_v11 = vmax.f32 %v252_v9, %v296_v8 }
  0xa8   :  { %v63_v12 = vpop.f32.mrf.mxu0  ;;  %v133_v13 = vpop.f32.mrf.mxu1 }
  0xa9   :  { %v352_v14 = vadd.f32 %v651_v10, %v335_v11  ;;  %v170_v15 = vmax.f32 %v63_v12, %v133_v13 }
  0xab   :  { %366 = vst.msk [vmem:[%s720_s3] sm:$0xff] %vm365_vm0, %v352_v14 }
  0xac   :  { %v216_v16 = vpop.f32.mrf.mxu2  ;;  %v299_v17 = vpop.f32.mrf.mxu3 }
  0xad   :  { %v253_v18 = vmax.f32 %v170_v15, %v216_v16 }
  0xaf   :  { %v336_v19 = vmax.f32 %v253_v18, %v299_v17 }
  0xb0   :  { %v66_v20 = vpop.f32.mrf.mxu0  ;;  %v136_v21 = vpop.f32.mrf.mxu1 }
  0xb1   :  { %v353_v22 = vadd.f32 %v651_v10, %v336_v19  ;;  %v171_v23 = vmax.f32 %v66_v20, %v136_v21 }
  0xb3   :  { %367 = vst.msk [vmem:[%s720_s3 + $0x8] sm:$0xff] %vm365_vm0, %v353_v22 }
  0xb4   :  { %v219_v24 = vpop.f32.mrf.mxu2  ;;  %v302_v25 = vpop.f32.mrf.mxu3 }
  0xb5   :  { %v254_v26 = vmax.f32 %v171_v23, %v219_v24 }
  0xb7   :  { %v337_v27 = vmax.f32 %v254_v26, %v302_v25 }
  0xb8   :  { %v69_v28 = vpop.f32.mrf.mxu0  ;;  %v139_v29 = vpop.f32.mrf.mxu1 }
  0xb9   :  { %v354_v30 = vadd.f32 %v651_v10, %v337_v27  ;;  %v172_v31 = vmax.f32 %v69_v28, %v139_v29 }
  0xbb   :  { %368 = vst.msk [vmem:[%s720_s3 + $0x10] sm:$0xff] %vm365_vm0, %v354_v30 }
  0xbc   :  { %v222_v32 = vpop.f32.mrf.mxu2  ;;  %v305_v33 = vpop.f32.mrf.mxu3 }
  0xbd   :  { %v255_v34 = vmax.f32 %v172_v31, %v222_v32 }
  0xbf   :  { %v338_v35 = vmax.f32 %v255_v34, %v305_v33 }
  0xc0   :  { %v72_v36 = vpop.f32.mrf.mxu0  ;;  %v142_v37 = vpop.f32.mrf.mxu1 }
  0xc1   :  { %v355_v38 = vadd.f32 %v651_v10, %v338_v35  ;;  %v173_v39 = vmax.f32 %v72_v36, %v142_v37 }
  0xc3   :  { %369 = vst.msk [vmem:[%s720_s3 + $0x18] sm:$0xff] %vm365_vm0, %v355_v38 }
  0xc4   :  { %v225_v40 = vpop.f32.mrf.mxu2  ;;  %v308_v41 = vpop.f32.mrf.mxu3 }
  0xc5   :  { %v256_v42 = vmax.f32 %v173_v39, %v225_v40 }
  0xc7   :  { %v339_v43 = vmax.f32 %v256_v42, %v308_v41 }
  0xc8   :  { %v75_v44 = vpop.f32.mrf.mxu0  ;;  %v145_v45 = vpop.f32.mrf.mxu1 }
  0xc9   :  { %v356_v46 = vadd.f32 %v651_v10, %v339_v43  ;;  %v174_v47 = vmax.f32 %v75_v44, %v145_v45 }
  0xcb   :  { %370 = vst.msk [vmem:[%s720_s3 + $0x20] sm:$0xff] %vm365_vm0, %v356_v46 }
  0xcc   :  { %v228_v48 = vpop.f32.mrf.mxu2  ;;  %v311_v49 = vpop.f32.mrf.mxu3 }
  0xcd   :  { %v257_v50 = vmax.f32 %v174_v47, %v228_v48 }
  0xcf   :  { %v340_v51 = vmax.f32 %v257_v50, %v311_v49 }
  0xd0   :  { %v78_v52 = vpop.f32.mrf.mxu0  ;;  %v148_v53 = vpop.f32.mrf.mxu1 }
  0xd1   :  { %v357_v54 = vadd.f32 %v651_v10, %v340_v51  ;;  %v175_v55 = vmax.f32 %v78_v52, %v148_v53 }
  0xd3   :  { %371 = vst.msk [vmem:[%s720_s3 + $0x28] sm:$0xff] %vm365_vm0, %v357_v54 }
  0xd4   :  { %v231_v56 = vpop.f32.mrf.mxu2  ;;  %v314_v57 = vpop.f32.mrf.mxu3 }
  0xd5   :  { %v258_v58 = vmax.f32 %v175_v55, %v231_v56 }
  0xd7   :  { %v341_v59 = vmax.f32 %v258_v58, %v314_v57 }
  0xd8   :  { %v81_v60 = vpop.f32.mrf.mxu0  ;;  %v151_v61 = vpop.f32.mrf.mxu1 }
  0xd9   :  { %v358_v62 = vadd.f32 %v651_v10, %v341_v59  ;;  %v176_v63 = vmax.f32 %v81_v60, %v151_v61 }
  0xdb   :  { %372 = vst.msk [vmem:[%s720_s3 + $0x30] sm:$0xff] %vm365_vm0, %v358_v62 }
  0xdc   :  { %v234_v0 = vpop.f32.mrf.mxu2  ;;  %v317_v1 = vpop.f32.mrf.mxu3 }
  0xdd   :  { %v259_v2 = vmax.f32 %v176_v63, %v234_v0 }
  0xdf   :  { %v342_v3 = vmax.f32 %v259_v2, %v317_v1 }
  0xe0   :  { %v84_v4 = vpop.f32.mrf.mxu0  ;;  %v154_v5 = vpop.f32.mrf.mxu1 }
  0xe1   :  { %v359_v6 = vadd.f32 %v651_v10, %v342_v3  ;;  %v177_v7 = vmax.f32 %v84_v4, %v154_v5 }
  0xe3   :  { %373 = vst.msk [vmem:[%s720_s3 + $0x38] sm:$0xff] %vm365_vm0, %v359_v6 }
  0xe4   :  { %v237_v8 = vpop.f32.mrf.mxu2  ;;  %v320_v9 = vpop.f32.mrf.mxu3 }
  0xe5   :  { %v260_v11 = vmax.f32 %v177_v7, %v237_v8 }
  0xe7   :  { %v343_v12 = vmax.f32 %v260_v11, %v320_v9 }
  0xe8   :  { %v87_v13 = vpop.f32.mrf.mxu0  ;;  %v157_v14 = vpop.f32.mrf.mxu1 }
  0xe9   :  { %v360_v15 = vadd.f32 %v651_v10, %v343_v12  ;;  %v178_v16 = vmax.f32 %v87_v13, %v157_v14 }
  0xeb   :  { %374 = vst.msk [vmem:[%s720_s3 + $0x40] sm:$0xff] %vm365_vm0, %v360_v15 }
  0xec   :  { %v240_v17 = vpop.f32.mrf.mxu2  ;;  %v323_v18 = vpop.f32.mrf.mxu3 }
  0xed   :  { %v261_v19 = vmax.f32 %v178_v16, %v240_v17 }
  0xef   :  { %v344_v20 = vmax.f32 %v261_v19, %v323_v18 }
  0xf0   :  { %v90_v21 = vpop.f32.mrf.mxu0  ;;  %v160_v22 = vpop.f32.mrf.mxu1 }
  0xf1   :  { %v361_v23 = vadd.f32 %v651_v10, %v344_v20  ;;  %v179_v24 = vmax.f32 %v90_v21, %v160_v22 }
  0xf3   :  { %375 = vst.msk [vmem:[%s720_s3 + $0x48] sm:$0xff] %vm365_vm0, %v361_v23 }
  0xf4   :  { %v243_v25 = vpop.f32.mrf.mxu2  ;;  %v326_v26 = vpop.f32.mrf.mxu3 }
  0xf5   :  { %v262_v27 = vmax.f32 %v179_v24, %v243_v25 }
  0xf7   :  { %v345_v28 = vmax.f32 %v262_v27, %v326_v26 }
  0xf8   :  { %v93_v29 = vpop.f32.mrf.mxu0  ;;  %v163_v30 = vpop.f32.mrf.mxu1 }
  0xf9   :  { %v362_v31 = vadd.f32 %v651_v10, %v345_v28  ;;  %v180_v32 = vmax.f32 %v93_v29, %v163_v30 }
  0xfb   :  { %376 = vst.msk [vmem:[%s720_s3 + $0x50] sm:$0xff] %vm365_vm0, %v362_v31 }
  0xfc   :  { %v246_v33 = vpop.f32.mrf.mxu2  ;;  %v329_v34 = vpop.f32.mrf.mxu3 }
  0xfd   :  { %v263_v35 = vmax.f32 %v180_v32, %v246_v33 }
  0xff   :  { %v346_v36 = vmax.f32 %v263_v35, %v329_v34 }
 0x100   :  { %v96_v37 = vpop.f32.mrf.mxu0  ;;  %v166_v38 = vpop.f32.mrf.mxu1 }
 0x101   :  { %v363_v39 = vadd.f32 %v651_v10, %v346_v36  ;;  %v181_v40 = vmax.f32 %v96_v37, %v166_v38 }
 0x103   :  { %377 = vst.msk [vmem:[%s720_s3 + $0x58] sm:$0xff] %vm365_vm0, %v363_v39 }
 0x104   :  { %v249_v41 = vpop.f32.mrf.mxu2  ;;  %v332_v42 = vpop.f32.mrf.mxu3 }
 0x105   :  { %v264_v43 = vmax.f32 %v181_v40, %v249_v41 }
 0x107   :  { %v347_v44 = vmax.f32 %v264_v43, %v332_v42 }
 0x109   :  { %v364_v45 = vadd.f32 %v651_v10, %v347_v44 }
 0x10b   :  { %379 = vst.msk [vmem:[%s720_s3 + $0x60] sm:$0x3] %vm378_vm1, %v364_v45 }

// kernel: actor_forward.5
= control target key start
LH: loop header
LB: loop body
LE: loop exit
PB: predicated region body
PF: predicated region fallthrough
CT: control target
= control target key end

     0   :  { %16 = vsyncpa [#allocation3], 0  ;;  %s711_s0 = inlined_call_operand.vmem [shape: f32[2,392], index: 0, kind: input, shape index: {}]   ;;  %s712_s1 = inlined_call_operand.vmem [shape: f32[392,128], index: 1, kind: input, shape index: {}]   ;;  %s713_s2 = inlined_call_operand.vmem [shape: f32[1,128], index: 2, kind: input, shape index: {}]   ;;  %s714_s3 = inlined_call_operand.vmem [shape: f32[128,64], index: 3, kind: input, shape index: {}]   ;;  %s715_s4 = inlined_call_operand.vmem [shape: f32[1,64], index: 4, kind: input, shape index: {}]   ;;  %s716_s5 = inlined_call_operand.vmem [shape: f32[64,10], index: 5, kind: input, shape index: {}]   ;;  %s717_s6 = inlined_call_operand.vmem [shape: f32[1,10], index: 6, kind: input, shape index: {}]   ;;  %s718_s7 = inlined_call_operand.vmem [shape: f32[64,10], index: 7, kind: input, shape index: {}]   ;;  %s719_s8 = inlined_call_operand.vmem [shape: f32[1,10], index: 8, kind: input, shape index: {}]   ;;  %s720_s9 = inlined_call_operand.hbm [shape: f32[2,10], index: 9, kind: output, shape index: {0}]   ;;  %s721_s10 = inlined_call_operand.hbm [shape: f32[2,10], index: 10, kind: output, shape index: {1}]  }
   0x1   :  { %v84_v0 = vld [vmem:[%s712_s1 + $0x178] sm:$0xff]  ;;  %v83_v2 = vld [vmem:[%s712_s1 + $0x170] sm:$0xff]  ;;  %v82_v5 = vld [vmem:[%s712_s1 + $0x168] sm:$0xff] }
   0x2   :  { %v52_v1 = vld [vmem:[%s712_s1 + $0x78] sm:$0xff]  ;;  %142 = vmatpush.msra.mxu2 %v84_v0  ;;  %v51_v3 = vld [vmem:[%s712_s1 + $0x70] sm:$0xff]  ;;  %v50_v6 = vld [vmem:[%s712_s1 + $0x68] sm:$0xff] }
   0x3   :  { %102 = vmatpush.msra.mxu0 %v52_v1  ;;  %v68_v4 = vld [vmem:[%s712_s1 + $0xf8] sm:$0xff]  ;;  %v67_v7 = vld [vmem:[%s712_s1 + $0xf0] sm:$0xff]  ;;  %v66_v8 = vld [vmem:[%s712_s1 + $0xe8] sm:$0xff] }
   0x4   :  { %122 = vmatpush.msra.mxu1 %v68_v4  ;;  %143 = vmatpush.msra.mxu2 %v83_v2  ;;  %v81_v9 = vld [vmem:[%s712_s1 + $0x160] sm:$0xff]  ;;  %v80_v12 = vld [vmem:[%s712_s1 + $0x158] sm:$0xff]  ;;  %v79_v15 = vld [vmem:[%s712_s1 + $0x150] sm:$0xff] }
   0x5   :  { %103 = vmatpush.msra.mxu0 %v51_v3  ;;  %v49_v10 = vld [vmem:[%s712_s1 + $0x60] sm:$0xff]  ;;  %v48_v13 = vld [vmem:[%s712_s1 + $0x58] sm:$0xff]  ;;  %v47_v16 = vld [vmem:[%s712_s1 + $0x50] sm:$0xff] }
   0x6   :  { %123 = vmatpush.msra.mxu1 %v67_v7  ;;  %144 = vmatpush.msra.mxu2 %v82_v5  ;;  %v65_v11 = vld [vmem:[%s712_s1 + $0xe0] sm:$0xff]  ;;  %v64_v14 = vld [vmem:[%s712_s1 + $0xd8] sm:$0xff]  ;;  %v63_v17 = vld [vmem:[%s712_s1 + $0xd0] sm:$0xff] }
   0x7   :  { %104 = vmatpush.msra.mxu0 %v50_v6  ;;  %v78_v18 = vld [vmem:[%s712_s1 + $0x148] sm:$0xff]  ;;  %v77_v21 = vld [vmem:[%s712_s1 + $0x140] sm:$0xff]  ;;  %v76_v24 = vld [vmem:[%s712_s1 + $0x138] sm:$0xff] }
   0x8   :  { %124 = vmatpush.msra.mxu1 %v66_v8  ;;  %145 = vmatpush.msra.mxu2 %v81_v9  ;;  %v46_v19 = vld [vmem:[%s712_s1 + $0x48] sm:$0xff]  ;;  %v45_v22 = vld [vmem:[%s712_s1 + $0x40] sm:$0xff]  ;;  %v44_v25 = vld [vmem:[%s712_s1 + $0x38] sm:$0xff] }
   0x9   :  { %105 = vmatpush.msra.mxu0 %v49_v10  ;;  %v62_v20 = vld [vmem:[%s712_s1 + $0xc8] sm:$0xff]  ;;  %v61_v23 = vld [vmem:[%s712_s1 + $0xc0] sm:$0xff]  ;;  %v60_v26 = vld [vmem:[%s712_s1 + $0xb8] sm:$0xff] }
   0xa   :  { %125 = vmatpush.msra.mxu1 %v65_v11  ;;  %146 = vmatpush.msra.mxu2 %v80_v12  ;;  %v36_v27 = vld [vmem:[%s711_s0] sm:$0xff]  ;;  %v75_v28 = vld [vmem:[%s712_s1 + $0x130] sm:$0xff]  ;;  %v74_v31 = vld [vmem:[%s712_s1 + $0x128] sm:$0xff] }
   0xb   :  { %106 = vmatpush.msra.mxu0 %v48_v13  ;;  %v43_v29 = vld [vmem:[%s712_s1 + $0x30] sm:$0xff]  ;;  %91 = vst [vmem:[#allocation1] ss:$4 sm:$0xff] %v36_v27  ;;  %v85_v30 = vld [vmem:[%s712_s1 + $0x180] sm:$0xff]  ;;  %v198_v33 = vld [vmem:[%s714_s3 + $0x78] sm:$0xff] }
   0xc   :  { %126 = vmatpush.msra.mxu1 %v64_v14  ;;  %147 = vmatpush.msra.mxu2 %v79_v15  ;;  %v59_v32 = vld [vmem:[%s712_s1 + $0xb0] sm:$0xff]  ;;  %v42_v34 = vld [vmem:[%s712_s1 + $0x28] sm:$0xff]  ;;  %v73_v35 = vld [vmem:[%s712_s1 + $0x120] sm:$0xff] }
   0xd   :  { %107 = vmatpush.msra.mxu0 %v47_v16  ;;  %v41_v36 = vld [vmem:[%s712_s1 + $0x20] sm:$0xff]  ;;  %177 = vmatpush.msra.mxu3 %v85_v30  ;;  %v58_v37 = vld [vmem:[%s712_s1 + $0xa8] sm:$0xff]  ;;  %v197_v39 = vld [vmem:[%s714_s3 + $0x70] sm:$0xff] }
   0xe   :  { %127 = vmatpush.msra.mxu1 %v63_v17  ;;  %148 = vmatpush.msra.mxu2 %v78_v18  ;;  %v57_v38 = vld [vmem:[%s712_s1 + $0xa0] sm:$0xff]  ;;  %v196_v40 = vld [vmem:[%s714_s3 + $0x68] sm:$0xff] }
   0xf   :  { %108 = vmatpush.msra.mxu0 %v46_v19  ;;  %203 = vmatpush.msrb.mxu3 %v198_v33 }
  0x10   :  { %128 = vmatpush.msra.mxu1 %v62_v20  ;;  %149 = vmatpush.msra.mxu2 %v77_v21 }
  0x11   :  { %109 = vmatpush.msra.mxu0 %v45_v22 }
  0x12   :  { %129 = vmatpush.msra.mxu1 %v61_v23  ;;  %150 = vmatpush.msra.mxu2 %v76_v24 }
  0x13   :  { %110 = vmatpush.msra.mxu0 %v44_v25 }
  0x14   :  { %130 = vmatpush.msra.mxu1 %v60_v26  ;;  %151 = vmatpush.msra.mxu2 %v75_v28 }
  0x15   :  { %111 = vmatpush.msra.mxu0 %v43_v29 }
  0x16   :  { %131 = vmatpush.msra.mxu1 %v59_v32  ;;  %152 = vmatpush.msra.mxu2 %v74_v31 }
  0x17   :  { %112 = vmatpush.msra.mxu0 %v42_v34 }
  0x18   :  { %17 = vsyncpa [#allocation5], 0  ;;  %132 = vmatpush.msra.mxu1 %v58_v37  ;;  %v72_v41 = vld [vmem:[%s712_s1 + $0x118] sm:$0xff]  ;;  %204 = vmatpush.msrb.mxu3 %v197_v39  ;;  %vm99_vm0 = vcmask 64512   ;;  %v71_v44 = vld [vmem:[%s712_s1 + $0x110] sm:$0xff]  ;;  %vm236_vm1 = vcmask 523264  }
  0x19   :  { %v40_v42 = vld [vmem:[%s712_s1 + $0x18] sm:$0xff]  ;;  %153 = vmatpush.msra.mxu2 %v73_v35  ;;  %113 = vmatpush.msra.mxu0 %v41_v36  ;;  %v39_v45 = vld [vmem:[%s712_s1 + $0x10] sm:$0xff]  ;;  %v195_v48 = vld [vmem:[%s714_s3 + $0x60] sm:$0xff]  ;;  %vm292_vm2 = vcmask 74752   ;;  %s391_s16 = smov [#allocation4]   ;;  %s315_s18 = sshll.u32 %s721_s10, 4  ;;  %s316_s18 = int_to_ptr.hbm [resolvable:$true] %s315_s18 }
  0x1a   :  { %v56_v43 = vld [vmem:[%s712_s1 + $0x98] sm:$0xff]  ;;  %133 = vmatpush.msra.mxu1 %v57_v38  ;;  %205 = vmatpush.msrb.mxu3 %v196_v40  ;;  %v55_v47 = vld [vmem:[%s712_s1 + $0x90] sm:$0xff]  ;;  %v70_v49 = vld [vmem:[%s712_s1 + $0x108] sm:$0xff]  ;;  %s313_s0 = sshll.u32 %s391_s16, 4  ;;  %s314_s0 = int_to_ptr.vmem [resolvable:$true] %s313_s0 }
  0x1b   :  { %v95_v46 = vld.sshfl [vmem:[#allocation1 + $0x18] sm:$0xff pattern:$0x73625140]  ;;  %154 = vmatpush.msra.mxu2 %v72_v41  ;;  %114 = vmatpush.msra.mxu0 %v40_v42  ;;  %v38_v50 = vld [vmem:[%s712_s1 + $0x8] sm:$0xff]  ;;  %v69_v53 = vld [vmem:[%s712_s1 + $0x100] sm:$0xff] }
  0x1c   :  { %134 = vmatpush.msra.mxu1 %v56_v43  ;;  %329 = vmatmul.msk.f32.vlgmr.msra.gmra.mxu3 %vm99_vm0, %v95_v46  ;;  %v54_v51 = vld [vmem:[%s712_s1 + $0x88] sm:$0xff]  ;;  %v194_v52 = vld [vmem:[%s714_s3 + $0x58] sm:$0xff]  ;;  %v37_v54 = vld [vmem:[%s712_s1] sm:$0xff] }
  0x1d   :  { %155 = vmatpush.msra.mxu2 %v71_v44  ;;  %115 = vmatpush.msra.mxu0 %v39_v45  ;;  %v94_v55 = vld.sshfl [vmem:[#allocation1 + $0x10] sm:$0xff pattern:$0x73625140]  ;;  %v92_v56 = vld.sshfl [vmem:[#allocation1] sm:$0xff pattern:$0x73625140] }
  0x1e   :  { %135 = vmatpush.msra.mxu1 %v55_v47  ;;  %206 = vmatpush.msrb.mxu3 %v195_v48  ;;  %v53_v57 = vld [vmem:[%s712_s1 + $0x80] sm:$0xff]  ;;  %v193_v58 = vld [vmem:[%s714_s3 + $0x50] sm:$0xff]  ;;  %v93_v59 = vld.sshfl [vmem:[#allocation1 + $0x8] sm:$0xff pattern:$0x73625140] }
  0x1f   :  { %156 = vmatpush.msra.mxu2 %v70_v49  ;;  %116 = vmatpush.msra.mxu0 %v38_v50  ;;  %v192_v60 = vld [vmem:[%s714_s3 + $0x48] sm:$0xff]  ;;  %v191_v61 = vld [vmem:[%s714_s3 + $0x40] sm:$0xff]  ;;  %v190_v62 = vld [vmem:[%s714_s3 + $0x38] sm:$0xff] }
  0x20   :  { %136 = vmatpush.msra.mxu1 %v54_v51  ;;  %207 = vmatpush.msrb.mxu3 %v194_v52  ;;  %v189_v63 = vld [vmem:[%s714_s3 + $0x30] sm:$0xff]  ;;  %v188_v0 = vld [vmem:[%s714_s3 + $0x28] sm:$0xff]  ;;  %v187_v1 = vld [vmem:[%s714_s3 + $0x20] sm:$0xff] }
  0x21   :  { %157 = vmatpush.msra.mxu2 %v69_v53  ;;  %117 = vmatpush.msra.mxu0 %v37_v54  ;;  %v186_v2 = vld [vmem:[%s714_s3 + $0x18] sm:$0xff]  ;;  %v185_v3 = vld [vmem:[%s714_s3 + $0x10] sm:$0xff]  ;;  %v184_v4 = vld [vmem:[%s714_s3 + $0x8] sm:$0xff] }
  0x22   :  { %158 = vmatmul.f32.vlgmr.msra.gmra.mxu2 %v94_v55  ;;  %118 = vmatmul.f32.vlgmr.msra.gmra.mxu0 %v92_v56  ;;  %v183_v5 = vld [vmem:[%s714_s3] sm:$0xff]  ;;  %v231_v6 = vld [vmem:[%s716_s5 + $0x38] sm:$0xff]  ;;  %v230_v8 = vld [vmem:[%s716_s5 + $0x30] sm:$0xff] }
  0x23   :  { %137 = vmatpush.msra.mxu1 %v53_v57  ;;  %208 = vmatpush.msrb.mxu3 %v193_v58  ;;  %v267_v7 = vld [vmem:[%s718_s7 + $0x38] sm:$0xff]  ;;  %v266_v9 = vld [vmem:[%s718_s7 + $0x30] sm:$0xff]  ;;  %v229_v10 = vld [vmem:[%s716_s5 + $0x28] sm:$0xff] }
  0x24   :  { %138 = vmatmul.f32.vlgmr.msra.gmra.mxu1 %v93_v59  ;;  %248 = vmatpush.msrb.mxu0 %v231_v6  ;;  %v265_v11 = vld [vmem:[%s718_s7 + $0x28] sm:$0xff]  ;;  %v228_v12 = vld [vmem:[%s716_s5 + $0x20] sm:$0xff]  ;;  %v227_v14 = vld [vmem:[%s716_s5 + $0x18] sm:$0xff] }
  0x25   :  { %209 = vmatpush.msrb.mxu3 %v192_v60  ;;  %280 = vmatpush.msrb.mxu1 %v267_v7  ;;  %v264_v13 = vld [vmem:[%s718_s7 + $0x20] sm:$0xff]  ;;  %v263_v15 = vld [vmem:[%s718_s7 + $0x18] sm:$0xff]  ;;  %v226_v26 = vld [vmem:[%s716_s5 + $0x10] sm:$0xff] }
  0x26   :  { %249 = vmatpush.msrb.mxu0 %v230_v8  ;;  %v334_v16 = vld [vmem:[%s713_s2] ss:$0 sm:$0xff]  ;;  %v262_v27 = vld [vmem:[%s718_s7 + $0x10] sm:$0xff]  ;;  %v225_v28 = vld [vmem:[%s716_s5 + $0x8] sm:$0xff] }
  0x27   :  { %210 = vmatpush.msrb.mxu3 %v191_v61  ;;  %281 = vmatpush.msrb.mxu1 %v266_v9  ;;  %v261_v29 = vld [vmem:[%s718_s7 + $0x8] sm:$0xff]  ;;  %v224_v30 = vld [vmem:[%s716_s5] sm:$0xff] }
  0x28   :  { %250 = vmatpush.msrb.mxu0 %v229_v10  ;;  %v260_v31 = vld [vmem:[%s718_s7] sm:$0xff]  ;;  %s390_s7 = smov [#allocation2]  }
  0x29   :  { %211 = vmatpush.msrb.mxu3 %v190_v62  ;;  %282 = vmatpush.msrb.mxu1 %v265_v11  ;;  %v335_v32 = vld [vmem:[%s715_s4] ss:$0 sm:$0xff]  ;;  %s302_s13 = sshll.u32 %s390_s7, 4  ;;  %s304_s4 = sshll.u32 %s720_s9, 4  ;;  %s303_s13 = int_to_ptr.vmem [resolvable:$true] %s302_s13  ;;  %s305_s4 = int_to_ptr.hbm [resolvable:$true] %s304_s4 }
  0x2a   :  { %251 = vmatpush.msrb.mxu0 %v228_v12  ;;  %v336_v36 = vld [vmem:[%s717_s6] ss:$0 sm:$0xff] }
  0x2b   :  { %212 = vmatpush.msrb.mxu3 %v189_v63  ;;  %283 = vmatpush.msrb.mxu1 %v264_v13  ;;  %v337_v37 = vld [vmem:[%s719_s8] ss:$0 sm:$0xff] }
  0x2c   :  { %252 = vmatpush.msrb.mxu0 %v227_v14 }
  0x2d   :  { %213 = vmatpush.msrb.mxu3 %v188_v0  ;;  %284 = vmatpush.msrb.mxu1 %v263_v15 }
  0x2e   :  { %253 = vmatpush.msrb.mxu0 %v226_v26 }
  0x2f   :  { %214 = vmatpush.msrb.mxu3 %v187_v1  ;;  %285 = vmatpush.msrb.mxu1 %v262_v27 }
  0x30   :  { %254 = vmatpush.msrb.mxu0 %v225_v28 }
  0x31   :  { %215 = vmatpush.msrb.mxu3 %v186_v2  ;;  %286 = vmatpush.msrb.mxu1 %v261_v29 }
  0x32   :  { %255 = vmatpush.msrb.mxu0 %v224_v30 }
  0x33   :  { %216 = vmatpush.msrb.mxu3 %v185_v3  ;;  %287 = vmatpush.msrb.mxu1 %v260_v31 }
  0x35   :  { %217 = vmatpush.msrb.mxu3 %v184_v4 }
  0x37   :  { %218 = vmatpush.msrb.mxu3 %v183_v5 }
  0x9f   :  { %v119_v17 = vpop.f32.mrf.mxu0  ;;  %v179_v22 = vpop.f32.mrf.mxu3 }
  0xa0   :  { %v120_v18 = vadd.f32 %v334_v16, %v119_v17 }
  0xa1   :  { %v139_v19 = vpop.f32.mrf.mxu1 }
  0xa2   :  { %v140_v20 = vadd.f32 %v139_v19, %v120_v18 }
  0xa5   :  { %v159_v21 = vpop.f32.mrf.mxu2 }
  0xa6   :  { %v160_v23 = vadd.f32 %v159_v21, %v140_v20 }
  0xa8   :  { %v180_v24 = vadd.f32 %v179_v22, %v160_v23 }
  0xaa   :  { %v182_v25 = vmax.f32 %v180_v24, 0.0 }
  0xac   :  { %219 = vmatmul.f32.vlgmr.msrb.gmra.mxu3 %v182_v25 }
 0x12f   :  { %v220_v33 = vpop.f32.mrf.mxu3 }
 0x130   :  { %v221_v34 = vadd.f32 %v335_v32, %v220_v33 }
 0x132   :  { %v223_v35 = vmax.f32 %v221_v34, 0.0 }
 0x134   :  { %330 = vmatmul.msk.f32.vlgmr.msrb.gmra.mxu0 %vm236_vm1, %v223_v35  ;;  %331 = vmatmul.msk.f32.vlgmr.msrb.gmra.mxu1 %vm236_vm1, %v223_v35 }
 0x1b1   :  { %v257_v38 = vpop.f32.mrf.mxu0  ;;  %v289_v39 = vpop.f32.mrf.mxu1 }
 0x1b2   :  { %v258_v40 = vadd.f32 %v336_v36, %v257_v38  ;;  %v290_v41 = vadd.f32 %v337_v37, %v289_v39 }
 0x1b4   :  { %v294_v42 = vmax.f32 %v290_v41, -20.0  ;;  %293 = vst.msk [vmem:[#allocation2] sm:$0x3] %vm292_vm2, %v258_v40 }
 0x1b5   :  { %307 = dma.vmem_to_hbm [thread:$0]  %s303_s13, 32, %s305_s4, [#allocation3]  }
 0x1b6   :  { %v295_v43 = vmin.f32 %v294_v42, 2.0 }
 0x1b8   :  { %296 = vst.msk [vmem:[#allocation4] sm:$0x3] %vm292_vm2, %v295_v43 }
 0x1b9   :  { %318 = dma.vmem_to_hbm [thread:$0]  %s314_s0, 32, %s316_s18, [#allocation5]  }
 0x1ba   :  { %386 = dma.done.wait [#allocation3], 32  }
 0x1bb   :  { %387 = vsyncadd [#allocation3], 4294967264 }
 0x1bc   :  { %388 = dma.done.wait [#allocation5], 32  }
 0x1bd   :  { %389 = vsyncadd [#allocation5], 4294967264 }
 0x1be   :  { %327 = vsyncpa [#allocation3], 1 }
 0x1bf   :  { %328 = vsyncpa [#allocation5], 1 }

</bundles_post_ra>
